<compile_context>
chip_gen: v7x
topology: tpu7x:2x2x1
jax: 0.10.0
libtpu: 0.0.40
codegen_flags: <defaults>
</compile_context>

<pallas_src>
import math

import jax
import jax.numpy as jnp
from jax.experimental import pallas as pl
from jax.experimental.pallas import tpu as pltpu

# ---- synthetic "config" -----------------------------------------------------
D = 128          # bert_config.hidden_size
N_HEADS = 4      # config.n_heads
D_FF = 256       # config.d_ff
VOCAB = 64       # synthetic vocab
N_WINDOWS = 4    # config.n_windows
WIN_LEN = 8      # tokens per window (seq_len = N_WINDOWS * WIN_LEN)
E_LAYERS = 1     # synthetic tiny-BERT encoder depth
W_LAYERS = 1     # config.w_layers (decoder depth)
OUT_DIM = (4, 6) # output_dim = (seg classes, label classes)
LN_EPS = 1e-5
EMB_LN_EPS = 1e-12
HEAD_PAD = 128   # lane-dense padded width of the fused seg+cls head output

LAYER_KEYS = ("wq", "bq", "wk", "bk", "wv", "bv", "wo", "bo",
              "ln1_g", "ln1_b", "w1", "b1", "w2", "b2", "ln2_g", "ln2_b")

# number of weight refs the fused kernel expects (emb LN + layers + pe + fused heads)
N_WEIGHT_REFS = 2 + 16 * E_LAYERS + 16 * W_LAYERS + 4


# ---- small helpers ----------------------------------------------------------
def _ln(x, g, b, eps):
    mu = jnp.mean(x, axis=-1, keepdims=True)
    var = jnp.mean(jnp.square(x - mu), axis=-1, keepdims=True)
    return (x - mu) * jax.lax.rsqrt(var + eps) * g + b


def positional_encoding(length, d):
    pos = jnp.arange(length, dtype=jnp.float32)[:, None]
    div = jnp.exp(jnp.arange(0, d, 2, dtype=jnp.float32) * (-math.log(10000.0) / d))
    pe = jnp.zeros((length, d), jnp.float32)
    pe = pe.at[:, 0::2].set(jnp.sin(pos * div))
    pe = pe.at[:, 1::2].set(jnp.cos(pos * div))
    return pe


# ---- in-kernel transformer block (operates on loaded values) ------------------
def _block(xx, bias, lw, *, n_heads=N_HEADS, eps=LN_EPS):
    """xx: (L, D) f32; bias: (L, L) additive attention bias or None."""
    (wq, bq, wk, bk, wv, bv, wo, bo, g1, be1, w1, b1, w2, b2, g2, be2) = lw
    L, d = xx.shape
    dh = d // n_heads
    scale = 1.0 / math.sqrt(dh)

    xb = xx.astype(wq.dtype)                                        # bf16 MXU operands
    q = jnp.dot(xb, wq, preferred_element_type=jnp.float32) + bq    # (L, D) f32
    k = jnp.dot(xb, wk, preferred_element_type=jnp.float32) + bk
    v = jnp.dot(xb, wv, preferred_element_type=jnp.float32) + bv

    attn = None
    for h in range(n_heads):          # static loop; each head handles ALL windows at once
        sl = slice(h * dh, (h + 1) * dh)
        s = jax.lax.dot_general(q[:, sl], k[:, sl],
                                (((1,), (1,)), ((), ())),
                                preferred_element_type=jnp.float32) * scale
        if bias is not None:
            s = s + bias
        s = s - jnp.max(s, axis=-1, keepdims=True)
        e = jnp.exp(s)
        a = e * pl.reciprocal(jnp.sum(e, axis=-1, keepdims=True), approx=True)
        ctx_h = jnp.dot(a, v[:, sl], preferred_element_type=jnp.float32)     # (L, dh)
        # fold WO per head: concat(ctx) @ WO == sum_h ctx_h @ WO[h*dh:(h+1)*dh]
        part = jnp.dot(ctx_h.astype(wo.dtype), wo[sl, :],
                       preferred_element_type=jnp.float32)                   # (L, D)
        attn = part if attn is None else attn + part
    attn = attn + bo

    h1 = _ln(xx + attn, g1, be1, eps)
    f = jnp.maximum(jnp.dot(h1.astype(w1.dtype), w1,
                            preferred_element_type=jnp.float32) + b1, 0.0)
    f = jnp.dot(f.astype(w2.dtype), w2, preferred_element_type=jnp.float32) + b2
    return _ln(h1 + f, g2, be2, eps)


# ---- fused forward kernel (one grid step = one batch element) ------------------
def fused_kernel(x_ref, bias_ref, *refs):
    w_refs = refs[:N_WEIGHT_REFS]
    heads_ref, px_ref = refs[N_WEIGHT_REFS], refs[N_WEIGHT_REFS + 1]

    it = iter(w_refs)
    emb_g = next(it)[...]
    emb_b = next(it)[...]
    enc = [tuple(next(it)[...] for _ in range(16)) for _ in range(E_LAYERS)]
    dec = [tuple(next(it)[...] for _ in range(16)) for _ in range(W_LAYERS)]
    pe = next(it)[...]
    hw_seg = next(it)[...]
    hw_cls = next(it)[...]
    hb = next(it)[...]

    xx = x_ref[...].astype(jnp.float32)            # (w*win_len, D) flattened windows
    bias = bias_ref[...].astype(jnp.float32)       # (w*win_len, w*win_len) block-diag mask

    # synthetic BERT: embedding LayerNorm + encoder layer(s) with per-window attention
    xx = _ln(xx, emb_g, emb_b, EMB_LN_EPS)
    for lw in enc:
        xx = _block(xx, bias, lw)

    # cls_pooling: pick row 0 of every window via a tiny selection matmul (MXU, no gather)
    l_tot = xx.shape[0]
    w = pe.shape[0]
    win_len = l_tot // w
    win_id = jax.lax.broadcasted_iota(jnp.int32, (w, l_tot), 0)
    pos_id = jax.lax.broadcasted_iota(jnp.int32, (w, l_tot), 1)
    sel = (pos_id == win_id * win_len).astype(jnp.float32)        # (w, l_tot)
    hx = jnp.dot(sel, xx, preferred_element_type=jnp.float32)     # (w, D)

    # decoder: h += pe(h); full attention over the w window embeddings (segs=None -> no mask)
    hd = hx + pe
    for lw in dec:
        hd = _block(hd, None, lw)

    px_ref[...] = hd.astype(px_ref.dtype)

    # fused lane-dense output heads: lanes [0:4] = seg_output(hx), lanes [4:10] = cls_output(px)
    heads = (jnp.dot(hx.astype(hw_seg.dtype), hw_seg, preferred_element_type=jnp.float32)
             + jnp.dot(hd.astype(hw_cls.dtype), hw_cls, preferred_element_type=jnp.float32)
             + hb)
    heads_ref[...] = heads.astype(heads_ref.dtype)


# ---- deterministic parameter initialization ----------------------------------
def _dense(key, shape, dtype=jnp.float32):
    return (0.02 * jax.random.normal(key, shape)).astype(dtype)


def layer_params(key):
    ks = jax.random.split(key, 6)
    z = lambda n: jnp.zeros((1, n), jnp.float32)
    o = lambda n: jnp.ones((1, n), jnp.float32)
    bf = jnp.bfloat16
    return {
        "wq": _dense(ks[0], (D, D), bf), "bq": z(D),
        "wk": _dense(ks[1], (D, D), bf), "bk": z(D),
        "wv": _dense(ks[2], (D, D), bf), "bv": z(D),
        "wo": _dense(ks[3], (D, D), bf), "bo": z(D),
        "ln1_g": o(D), "ln1_b": z(D),
        "w1": _dense(ks[4], (D, D_FF), bf), "b1": z(D_FF),
        "w2": _dense(ks[5], (D_FF, D), bf), "b2": z(D),
        "ln2_g": o(D), "ln2_b": z(D),
    }


def init_params(key):
    ks = jax.random.split(key, 6 + E_LAYERS + W_LAYERS)
    return {
        "tok_emb": _dense(ks[0], (VOCAB, D)),
        "pos_emb": _dense(ks[1], (WIN_LEN, D)),
        "emb_ln_g": jnp.ones((1, D), jnp.float32),
        "emb_ln_b": jnp.zeros((1, D), jnp.float32),
        "enc_layers": [layer_params(ks[2 + i]) for i in range(E_LAYERS)],
        "dec_layers": [layer_params(ks[2 + E_LAYERS + i]) for i in range(W_LAYERS)],
        "seg_W": _dense(ks[-4], (D, OUT_DIM[0]), jnp.bfloat16),
        "seg_b": jnp.zeros((1, OUT_DIM[0]), jnp.float32),
        "cls_W": _dense(ks[-3], (D, OUT_DIM[1]), jnp.bfloat16),
        "cls_b": jnp.zeros((1, OUT_DIM[1]), jnp.float32),
    }


# ---- forward (mirrors ChainOfExperts.forward) --------------------------------
def chain_of_experts_forward(params, x, attention_mask):
    b, seq = x.shape
    w = N_WINDOWS
    win_len = seq // w
    n_seg, n_cls = OUT_DIM

    # _fill_masking: force position 0 of every window to be attended ([CLS]).
    cls_idx = jnp.arange(w, dtype=jnp.int32) * win_len
    attention_mask = attention_mask.at[:, cls_idx].set(1)
    mask = attention_mask.astype(jnp.float32)                     # (b, seq)

    # embedding gather (glue); the embedding LayerNorm runs inside the kernel.
    pos = jnp.tile(params["pos_emb"], (w, 1))                     # (seq, D), per-window positions
    h_emb = params["tok_emb"][x] + pos[None, :, :]                # (b, seq, D)

    # additive attention bias: per-window (block-diagonal) attention + key padding mask
    win_of = jnp.arange(seq, dtype=jnp.int32) // win_len
    same_win = win_of[:, None] == win_of[None, :]                 # (seq, seq)
    allowed = same_win[None, :, :] & (mask[:, None, :] > 0.0)     # (b, seq, seq)
    bias = jnp.where(allowed, 0.0, -1e9).astype(jnp.float32)

    # fused, lane-dense output head weights (lanes 0:4 seg on hx, 4:10 cls on px, rest zero)
    hw_seg = jnp.zeros((D, HEAD_PAD), jnp.bfloat16).at[:, :n_seg].set(params["seg_W"])
    hw_cls = jnp.zeros((D, HEAD_PAD), jnp.bfloat16).at[:, n_seg:n_seg + n_cls].set(params["cls_W"])
    hb = (jnp.zeros((1, HEAD_PAD), jnp.float32)
          .at[:, :n_seg].set(params["seg_b"])
          .at[:, n_seg:n_seg + n_cls].set(params["cls_b"]))

    pe_dec = positional_encoding(w, D)

    weights = [params["emb_ln_g"], params["emb_ln_b"]]
    for lp in params["enc_layers"]:
        weights += [lp[k] for k in LAYER_KEYS]
    for lp in params["dec_layers"]:
        weights += [lp[k] for k in LAYER_KEYS]
    weights += [pe_dec, hw_seg, hw_cls, hb]
    assert len(weights) == N_WEIGHT_REFS

    def full_spec(a):
        nd = a.ndim
        return pl.BlockSpec(a.shape, lambda i, _nd=nd: (0,) * _nd)

    heads_pad, px3 = pl.pallas_call(
        fused_kernel,
        out_shape=(jax.ShapeDtypeStruct((b, w, HEAD_PAD), jnp.float32),
                   jax.ShapeDtypeStruct((b, w, D), jnp.float32)),
        grid=(b,),
        in_specs=[pl.BlockSpec((None, seq, D), lambda i: (i, 0, 0)),
                  pl.BlockSpec((None, seq, seq), lambda i: (i, 0, 0))]
                 + [full_spec(a) for a in weights],
        out_specs=[pl.BlockSpec((None, w, HEAD_PAD), lambda i: (i, 0, 0)),
                   pl.BlockSpec((None, w, D), lambda i: (i, 0, 0))],
        compiler_params=pltpu.CompilerParams(dimension_semantics=("parallel",)),
    )(h_emb, bias, *weights)

    segs = heads_pad[:, :, :n_seg].reshape(b * w, n_seg)
    labeling = heads_pad[:, :, n_seg:n_seg + n_cls].reshape(b * w, n_cls)
    px = px3.reshape(b * w, D)
    return segs, labeling, px
    # TODO(synk): sim_loss / seg_masking branches are dead in forward() (segs=None) and are not modelled.


if __name__ == "__main__":
    params = init_params(jax.random.PRNGKey(1))
    kx, km = jax.random.split(jax.random.PRNGKey(0))
    b = 2
    seq = N_WINDOWS * WIN_LEN
    x = jax.random.randint(kx, (b, seq), 0, VOCAB, dtype=jnp.int32)
    attention_mask = (jax.random.uniform(km, (b, seq)) > 0.3).astype(jnp.int32)

    fwd = jax.jit(chain_of_experts_forward)
    segs, labeling, px = fwd(params, x, attention_mask)
    jax.block_until_ready((segs, labeling, px))

    assert segs.shape == (b * N_WINDOWS, OUT_DIM[0])
    assert labeling.shape == (b * N_WINDOWS, OUT_DIM[1])
    assert px.shape == (b * N_WINDOWS, D)
    assert bool(jnp.all(jnp.isfinite(segs))) and bool(jnp.all(jnp.isfinite(labeling)))
    print("KERNEL_OK")
</pallas_src>

<mosaic_0001>
module attributes {stable_mosaic.version = 11 : i64} {
  func.func @fused_kernel(%arg0: i32, %arg1: memref<1x32x128xf32, #tpu.memory_space<vmem>>, %arg2: memref<1x32x32xf32, #tpu.memory_space<vmem>>, %arg3: memref<1x128xf32, #tpu.memory_space<vmem>>, %arg4: memref<1x128xf32, #tpu.memory_space<vmem>>, %arg5: memref<128x128xbf16, #tpu.memory_space<vmem>>, %arg6: memref<1x128xf32, #tpu.memory_space<vmem>>, %arg7: memref<128x128xbf16, #tpu.memory_space<vmem>>, %arg8: memref<1x128xf32, #tpu.memory_space<vmem>>, %arg9: memref<128x128xbf16, #tpu.memory_space<vmem>>, %arg10: memref<1x128xf32, #tpu.memory_space<vmem>>, %arg11: memref<128x128xbf16, #tpu.memory_space<vmem>>, %arg12: memref<1x128xf32, #tpu.memory_space<vmem>>, %arg13: memref<1x128xf32, #tpu.memory_space<vmem>>, %arg14: memref<1x128xf32, #tpu.memory_space<vmem>>, %arg15: memref<128x256xbf16, #tpu.memory_space<vmem>>, %arg16: memref<1x256xf32, #tpu.memory_space<vmem>>, %arg17: memref<256x128xbf16, #tpu.memory_space<vmem>>, %arg18: memref<1x128xf32, #tpu.memory_space<vmem>>, %arg19: memref<1x128xf32, #tpu.memory_space<vmem>>, %arg20: memref<1x128xf32, #tpu.memory_space<vmem>>, %arg21: memref<128x128xbf16, #tpu.memory_space<vmem>>, %arg22: memref<1x128xf32, #tpu.memory_space<vmem>>, %arg23: memref<128x128xbf16, #tpu.memory_space<vmem>>, %arg24: memref<1x128xf32, #tpu.memory_space<vmem>>, %arg25: memref<128x128xbf16, #tpu.memory_space<vmem>>, %arg26: memref<1x128xf32, #tpu.memory_space<vmem>>, %arg27: memref<128x128xbf16, #tpu.memory_space<vmem>>, %arg28: memref<1x128xf32, #tpu.memory_space<vmem>>, %arg29: memref<1x128xf32, #tpu.memory_space<vmem>>, %arg30: memref<1x128xf32, #tpu.memory_space<vmem>>, %arg31: memref<128x256xbf16, #tpu.memory_space<vmem>>, %arg32: memref<1x256xf32, #tpu.memory_space<vmem>>, %arg33: memref<256x128xbf16, #tpu.memory_space<vmem>>, %arg34: memref<1x128xf32, #tpu.memory_space<vmem>>, %arg35: memref<1x128xf32, #tpu.memory_space<vmem>>, %arg36: memref<1x128xf32, #tpu.memory_space<vmem>>, %arg37: memref<4x128xf32, #tpu.memory_space<vmem>>, %arg38: memref<128x128xbf16, #tpu.memory_space<vmem>>, %arg39: memref<128x128xbf16, #tpu.memory_space<vmem>>, %arg40: memref<1x128xf32, #tpu.memory_space<vmem>>, %arg41: memref<1x4x128xf32, #tpu.memory_space<vmem>>, %arg42: memref<1x4x128xf32, #tpu.memory_space<vmem>>) attributes {dimension_semantics = [#tpu.dimension_semantics<parallel>], iteration_bounds = array<i64: 2>, scalar_prefetch = 0 : i64, scratch_operands = 0 : i64, tpu.core_type = #tpu.core_type<tc>, window_params = [{transform_indices = @transform_0, window_bounds = array<i64: 1, 32, 128>}, {transform_indices = @transform_1, window_bounds = array<i64: 1, 32, 32>}, {pipeline_mode = #tpu.pipeline_mode<synchronous>, transform_indices = @transform_2, window_bounds = array<i64: 1, 128>}, {pipeline_mode = #tpu.pipeline_mode<synchronous>, transform_indices = @transform_3, window_bounds = array<i64: 1, 128>}, {pipeline_mode = #tpu.pipeline_mode<synchronous>, transform_indices = @transform_4, window_bounds = array<i64: 128, 128>}, {pipeline_mode = #tpu.pipeline_mode<synchronous>, transform_indices = @transform_5, window_bounds = array<i64: 1, 128>}, {pipeline_mode = #tpu.pipeline_mode<synchronous>, transform_indices = @transform_6, window_bounds = array<i64: 128, 128>}, {pipeline_mode = #tpu.pipeline_mode<synchronous>, transform_indices = @transform_7, window_bounds = array<i64: 1, 128>}, {pipeline_mode = #tpu.pipeline_mode<synchronous>, transform_indices = @transform_8, window_bounds = array<i64: 128, 128>}, {pipeline_mode = #tpu.pipeline_mode<synchronous>, transform_indices = @transform_9, window_bounds = array<i64: 1, 128>}, {pipeline_mode = #tpu.pipeline_mode<synchronous>, transform_indices = @transform_10, window_bounds = array<i64: 128, 128>}, {pipeline_mode = #tpu.pipeline_mode<synchronous>, transform_indices = @transform_11, window_bounds = array<i64: 1, 128>}, {pipeline_mode = #tpu.pipeline_mode<synchronous>, transform_indices = @transform_12, window_bounds = array<i64: 1, 128>}, {pipeline_mode = #tpu.pipeline_mode<synchronous>, transform_indices = @transform_13, window_bounds = array<i64: 1, 128>}, {pipeline_mode = #tpu.pipeline_mode<synchronous>, transform_indices = @transform_14, window_bounds = array<i64: 128, 256>}, {pipeline_mode = #tpu.pipeline_mode<synchronous>, transform_indices = @transform_15, window_bounds = array<i64: 1, 256>}, {pipeline_mode = #tpu.pipeline_mode<synchronous>, transform_indices = @transform_16, window_bounds = array<i64: 256, 128>}, {pipeline_mode = #tpu.pipeline_mode<synchronous>, transform_indices = @transform_17, window_bounds = array<i64: 1, 128>}, {pipeline_mode = #tpu.pipeline_mode<synchronous>, transform_indices = @transform_18, window_bounds = array<i64: 1, 128>}, {pipeline_mode = #tpu.pipeline_mode<synchronous>, transform_indices = @transform_19, window_bounds = array<i64: 1, 128>}, {pipeline_mode = #tpu.pipeline_mode<synchronous>, transform_indices = @transform_20, window_bounds = array<i64: 128, 128>}, {pipeline_mode = #tpu.pipeline_mode<synchronous>, transform_indices = @transform_21, window_bounds = array<i64: 1, 128>}, {pipeline_mode = #tpu.pipeline_mode<synchronous>, transform_indices = @transform_22, window_bounds = array<i64: 128, 128>}, {pipeline_mode = #tpu.pipeline_mode<synchronous>, transform_indices = @transform_23, window_bounds = array<i64: 1, 128>}, {pipeline_mode = #tpu.pipeline_mode<synchronous>, transform_indices = @transform_24, window_bounds = array<i64: 128, 128>}, {pipeline_mode = #tpu.pipeline_mode<synchronous>, transform_indices = @transform_25, window_bounds = array<i64: 1, 128>}, {pipeline_mode = #tpu.pipeline_mode<synchronous>, transform_indices = @transform_26, window_bounds = array<i64: 128, 128>}, {pipeline_mode = #tpu.pipeline_mode<synchronous>, transform_indices = @transform_27, window_bounds = array<i64: 1, 128>}, {pipeline_mode = #tpu.pipeline_mode<synchronous>, transform_indices = @transform_28, window_bounds = array<i64: 1, 128>}, {pipeline_mode = #tpu.pipeline_mode<synchronous>, transform_indices = @transform_29, window_bounds = array<i64: 1, 128>}, {pipeline_mode = #tpu.pipeline_mode<synchronous>, transform_indices = @transform_30, window_bounds = array<i64: 128, 256>}, {pipeline_mode = #tpu.pipeline_mode<synchronous>, transform_indices = @transform_31, window_bounds = array<i64: 1, 256>}, {pipeline_mode = #tpu.pipeline_mode<synchronous>, transform_indices = @transform_32, window_bounds = array<i64: 256, 128>}, {pipeline_mode = #tpu.pipeline_mode<synchronous>, transform_indices = @transform_33, window_bounds = array<i64: 1, 128>}, {pipeline_mode = #tpu.pipeline_mode<synchronous>, transform_indices = @transform_34, window_bounds = array<i64: 1, 128>}, {pipeline_mode = #tpu.pipeline_mode<synchronous>, transform_indices = @transform_35, window_bounds = array<i64: 1, 128>}, {pipeline_mode = #tpu.pipeline_mode<synchronous>, transform_indices = @transform_36, window_bounds = array<i64: 4, 128>}, {pipeline_mode = #tpu.pipeline_mode<synchronous>, transform_indices = @transform_37, window_bounds = array<i64: 128, 128>}, {pipeline_mode = #tpu.pipeline_mode<synchronous>, transform_indices = @transform_38, window_bounds = array<i64: 128, 128>}, {pipeline_mode = #tpu.pipeline_mode<synchronous>, transform_indices = @transform_39, window_bounds = array<i64: 1, 128>}, {transform_indices = @transform_40, window_bounds = array<i64: 1, 4, 128>}, {transform_indices = @transform_41, window_bounds = array<i64: 1, 4, 128>}]} {
    %c0 = arith.constant 0 : index
    %c0_0 = arith.constant 0 : index
    %0 = vector.load %arg3[%c0, %c0_0] : memref<1x128xf32, #tpu.memory_space<vmem>>, vector<1x128xf32>
    %c0_1 = arith.constant 0 : index
    %c0_2 = arith.constant 0 : index
    %1 = vector.load %arg4[%c0_1, %c0_2] : memref<1x128xf32, #tpu.memory_space<vmem>>, vector<1x128xf32>
    %c0_3 = arith.constant 0 : index
    %c0_4 = arith.constant 0 : index
    %2 = vector.load %arg5[%c0_3, %c0_4] : memref<128x128xbf16, #tpu.memory_space<vmem>>, vector<128x128xbf16>
    %c0_5 = arith.constant 0 : index
    %c0_6 = arith.constant 0 : index
    %3 = vector.load %arg6[%c0_5, %c0_6] : memref<1x128xf32, #tpu.memory_space<vmem>>, vector<1x128xf32>
    %c0_7 = arith.constant 0 : index
    %c0_8 = arith.constant 0 : index
    %4 = vector.load %arg7[%c0_7, %c0_8] : memref<128x128xbf16, #tpu.memory_space<vmem>>, vector<128x128xbf16>
    %c0_9 = arith.constant 0 : index
    %c0_10 = arith.constant 0 : index
    %5 = vector.load %arg8[%c0_9, %c0_10] : memref<1x128xf32, #tpu.memory_space<vmem>>, vector<1x128xf32>
    %c0_11 = arith.constant 0 : index
    %c0_12 = arith.constant 0 : index
    %6 = vector.load %arg9[%c0_11, %c0_12] : memref<128x128xbf16, #tpu.memory_space<vmem>>, vector<128x128xbf16>
    %c0_13 = arith.constant 0 : index
    %c0_14 = arith.constant 0 : index
    %7 = vector.load %arg10[%c0_13, %c0_14] : memref<1x128xf32, #tpu.memory_space<vmem>>, vector<1x128xf32>
    %c0_15 = arith.constant 0 : index
    %c0_16 = arith.constant 0 : index
    %8 = vector.load %arg11[%c0_15, %c0_16] : memref<128x128xbf16, #tpu.memory_space<vmem>>, vector<128x128xbf16>
    %c0_17 = arith.constant 0 : index
    %c0_18 = arith.constant 0 : index
    %9 = vector.load %arg12[%c0_17, %c0_18] : memref<1x128xf32, #tpu.memory_space<vmem>>, vector<1x128xf32>
    %c0_19 = arith.constant 0 : index
    %c0_20 = arith.constant 0 : index
    %10 = vector.load %arg13[%c0_19, %c0_20] : memref<1x128xf32, #tpu.memory_space<vmem>>, vector<1x128xf32>
    %c0_21 = arith.constant 0 : index
    %c0_22 = arith.constant 0 : index
    %11 = vector.load %arg14[%c0_21, %c0_22] : memref<1x128xf32, #tpu.memory_space<vmem>>, vector<1x128xf32>
    %c0_23 = arith.constant 0 : index
    %c0_24 = arith.constant 0 : index
    %12 = vector.load %arg15[%c0_23, %c0_24] : memref<128x256xbf16, #tpu.memory_space<vmem>>, vector<128x256xbf16>
    %c0_25 = arith.constant 0 : index
    %c0_26 = arith.constant 0 : index
    %13 = vector.load %arg16[%c0_25, %c0_26] : memref<1x256xf32, #tpu.memory_space<vmem>>, vector<1x256xf32>
    %c0_27 = arith.constant 0 : index
    %c0_28 = arith.constant 0 : index
    %14 = vector.load %arg17[%c0_27, %c0_28] : memref<256x128xbf16, #tpu.memory_space<vmem>>, vector<256x128xbf16>
    %c0_29 = arith.constant 0 : index
    %c0_30 = arith.constant 0 : index
    %15 = vector.load %arg18[%c0_29, %c0_30] : memref<1x128xf32, #tpu.memory_space<vmem>>, vector<1x128xf32>
    %c0_31 = arith.constant 0 : index
    %c0_32 = arith.constant 0 : index
    %16 = vector.load %arg19[%c0_31, %c0_32] : memref<1x128xf32, #tpu.memory_space<vmem>>, vector<1x128xf32>
    %c0_33 = arith.constant 0 : index
    %c0_34 = arith.constant 0 : index
    %17 = vector.load %arg20[%c0_33, %c0_34] : memref<1x128xf32, #tpu.memory_space<vmem>>, vector<1x128xf32>
    %c0_35 = arith.constant 0 : index
    %c0_36 = arith.constant 0 : index
    %18 = vector.load %arg21[%c0_35, %c0_36] : memref<128x128xbf16, #tpu.memory_space<vmem>>, vector<128x128xbf16>
    %c0_37 = arith.constant 0 : index
    %c0_38 = arith.constant 0 : index
    %19 = vector.load %arg22[%c0_37, %c0_38] : memref<1x128xf32, #tpu.memory_space<vmem>>, vector<1x128xf32>
    %c0_39 = arith.constant 0 : index
    %c0_40 = arith.constant 0 : index
    %20 = vector.load %arg23[%c0_39, %c0_40] : memref<128x128xbf16, #tpu.memory_space<vmem>>, vector<128x128xbf16>
    %c0_41 = arith.constant 0 : index
    %c0_42 = arith.constant 0 : index
    %21 = vector.load %arg24[%c0_41, %c0_42] : memref<1x128xf32, #tpu.memory_space<vmem>>, vector<1x128xf32>
    %c0_43 = arith.constant 0 : index
    %c0_44 = arith.constant 0 : index
    %22 = vector.load %arg25[%c0_43, %c0_44] : memref<128x128xbf16, #tpu.memory_space<vmem>>, vector<128x128xbf16>
    %c0_45 = arith.constant 0 : index
    %c0_46 = arith.constant 0 : index
    %23 = vector.load %arg26[%c0_45, %c0_46] : memref<1x128xf32, #tpu.memory_space<vmem>>, vector<1x128xf32>
    %c0_47 = arith.constant 0 : index
    %c0_48 = arith.constant 0 : index
    %24 = vector.load %arg27[%c0_47, %c0_48] : memref<128x128xbf16, #tpu.memory_space<vmem>>, vector<128x128xbf16>
    %c0_49 = arith.constant 0 : index
    %c0_50 = arith.constant 0 : index
    %25 = vector.load %arg28[%c0_49, %c0_50] : memref<1x128xf32, #tpu.memory_space<vmem>>, vector<1x128xf32>
    %c0_51 = arith.constant 0 : index
    %c0_52 = arith.constant 0 : index
    %26 = vector.load %arg29[%c0_51, %c0_52] : memref<1x128xf32, #tpu.memory_space<vmem>>, vector<1x128xf32>
    %c0_53 = arith.constant 0 : index
    %c0_54 = arith.constant 0 : index
    %27 = vector.load %arg30[%c0_53, %c0_54] : memref<1x128xf32, #tpu.memory_space<vmem>>, vector<1x128xf32>
    %c0_55 = arith.constant 0 : index
    %c0_56 = arith.constant 0 : index
    %28 = vector.load %arg31[%c0_55, %c0_56] : memref<128x256xbf16, #tpu.memory_space<vmem>>, vector<128x256xbf16>
    %c0_57 = arith.constant 0 : index
    %c0_58 = arith.constant 0 : index
    %29 = vector.load %arg32[%c0_57, %c0_58] : memref<1x256xf32, #tpu.memory_space<vmem>>, vector<1x256xf32>
    %c0_59 = arith.constant 0 : index
    %c0_60 = arith.constant 0 : index
    %30 = vector.load %arg33[%c0_59, %c0_60] : memref<256x128xbf16, #tpu.memory_space<vmem>>, vector<256x128xbf16>
    %c0_61 = arith.constant 0 : index
    %c0_62 = arith.constant 0 : index
    %31 = vector.load %arg34[%c0_61, %c0_62] : memref<1x128xf32, #tpu.memory_space<vmem>>, vector<1x128xf32>
    %c0_63 = arith.constant 0 : index
    %c0_64 = arith.constant 0 : index
    %32 = vector.load %arg35[%c0_63, %c0_64] : memref<1x128xf32, #tpu.memory_space<vmem>>, vector<1x128xf32>
    %c0_65 = arith.constant 0 : index
    %c0_66 = arith.constant 0 : index
    %33 = vector.load %arg36[%c0_65, %c0_66] : memref<1x128xf32, #tpu.memory_space<vmem>>, vector<1x128xf32>
    %c0_67 = arith.constant 0 : index
    %c0_68 = arith.constant 0 : index
    %34 = vector.load %arg37[%c0_67, %c0_68] : memref<4x128xf32, #tpu.memory_space<vmem>>, vector<4x128xf32>
    %c0_69 = arith.constant 0 : index
    %c0_70 = arith.constant 0 : index
    %35 = vector.load %arg38[%c0_69, %c0_70] : memref<128x128xbf16, #tpu.memory_space<vmem>>, vector<128x128xbf16>
    %c0_71 = arith.constant 0 : index
    %c0_72 = arith.constant 0 : index
    %36 = vector.load %arg39[%c0_71, %c0_72] : memref<128x128xbf16, #tpu.memory_space<vmem>>, vector<128x128xbf16>
    %c0_73 = arith.constant 0 : index
    %c0_74 = arith.constant 0 : index
    %37 = vector.load %arg40[%c0_73, %c0_74] : memref<1x128xf32, #tpu.memory_space<vmem>>, vector<1x128xf32>
    %c0_75 = arith.constant 0 : index
    %c0_76 = arith.constant 0 : index
    %c0_77 = arith.constant 0 : index
    %38 = vector.load %arg1[%c0_75, %c0_76, %c0_77] : memref<1x32x128xf32, #tpu.memory_space<vmem>>, vector<1x32x128xf32>
    %39 = vector.shape_cast %38 : vector<1x32x128xf32> to vector<32x128xf32>
    %c0_78 = arith.constant 0 : index
    %c0_79 = arith.constant 0 : index
    %c0_80 = arith.constant 0 : index
    %40 = vector.load %arg2[%c0_78, %c0_79, %c0_80] : memref<1x32x32xf32, #tpu.memory_space<vmem>>, vector<1x32x32xf32>
    %41 = vector.shape_cast %40 : vector<1x32x32xf32> to vector<32x32xf32>
    %cst = arith.constant dense<0.000000e+00> : vector<32xf32>
    %42 = vector.multi_reduction <add>, %39, %cst [1] : vector<32x128xf32> to vector<32xf32>
    %43 = vector.shape_cast %42 : vector<32xf32> to vector<32x1xf32>
    %cst_81 = arith.constant 1.280000e+02 : f32
    %44 = vector.broadcast %cst_81 : f32 to vector<32x1xf32>
    %45 = arith.divf %43, %44 : vector<32x1xf32>
    %46 = vector.broadcast %45 : vector<32x1xf32> to vector<32x128xf32>
    %47 = arith.subf %39, %46 : vector<32x128xf32>
    %48 = arith.mulf %47, %47 : vector<32x128xf32>
    %cst_82 = arith.constant dense<0.000000e+00> : vector<32xf32>
    %49 = vector.multi_reduction <add>, %48, %cst_82 [1] : vector<32x128xf32> to vector<32xf32>
    %50 = vector.shape_cast %49 : vector<32xf32> to vector<32x1xf32>
    %cst_83 = arith.constant 1.280000e+02 : f32
    %51 = vector.broadcast %cst_83 : f32 to vector<32x1xf32>
    %52 = arith.divf %50, %51 : vector<32x1xf32>
    %53 = vector.broadcast %45 : vector<32x1xf32> to vector<32x128xf32>
    %54 = arith.subf %39, %53 : vector<32x128xf32>
    %cst_84 = arith.constant 9.99999996E-13 : f32
    %55 = vector.broadcast %cst_84 : f32 to vector<32x1xf32>
    %56 = arith.addf %52, %55 : vector<32x1xf32>
    %57 = math.rsqrt %56 : vector<32x1xf32>
    %58 = vector.broadcast %57 : vector<32x1xf32> to vector<32x128xf32>
    %59 = arith.mulf %54, %58 : vector<32x128xf32>
    %60 = vector.broadcast %0 : vector<1x128xf32> to vector<32x128xf32>
    %61 = arith.mulf %59, %60 : vector<32x128xf32>
    %62 = vector.broadcast %1 : vector<1x128xf32> to vector<32x128xf32>
    %63 = arith.addf %61, %62 : vector<32x128xf32>
    %64 = arith.truncf %63 : vector<32x128xf32> to vector<32x128xbf16>
    %cst_85 = arith.constant dense<0.000000e+00> : vector<32x128xf32>
    %65 = tpu.matmul %64, %2, %cst_85 {dimension_numbers = #tpu.dot_dimension_numbers<[1], [0], [0], [1], [0, 0, 1, 1], [], []>} : vector<32x128xbf16>, vector<128x128xbf16>, vector<32x128xf32> -> vector<32x128xf32>
    %66 = vector.broadcast %3 : vector<1x128xf32> to vector<32x128xf32>
    %67 = arith.addf %65, %66 : vector<32x128xf32>
    %cst_86 = arith.constant dense<0.000000e+00> : vector<32x128xf32>
    %68 = tpu.matmul %64, %4, %cst_86 {dimension_numbers = #tpu.dot_dimension_numbers<[1], [0], [0], [1], [0, 0, 1, 1], [], []>} : vector<32x128xbf16>, vector<128x128xbf16>, vector<32x128xf32> -> vector<32x128xf32>
    %69 = vector.broadcast %5 : vector<1x128xf32> to vector<32x128xf32>
    %70 = arith.addf %68, %69 : vector<32x128xf32>
    %cst_87 = arith.constant dense<0.000000e+00> : vector<32x128xf32>
    %71 = tpu.matmul %64, %6, %cst_87 {dimension_numbers = #tpu.dot_dimension_numbers<[1], [0], [0], [1], [0, 0, 1, 1], [], []>} : vector<32x128xbf16>, vector<128x128xbf16>, vector<32x128xf32> -> vector<32x128xf32>
    %72 = vector.broadcast %7 : vector<1x128xf32> to vector<32x128xf32>
    %73 = arith.addf %71, %72 : vector<32x128xf32>
    %74 = vector.extract_strided_slice %67 {offsets = [0, 0], sizes = [32, 32], strides = [1, 1]} : vector<32x128xf32> to vector<32x32xf32>
    %75 = vector.extract_strided_slice %70 {offsets = [0, 0], sizes = [32, 32], strides = [1, 1]} : vector<32x128xf32> to vector<32x32xf32>
    %cst_88 = arith.constant dense<0.000000e+00> : vector<32x32xf32>
    %76 = tpu.matmul %74, %75, %cst_88 {dimension_numbers = #tpu.dot_dimension_numbers<[1], [1], [0], [0], [0, 0, 1, 0], [], []>} : vector<32x32xf32>, vector<32x32xf32>, vector<32x32xf32> -> vector<32x32xf32>
    %cst_89 = arith.constant 0.176776692 : f32
    %77 = vector.broadcast %cst_89 : f32 to vector<32x32xf32>
    %78 = arith.mulf %76, %77 : vector<32x32xf32>
    %79 = arith.addf %78, %41 : vector<32x32xf32>
    %cst_90 = arith.constant dense<0xFF800000> : vector<32xf32>
    %80 = vector.multi_reduction <maximumf>, %79, %cst_90 [1] : vector<32x32xf32> to vector<32xf32>
    %81 = vector.shape_cast %80 : vector<32xf32> to vector<32x1xf32>
    %82 = vector.broadcast %81 : vector<32x1xf32> to vector<32x32xf32>
    %83 = arith.subf %79, %82 : vector<32x32xf32>
    %84 = math.exp %83 : vector<32x32xf32>
    %cst_91 = arith.constant dense<0.000000e+00> : vector<32xf32>
    %85 = vector.multi_reduction <add>, %84, %cst_91 [1] : vector<32x32xf32> to vector<32xf32>
    %86 = vector.shape_cast %85 : vector<32xf32> to vector<32x1xf32>
    %87 = tpu.reciprocal %86 {approx = true} : vector<32x1xf32> -> vector<32x1xf32>
    %88 = vector.broadcast %87 : vector<32x1xf32> to vector<32x32xf32>
    %89 = arith.mulf %84, %88 : vector<32x32xf32>
    %90 = vector.extract_strided_slice %73 {offsets = [0, 0], sizes = [32, 32], strides = [1, 1]} : vector<32x128xf32> to vector<32x32xf32>
    %cst_92 = arith.constant dense<0.000000e+00> : vector<32x32xf32>
    %91 = tpu.matmul %89, %90, %cst_92 {dimension_numbers = #tpu.dot_dimension_numbers<[1], [0], [0], [1], [0, 0, 1, 1], [], []>} : vector<32x32xf32>, vector<32x32xf32>, vector<32x32xf32> -> vector<32x32xf32>
    %92 = arith.truncf %91 : vector<32x32xf32> to vector<32x32xbf16>
    %93 = vector.extract_strided_slice %8 {offsets = [0, 0], sizes = [32, 128], strides = [1, 1]} : vector<128x128xbf16> to vector<32x128xbf16>
    %cst_93 = arith.constant dense<0.000000e+00> : vector<32x128xf32>
    %94 = tpu.matmul %92, %93, %cst_93 {dimension_numbers = #tpu.dot_dimension_numbers<[1], [0], [0], [1], [0, 0, 1, 1], [], []>} : vector<32x32xbf16>, vector<32x128xbf16>, vector<32x128xf32> -> vector<32x128xf32>
    %95 = vector.extract_strided_slice %67 {offsets = [0, 32], sizes = [32, 32], strides = [1, 1]} : vector<32x128xf32> to vector<32x32xf32>
    %96 = vector.extract_strided_slice %70 {offsets = [0, 32], sizes = [32, 32], strides = [1, 1]} : vector<32x128xf32> to vector<32x32xf32>
    %cst_94 = arith.constant dense<0.000000e+00> : vector<32x32xf32>
    %97 = tpu.matmul %95, %96, %cst_94 {dimension_numbers = #tpu.dot_dimension_numbers<[1], [1], [0], [0], [0, 0, 1, 0], [], []>} : vector<32x32xf32>, vector<32x32xf32>, vector<32x32xf32> -> vector<32x32xf32>
    %cst_95 = arith.constant 0.176776692 : f32
    %98 = vector.broadcast %cst_95 : f32 to vector<32x32xf32>
    %99 = arith.mulf %97, %98 : vector<32x32xf32>
    %100 = arith.addf %99, %41 : vector<32x32xf32>
    %cst_96 = arith.constant dense<0xFF800000> : vector<32xf32>
    %101 = vector.multi_reduction <maximumf>, %100, %cst_96 [1] : vector<32x32xf32> to vector<32xf32>
    %102 = vector.shape_cast %101 : vector<32xf32> to vector<32x1xf32>
    %103 = vector.broadcast %102 : vector<32x1xf32> to vector<32x32xf32>
    %104 = arith.subf %100, %103 : vector<32x32xf32>
    %105 = math.exp %104 : vector<32x32xf32>
    %cst_97 = arith.constant dense<0.000000e+00> : vector<32xf32>
    %106 = vector.multi_reduction <add>, %105, %cst_97 [1] : vector<32x32xf32> to vector<32xf32>
    %107 = vector.shape_cast %106 : vector<32xf32> to vector<32x1xf32>
    %108 = tpu.reciprocal %107 {approx = true} : vector<32x1xf32> -> vector<32x1xf32>
    %109 = vector.broadcast %108 : vector<32x1xf32> to vector<32x32xf32>
    %110 = arith.mulf %105, %109 : vector<32x32xf32>
    %111 = vector.extract_strided_slice %73 {offsets = [0, 32], sizes = [32, 32], strides = [1, 1]} : vector<32x128xf32> to vector<32x32xf32>
    %cst_98 = arith.constant dense<0.000000e+00> : vector<32x32xf32>
    %112 = tpu.matmul %110, %111, %cst_98 {dimension_numbers = #tpu.dot_dimension_numbers<[1], [0], [0], [1], [0, 0, 1, 1], [], []>} : vector<32x32xf32>, vector<32x32xf32>, vector<32x32xf32> -> vector<32x32xf32>
    %113 = arith.truncf %112 : vector<32x32xf32> to vector<32x32xbf16>
    %114 = vector.extract_strided_slice %8 {offsets = [32, 0], sizes = [32, 128], strides = [1, 1]} : vector<128x128xbf16> to vector<32x128xbf16>
    %cst_99 = arith.constant dense<0.000000e+00> : vector<32x128xf32>
    %115 = tpu.matmul %113, %114, %cst_99 {dimension_numbers = #tpu.dot_dimension_numbers<[1], [0], [0], [1], [0, 0, 1, 1], [], []>} : vector<32x32xbf16>, vector<32x128xbf16>, vector<32x128xf32> -> vector<32x128xf32>
    %116 = arith.addf %94, %115 : vector<32x128xf32>
    %117 = vector.extract_strided_slice %67 {offsets = [0, 64], sizes = [32, 32], strides = [1, 1]} : vector<32x128xf32> to vector<32x32xf32>
    %118 = vector.extract_strided_slice %70 {offsets = [0, 64], sizes = [32, 32], strides = [1, 1]} : vector<32x128xf32> to vector<32x32xf32>
    %cst_100 = arith.constant dense<0.000000e+00> : vector<32x32xf32>
    %119 = tpu.matmul %117, %118, %cst_100 {dimension_numbers = #tpu.dot_dimension_numbers<[1], [1], [0], [0], [0, 0, 1, 0], [], []>} : vector<32x32xf32>, vector<32x32xf32>, vector<32x32xf32> -> vector<32x32xf32>
    %cst_101 = arith.constant 0.176776692 : f32
    %120 = vector.broadcast %cst_101 : f32 to vector<32x32xf32>
    %121 = arith.mulf %119, %120 : vector<32x32xf32>
    %122 = arith.addf %121, %41 : vector<32x32xf32>
    %cst_102 = arith.constant dense<0xFF800000> : vector<32xf32>
    %123 = vector.multi_reduction <maximumf>, %122, %cst_102 [1] : vector<32x32xf32> to vector<32xf32>
    %124 = vector.shape_cast %123 : vector<32xf32> to vector<32x1xf32>
    %125 = vector.broadcast %124 : vector<32x1xf32> to vector<32x32xf32>
    %126 = arith.subf %122, %125 : vector<32x32xf32>
    %127 = math.exp %126 : vector<32x32xf32>
    %cst_103 = arith.constant dense<0.000000e+00> : vector<32xf32>
    %128 = vector.multi_reduction <add>, %127, %cst_103 [1] : vector<32x32xf32> to vector<32xf32>
    %129 = vector.shape_cast %128 : vector<32xf32> to vector<32x1xf32>
    %130 = tpu.reciprocal %129 {approx = true} : vector<32x1xf32> -> vector<32x1xf32>
    %131 = vector.broadcast %130 : vector<32x1xf32> to vector<32x32xf32>
    %132 = arith.mulf %127, %131 : vector<32x32xf32>
    %133 = vector.extract_strided_slice %73 {offsets = [0, 64], sizes = [32, 32], strides = [1, 1]} : vector<32x128xf32> to vector<32x32xf32>
    %cst_104 = arith.constant dense<0.000000e+00> : vector<32x32xf32>
    %134 = tpu.matmul %132, %133, %cst_104 {dimension_numbers = #tpu.dot_dimension_numbers<[1], [0], [0], [1], [0, 0, 1, 1], [], []>} : vector<32x32xf32>, vector<32x32xf32>, vector<32x32xf32> -> vector<32x32xf32>
    %135 = arith.truncf %134 : vector<32x32xf32> to vector<32x32xbf16>
    %136 = vector.extract_strided_slice %8 {offsets = [64, 0], sizes = [32, 128], strides = [1, 1]} : vector<128x128xbf16> to vector<32x128xbf16>
    %cst_105 = arith.constant dense<0.000000e+00> : vector<32x128xf32>
    %137 = tpu.matmul %135, %136, %cst_105 {dimension_numbers = #tpu.dot_dimension_numbers<[1], [0], [0], [1], [0, 0, 1, 1], [], []>} : vector<32x32xbf16>, vector<32x128xbf16>, vector<32x128xf32> -> vector<32x128xf32>
    %138 = arith.addf %116, %137 : vector<32x128xf32>
    %139 = vector.extract_strided_slice %67 {offsets = [0, 96], sizes = [32, 32], strides = [1, 1]} : vector<32x128xf32> to vector<32x32xf32>
    %140 = vector.extract_strided_slice %70 {offsets = [0, 96], sizes = [32, 32], strides = [1, 1]} : vector<32x128xf32> to vector<32x32xf32>
    %cst_106 = arith.constant dense<0.000000e+00> : vector<32x32xf32>
    %141 = tpu.matmul %139, %140, %cst_106 {dimension_numbers = #tpu.dot_dimension_numbers<[1], [1], [0], [0], [0, 0, 1, 0], [], []>} : vector<32x32xf32>, vector<32x32xf32>, vector<32x32xf32> -> vector<32x32xf32>
    %cst_107 = arith.constant 0.176776692 : f32
    %142 = vector.broadcast %cst_107 : f32 to vector<32x32xf32>
    %143 = arith.mulf %141, %142 : vector<32x32xf32>
    %144 = arith.addf %143, %41 : vector<32x32xf32>
    %cst_108 = arith.constant dense<0xFF800000> : vector<32xf32>
    %145 = vector.multi_reduction <maximumf>, %144, %cst_108 [1] : vector<32x32xf32> to vector<32xf32>
    %146 = vector.shape_cast %145 : vector<32xf32> to vector<32x1xf32>
    %147 = vector.broadcast %146 : vector<32x1xf32> to vector<32x32xf32>
    %148 = arith.subf %144, %147 : vector<32x32xf32>
    %149 = math.exp %148 : vector<32x32xf32>
    %cst_109 = arith.constant dense<0.000000e+00> : vector<32xf32>
    %150 = vector.multi_reduction <add>, %149, %cst_109 [1] : vector<32x32xf32> to vector<32xf32>
    %151 = vector.shape_cast %150 : vector<32xf32> to vector<32x1xf32>
    %152 = tpu.reciprocal %151 {approx = true} : vector<32x1xf32> -> vector<32x1xf32>
    %153 = vector.broadcast %152 : vector<32x1xf32> to vector<32x32xf32>
    %154 = arith.mulf %149, %153 : vector<32x32xf32>
    %155 = vector.extract_strided_slice %73 {offsets = [0, 96], sizes = [32, 32], strides = [1, 1]} : vector<32x128xf32> to vector<32x32xf32>
    %cst_110 = arith.constant dense<0.000000e+00> : vector<32x32xf32>
    %156 = tpu.matmul %154, %155, %cst_110 {dimension_numbers = #tpu.dot_dimension_numbers<[1], [0], [0], [1], [0, 0, 1, 1], [], []>} : vector<32x32xf32>, vector<32x32xf32>, vector<32x32xf32> -> vector<32x32xf32>
    %157 = arith.truncf %156 : vector<32x32xf32> to vector<32x32xbf16>
    %158 = vector.extract_strided_slice %8 {offsets = [96, 0], sizes = [32, 128], strides = [1, 1]} : vector<128x128xbf16> to vector<32x128xbf16>
    %cst_111 = arith.constant dense<0.000000e+00> : vector<32x128xf32>
    %159 = tpu.matmul %157, %158, %cst_111 {dimension_numbers = #tpu.dot_dimension_numbers<[1], [0], [0], [1], [0, 0, 1, 1], [], []>} : vector<32x32xbf16>, vector<32x128xbf16>, vector<32x128xf32> -> vector<32x128xf32>
    %160 = arith.addf %138, %159 : vector<32x128xf32>
    %161 = vector.broadcast %9 : vector<1x128xf32> to vector<32x128xf32>
    %162 = arith.addf %160, %161 : vector<32x128xf32>
    %163 = arith.addf %63, %162 : vector<32x128xf32>
    %cst_112 = arith.constant dense<0.000000e+00> : vector<32xf32>
    %164 = vector.multi_reduction <add>, %163, %cst_112 [1] : vector<32x128xf32> to vector<32xf32>
    %165 = vector.shape_cast %164 : vector<32xf32> to vector<32x1xf32>
    %cst_113 = arith.constant 1.280000e+02 : f32
    %166 = vector.broadcast %cst_113 : f32 to vector<32x1xf32>
    %167 = arith.divf %165, %166 : vector<32x1xf32>
    %168 = vector.broadcast %167 : vector<32x1xf32> to vector<32x128xf32>
    %169 = arith.subf %163, %168 : vector<32x128xf32>
    %170 = arith.mulf %169, %169 : vector<32x128xf32>
    %cst_114 = arith.constant dense<0.000000e+00> : vector<32xf32>
    %171 = vector.multi_reduction <add>, %170, %cst_114 [1] : vector<32x128xf32> to vector<32xf32>
    %172 = vector.shape_cast %171 : vector<32xf32> to vector<32x1xf32>
    %cst_115 = arith.constant 1.280000e+02 : f32
    %173 = vector.broadcast %cst_115 : f32 to vector<32x1xf32>
    %174 = arith.divf %172, %173 : vector<32x1xf32>
    %175 = vector.broadcast %167 : vector<32x1xf32> to vector<32x128xf32>
    %176 = arith.subf %163, %175 : vector<32x128xf32>
    %cst_116 = arith.constant 9.99999974E-6 : f32
    %177 = vector.broadcast %cst_116 : f32 to vector<32x1xf32>
    %178 = arith.addf %174, %177 : vector<32x1xf32>
    %179 = math.rsqrt %178 : vector<32x1xf32>
    %180 = vector.broadcast %179 : vector<32x1xf32> to vector<32x128xf32>
    %181 = arith.mulf %176, %180 : vector<32x128xf32>
    %182 = vector.broadcast %10 : vector<1x128xf32> to vector<32x128xf32>
    %183 = arith.mulf %181, %182 : vector<32x128xf32>
    %184 = vector.broadcast %11 : vector<1x128xf32> to vector<32x128xf32>
    %185 = arith.addf %183, %184 : vector<32x128xf32>
    %186 = arith.truncf %185 : vector<32x128xf32> to vector<32x128xbf16>
    %cst_117 = arith.constant dense<0.000000e+00> : vector<32x256xf32>
    %187 = tpu.matmul %186, %12, %cst_117 {dimension_numbers = #tpu.dot_dimension_numbers<[1], [0], [0], [1], [0, 0, 1, 1], [], []>} : vector<32x128xbf16>, vector<128x256xbf16>, vector<32x256xf32> -> vector<32x256xf32>
    %188 = vector.broadcast %13 : vector<1x256xf32> to vector<32x256xf32>
    %189 = arith.addf %187, %188 : vector<32x256xf32>
    %cst_118 = arith.constant 0.000000e+00 : f32
    %190 = vector.broadcast %cst_118 : f32 to vector<32x256xf32>
    %191 = arith.maximumf %189, %190 : vector<32x256xf32>
    %192 = arith.truncf %191 : vector<32x256xf32> to vector<32x256xbf16>
    %cst_119 = arith.constant dense<0.000000e+00> : vector<32x128xf32>
    %193 = tpu.matmul %192, %14, %cst_119 {dimension_numbers = #tpu.dot_dimension_numbers<[1], [0], [0], [1], [0, 0, 1, 1], [], []>} : vector<32x256xbf16>, vector<256x128xbf16>, vector<32x128xf32> -> vector<32x128xf32>
    %194 = vector.broadcast %15 : vector<1x128xf32> to vector<32x128xf32>
    %195 = arith.addf %193, %194 : vector<32x128xf32>
    %196 = arith.addf %185, %195 : vector<32x128xf32>
    %cst_120 = arith.constant dense<0.000000e+00> : vector<32xf32>
    %197 = vector.multi_reduction <add>, %196, %cst_120 [1] : vector<32x128xf32> to vector<32xf32>
    %198 = vector.shape_cast %197 : vector<32xf32> to vector<32x1xf32>
    %cst_121 = arith.constant 1.280000e+02 : f32
    %199 = vector.broadcast %cst_121 : f32 to vector<32x1xf32>
    %200 = arith.divf %198, %199 : vector<32x1xf32>
    %201 = vector.broadcast %200 : vector<32x1xf32> to vector<32x128xf32>
    %202 = arith.subf %196, %201 : vector<32x128xf32>
    %203 = arith.mulf %202, %202 : vector<32x128xf32>
    %cst_122 = arith.constant dense<0.000000e+00> : vector<32xf32>
    %204 = vector.multi_reduction <add>, %203, %cst_122 [1] : vector<32x128xf32> to vector<32xf32>
    %205 = vector.shape_cast %204 : vector<32xf32> to vector<32x1xf32>
    %cst_123 = arith.constant 1.280000e+02 : f32
    %206 = vector.broadcast %cst_123 : f32 to vector<32x1xf32>
    %207 = arith.divf %205, %206 : vector<32x1xf32>
    %208 = vector.broadcast %200 : vector<32x1xf32> to vector<32x128xf32>
    %209 = arith.subf %196, %208 : vector<32x128xf32>
    %cst_124 = arith.constant 9.99999974E-6 : f32
    %210 = vector.broadcast %cst_124 : f32 to vector<32x1xf32>
    %211 = arith.addf %207, %210 : vector<32x1xf32>
    %212 = math.rsqrt %211 : vector<32x1xf32>
    %213 = vector.broadcast %212 : vector<32x1xf32> to vector<32x128xf32>
    %214 = arith.mulf %209, %213 : vector<32x128xf32>
    %215 = vector.broadcast %16 : vector<1x128xf32> to vector<32x128xf32>
    %216 = arith.mulf %214, %215 : vector<32x128xf32>
    %217 = vector.broadcast %17 : vector<1x128xf32> to vector<32x128xf32>
    %218 = arith.addf %216, %217 : vector<32x128xf32>
    %219 = tpu.iota {dimensions = array<i32: 0>} : vector<4x32xi32>
    %220 = tpu.iota {dimensions = array<i32: 1>} : vector<4x32xi32>
    %c8_i32 = arith.constant 8 : i32
    %221 = vector.broadcast %c8_i32 : i32 to vector<4x32xi32>
    %222 = arith.muli %219, %221 : vector<4x32xi32>
    %223 = arith.cmpi eq, %220, %222 : vector<4x32xi32>
    %224 = arith.extui %223 : vector<4x32xi1> to vector<4x32xi32>
    %225 = arith.sitofp %224 : vector<4x32xi32> to vector<4x32xf32>
    %cst_125 = arith.constant dense<0.000000e+00> : vector<4x128xf32>
    %226 = tpu.matmul %225, %218, %cst_125 {dimension_numbers = #tpu.dot_dimension_numbers<[1], [0], [0], [1], [0, 0, 1, 1], [], []>} : vector<4x32xf32>, vector<32x128xf32>, vector<4x128xf32> -> vector<4x128xf32>
    %227 = arith.addf %226, %34 : vector<4x128xf32>
    %228 = arith.truncf %227 : vector<4x128xf32> to vector<4x128xbf16>
    %cst_126 = arith.constant dense<0.000000e+00> : vector<4x128xf32>
    %229 = tpu.matmul %228, %18, %cst_126 {dimension_numbers = #tpu.dot_dimension_numbers<[1], [0], [0], [1], [0, 0, 1, 1], [], []>} : vector<4x128xbf16>, vector<128x128xbf16>, vector<4x128xf32> -> vector<4x128xf32>
    %230 = vector.broadcast %19 : vector<1x128xf32> to vector<4x128xf32>
    %231 = arith.addf %229, %230 : vector<4x128xf32>
    %cst_127 = arith.constant dense<0.000000e+00> : vector<4x128xf32>
    %232 = tpu.matmul %228, %20, %cst_127 {dimension_numbers = #tpu.dot_dimension_numbers<[1], [0], [0], [1], [0, 0, 1, 1], [], []>} : vector<4x128xbf16>, vector<128x128xbf16>, vector<4x128xf32> -> vector<4x128xf32>
    %233 = vector.broadcast %21 : vector<1x128xf32> to vector<4x128xf32>
    %234 = arith.addf %232, %233 : vector<4x128xf32>
    %cst_128 = arith.constant dense<0.000000e+00> : vector<4x128xf32>
    %235 = tpu.matmul %228, %22, %cst_128 {dimension_numbers = #tpu.dot_dimension_numbers<[1], [0], [0], [1], [0, 0, 1, 1], [], []>} : vector<4x128xbf16>, vector<128x128xbf16>, vector<4x128xf32> -> vector<4x128xf32>
    %236 = vector.broadcast %23 : vector<1x128xf32> to vector<4x128xf32>
    %237 = arith.addf %235, %236 : vector<4x128xf32>
    %238 = vector.extract_strided_slice %231 {offsets = [0, 0], sizes = [4, 32], strides = [1, 1]} : vector<4x128xf32> to vector<4x32xf32>
    %239 = vector.extract_strided_slice %234 {offsets = [0, 0], sizes = [4, 32], strides = [1, 1]} : vector<4x128xf32> to vector<4x32xf32>
    %cst_129 = arith.constant dense<0.000000e+00> : vector<4x4xf32>
    %240 = tpu.matmul %238, %239, %cst_129 {dimension_numbers = #tpu.dot_dimension_numbers<[1], [1], [0], [0], [0, 0, 1, 0], [], []>} : vector<4x32xf32>, vector<4x32xf32>, vector<4x4xf32> -> vector<4x4xf32>
    %cst_130 = arith.constant 0.176776692 : f32
    %241 = vector.broadcast %cst_130 : f32 to vector<4x4xf32>
    %242 = arith.mulf %240, %241 : vector<4x4xf32>
    %cst_131 = arith.constant dense<0xFF800000> : vector<4xf32>
    %243 = vector.multi_reduction <maximumf>, %242, %cst_131 [1] : vector<4x4xf32> to vector<4xf32>
    %244 = vector.shape_cast %243 : vector<4xf32> to vector<4x1xf32>
    %245 = vector.broadcast %244 : vector<4x1xf32> to vector<4x4xf32>
    %246 = arith.subf %242, %245 : vector<4x4xf32>
    %247 = math.exp %246 : vector<4x4xf32>
    %cst_132 = arith.constant dense<0.000000e+00> : vector<4xf32>
    %248 = vector.multi_reduction <add>, %247, %cst_132 [1] : vector<4x4xf32> to vector<4xf32>
    %249 = vector.shape_cast %248 : vector<4xf32> to vector<4x1xf32>
    %250 = tpu.reciprocal %249 {approx = true} : vector<4x1xf32> -> vector<4x1xf32>
    %251 = vector.broadcast %250 : vector<4x1xf32> to vector<4x4xf32>
    %252 = arith.mulf %247, %251 : vector<4x4xf32>
    %253 = vector.extract_strided_slice %237 {offsets = [0, 0], sizes = [4, 32], strides = [1, 1]} : vector<4x128xf32> to vector<4x32xf32>
    %cst_133 = arith.constant dense<0.000000e+00> : vector<4x32xf32>
    %254 = tpu.matmul %252, %253, %cst_133 {dimension_numbers = #tpu.dot_dimension_numbers<[1], [0], [0], [1], [0, 0, 1, 1], [], []>} : vector<4x4xf32>, vector<4x32xf32>, vector<4x32xf32> -> vector<4x32xf32>
    %255 = arith.truncf %254 : vector<4x32xf32> to vector<4x32xbf16>
    %256 = vector.extract_strided_slice %24 {offsets = [0, 0], sizes = [32, 128], strides = [1, 1]} : vector<128x128xbf16> to vector<32x128xbf16>
    %cst_134 = arith.constant dense<0.000000e+00> : vector<4x128xf32>
    %257 = tpu.matmul %255, %256, %cst_134 {dimension_numbers = #tpu.dot_dimension_numbers<[1], [0], [0], [1], [0, 0, 1, 1], [], []>} : vector<4x32xbf16>, vector<32x128xbf16>, vector<4x128xf32> -> vector<4x128xf32>
    %258 = vector.extract_strided_slice %231 {offsets = [0, 32], sizes = [4, 32], strides = [1, 1]} : vector<4x128xf32> to vector<4x32xf32>
    %259 = vector.extract_strided_slice %234 {offsets = [0, 32], sizes = [4, 32], strides = [1, 1]} : vector<4x128xf32> to vector<4x32xf32>
    %cst_135 = arith.constant dense<0.000000e+00> : vector<4x4xf32>
    %260 = tpu.matmul %258, %259, %cst_135 {dimension_numbers = #tpu.dot_dimension_numbers<[1], [1], [0], [0], [0, 0, 1, 0], [], []>} : vector<4x32xf32>, vector<4x32xf32>, vector<4x4xf32> -> vector<4x4xf32>
    %cst_136 = arith.constant 0.176776692 : f32
    %261 = vector.broadcast %cst_136 : f32 to vector<4x4xf32>
    %262 = arith.mulf %260, %261 : vector<4x4xf32>
    %cst_137 = arith.constant dense<0xFF800000> : vector<4xf32>
    %263 = vector.multi_reduction <maximumf>, %262, %cst_137 [1] : vector<4x4xf32> to vector<4xf32>
    %264 = vector.shape_cast %263 : vector<4xf32> to vector<4x1xf32>
    %265 = vector.broadcast %264 : vector<4x1xf32> to vector<4x4xf32>
    %266 = arith.subf %262, %265 : vector<4x4xf32>
    %267 = math.exp %266 : vector<4x4xf32>
    %cst_138 = arith.constant dense<0.000000e+00> : vector<4xf32>
    %268 = vector.multi_reduction <add>, %267, %cst_138 [1] : vector<4x4xf32> to vector<4xf32>
    %269 = vector.shape_cast %268 : vector<4xf32> to vector<4x1xf32>
    %270 = tpu.reciprocal %269 {approx = true} : vector<4x1xf32> -> vector<4x1xf32>
    %271 = vector.broadcast %270 : vector<4x1xf32> to vector<4x4xf32>
    %272 = arith.mulf %267, %271 : vector<4x4xf32>
    %273 = vector.extract_strided_slice %237 {offsets = [0, 32], sizes = [4, 32], strides = [1, 1]} : vector<4x128xf32> to vector<4x32xf32>
    %cst_139 = arith.constant dense<0.000000e+00> : vector<4x32xf32>
    %274 = tpu.matmul %272, %273, %cst_139 {dimension_numbers = #tpu.dot_dimension_numbers<[1], [0], [0], [1], [0, 0, 1, 1], [], []>} : vector<4x4xf32>, vector<4x32xf32>, vector<4x32xf32> -> vector<4x32xf32>
    %275 = arith.truncf %274 : vector<4x32xf32> to vector<4x32xbf16>
    %276 = vector.extract_strided_slice %24 {offsets = [32, 0], sizes = [32, 128], strides = [1, 1]} : vector<128x128xbf16> to vector<32x128xbf16>
    %cst_140 = arith.constant dense<0.000000e+00> : vector<4x128xf32>
    %277 = tpu.matmul %275, %276, %cst_140 {dimension_numbers = #tpu.dot_dimension_numbers<[1], [0], [0], [1], [0, 0, 1, 1], [], []>} : vector<4x32xbf16>, vector<32x128xbf16>, vector<4x128xf32> -> vector<4x128xf32>
    %278 = arith.addf %257, %277 : vector<4x128xf32>
    %279 = vector.extract_strided_slice %231 {offsets = [0, 64], sizes = [4, 32], strides = [1, 1]} : vector<4x128xf32> to vector<4x32xf32>
    %280 = vector.extract_strided_slice %234 {offsets = [0, 64], sizes = [4, 32], strides = [1, 1]} : vector<4x128xf32> to vector<4x32xf32>
    %cst_141 = arith.constant dense<0.000000e+00> : vector<4x4xf32>
    %281 = tpu.matmul %279, %280, %cst_141 {dimension_numbers = #tpu.dot_dimension_numbers<[1], [1], [0], [0], [0, 0, 1, 0], [], []>} : vector<4x32xf32>, vector<4x32xf32>, vector<4x4xf32> -> vector<4x4xf32>
    %cst_142 = arith.constant 0.176776692 : f32
    %282 = vector.broadcast %cst_142 : f32 to vector<4x4xf32>
    %283 = arith.mulf %281, %282 : vector<4x4xf32>
    %cst_143 = arith.constant dense<0xFF800000> : vector<4xf32>
    %284 = vector.multi_reduction <maximumf>, %283, %cst_143 [1] : vector<4x4xf32> to vector<4xf32>
    %285 = vector.shape_cast %284 : vector<4xf32> to vector<4x1xf32>
    %286 = vector.broadcast %285 : vector<4x1xf32> to vector<4x4xf32>
    %287 = arith.subf %283, %286 : vector<4x4xf32>
    %288 = math.exp %287 : vector<4x4xf32>
    %cst_144 = arith.constant dense<0.000000e+00> : vector<4xf32>
    %289 = vector.multi_reduction <add>, %288, %cst_144 [1] : vector<4x4xf32> to vector<4xf32>
    %290 = vector.shape_cast %289 : vector<4xf32> to vector<4x1xf32>
    %291 = tpu.reciprocal %290 {approx = true} : vector<4x1xf32> -> vector<4x1xf32>
    %292 = vector.broadcast %291 : vector<4x1xf32> to vector<4x4xf32>
    %293 = arith.mulf %288, %292 : vector<4x4xf32>
    %294 = vector.extract_strided_slice %237 {offsets = [0, 64], sizes = [4, 32], strides = [1, 1]} : vector<4x128xf32> to vector<4x32xf32>
    %cst_145 = arith.constant dense<0.000000e+00> : vector<4x32xf32>
    %295 = tpu.matmul %293, %294, %cst_145 {dimension_numbers = #tpu.dot_dimension_numbers<[1], [0], [0], [1], [0, 0, 1, 1], [], []>} : vector<4x4xf32>, vector<4x32xf32>, vector<4x32xf32> -> vector<4x32xf32>
    %296 = arith.truncf %295 : vector<4x32xf32> to vector<4x32xbf16>
    %297 = vector.extract_strided_slice %24 {offsets = [64, 0], sizes = [32, 128], strides = [1, 1]} : vector<128x128xbf16> to vector<32x128xbf16>
    %cst_146 = arith.constant dense<0.000000e+00> : vector<4x128xf32>
    %298 = tpu.matmul %296, %297, %cst_146 {dimension_numbers = #tpu.dot_dimension_numbers<[1], [0], [0], [1], [0, 0, 1, 1], [], []>} : vector<4x32xbf16>, vector<32x128xbf16>, vector<4x128xf32> -> vector<4x128xf32>
    %299 = arith.addf %278, %298 : vector<4x128xf32>
    %300 = vector.extract_strided_slice %231 {offsets = [0, 96], sizes = [4, 32], strides = [1, 1]} : vector<4x128xf32> to vector<4x32xf32>
    %301 = vector.extract_strided_slice %234 {offsets = [0, 96], sizes = [4, 32], strides = [1, 1]} : vector<4x128xf32> to vector<4x32xf32>
    %cst_147 = arith.constant dense<0.000000e+00> : vector<4x4xf32>
    %302 = tpu.matmul %300, %301, %cst_147 {dimension_numbers = #tpu.dot_dimension_numbers<[1], [1], [0], [0], [0, 0, 1, 0], [], []>} : vector<4x32xf32>, vector<4x32xf32>, vector<4x4xf32> -> vector<4x4xf32>
    %cst_148 = arith.constant 0.176776692 : f32
    %303 = vector.broadcast %cst_148 : f32 to vector<4x4xf32>
    %304 = arith.mulf %302, %303 : vector<4x4xf32>
    %cst_149 = arith.constant dense<0xFF800000> : vector<4xf32>
    %305 = vector.multi_reduction <maximumf>, %304, %cst_149 [1] : vector<4x4xf32> to vector<4xf32>
    %306 = vector.shape_cast %305 : vector<4xf32> to vector<4x1xf32>
    %307 = vector.broadcast %306 : vector<4x1xf32> to vector<4x4xf32>
    %308 = arith.subf %304, %307 : vector<4x4xf32>
    %309 = math.exp %308 : vector<4x4xf32>
    %cst_150 = arith.constant dense<0.000000e+00> : vector<4xf32>
    %310 = vector.multi_reduction <add>, %309, %cst_150 [1] : vector<4x4xf32> to vector<4xf32>
    %311 = vector.shape_cast %310 : vector<4xf32> to vector<4x1xf32>
    %312 = tpu.reciprocal %311 {approx = true} : vector<4x1xf32> -> vector<4x1xf32>
    %313 = vector.broadcast %312 : vector<4x1xf32> to vector<4x4xf32>
    %314 = arith.mulf %309, %313 : vector<4x4xf32>
    %315 = vector.extract_strided_slice %237 {offsets = [0, 96], sizes = [4, 32], strides = [1, 1]} : vector<4x128xf32> to vector<4x32xf32>
    %cst_151 = arith.constant dense<0.000000e+00> : vector<4x32xf32>
    %316 = tpu.matmul %314, %315, %cst_151 {dimension_numbers = #tpu.dot_dimension_numbers<[1], [0], [0], [1], [0, 0, 1, 1], [], []>} : vector<4x4xf32>, vector<4x32xf32>, vector<4x32xf32> -> vector<4x32xf32>
    %317 = arith.truncf %316 : vector<4x32xf32> to vector<4x32xbf16>
    %318 = vector.extract_strided_slice %24 {offsets = [96, 0], sizes = [32, 128], strides = [1, 1]} : vector<128x128xbf16> to vector<32x128xbf16>
    %cst_152 = arith.constant dense<0.000000e+00> : vector<4x128xf32>
    %319 = tpu.matmul %317, %318, %cst_152 {dimension_numbers = #tpu.dot_dimension_numbers<[1], [0], [0], [1], [0, 0, 1, 1], [], []>} : vector<4x32xbf16>, vector<32x128xbf16>, vector<4x128xf32> -> vector<4x128xf32>
    %320 = arith.addf %299, %319 : vector<4x128xf32>
    %321 = vector.broadcast %25 : vector<1x128xf32> to vector<4x128xf32>
    %322 = arith.addf %320, %321 : vector<4x128xf32>
    %323 = arith.addf %227, %322 : vector<4x128xf32>
    %cst_153 = arith.constant dense<0.000000e+00> : vector<4xf32>
    %324 = vector.multi_reduction <add>, %323, %cst_153 [1] : vector<4x128xf32> to vector<4xf32>
    %325 = vector.shape_cast %324 : vector<4xf32> to vector<4x1xf32>
    %cst_154 = arith.constant 1.280000e+02 : f32
    %326 = vector.broadcast %cst_154 : f32 to vector<4x1xf32>
    %327 = arith.divf %325, %326 : vector<4x1xf32>
    %328 = vector.broadcast %327 : vector<4x1xf32> to vector<4x128xf32>
    %329 = arith.subf %323, %328 : vector<4x128xf32>
    %330 = arith.mulf %329, %329 : vector<4x128xf32>
    %cst_155 = arith.constant dense<0.000000e+00> : vector<4xf32>
    %331 = vector.multi_reduction <add>, %330, %cst_155 [1] : vector<4x128xf32> to vector<4xf32>
    %332 = vector.shape_cast %331 : vector<4xf32> to vector<4x1xf32>
    %cst_156 = arith.constant 1.280000e+02 : f32
    %333 = vector.broadcast %cst_156 : f32 to vector<4x1xf32>
    %334 = arith.divf %332, %333 : vector<4x1xf32>
    %335 = vector.broadcast %327 : vector<4x1xf32> to vector<4x128xf32>
    %336 = arith.subf %323, %335 : vector<4x128xf32>
    %cst_157 = arith.constant 9.99999974E-6 : f32
    %337 = vector.broadcast %cst_157 : f32 to vector<4x1xf32>
    %338 = arith.addf %334, %337 : vector<4x1xf32>
    %339 = math.rsqrt %338 : vector<4x1xf32>
    %340 = vector.broadcast %339 : vector<4x1xf32> to vector<4x128xf32>
    %341 = arith.mulf %336, %340 : vector<4x128xf32>
    %342 = vector.broadcast %26 : vector<1x128xf32> to vector<4x128xf32>
    %343 = arith.mulf %341, %342 : vector<4x128xf32>
    %344 = vector.broadcast %27 : vector<1x128xf32> to vector<4x128xf32>
    %345 = arith.addf %343, %344 : vector<4x128xf32>
    %346 = arith.truncf %345 : vector<4x128xf32> to vector<4x128xbf16>
    %cst_158 = arith.constant dense<0.000000e+00> : vector<4x256xf32>
    %347 = tpu.matmul %346, %28, %cst_158 {dimension_numbers = #tpu.dot_dimension_numbers<[1], [0], [0], [1], [0, 0, 1, 1], [], []>} : vector<4x128xbf16>, vector<128x256xbf16>, vector<4x256xf32> -> vector<4x256xf32>
    %348 = vector.broadcast %29 : vector<1x256xf32> to vector<4x256xf32>
    %349 = arith.addf %347, %348 : vector<4x256xf32>
    %cst_159 = arith.constant 0.000000e+00 : f32
    %350 = vector.broadcast %cst_159 : f32 to vector<4x256xf32>
    %351 = arith.maximumf %349, %350 : vector<4x256xf32>
    %352 = arith.truncf %351 : vector<4x256xf32> to vector<4x256xbf16>
    %cst_160 = arith.constant dense<0.000000e+00> : vector<4x128xf32>
    %353 = tpu.matmul %352, %30, %cst_160 {dimension_numbers = #tpu.dot_dimension_numbers<[1], [0], [0], [1], [0, 0, 1, 1], [], []>} : vector<4x256xbf16>, vector<256x128xbf16>, vector<4x128xf32> -> vector<4x128xf32>
    %354 = vector.broadcast %31 : vector<1x128xf32> to vector<4x128xf32>
    %355 = arith.addf %353, %354 : vector<4x128xf32>
    %356 = arith.addf %345, %355 : vector<4x128xf32>
    %cst_161 = arith.constant dense<0.000000e+00> : vector<4xf32>
    %357 = vector.multi_reduction <add>, %356, %cst_161 [1] : vector<4x128xf32> to vector<4xf32>
    %358 = vector.shape_cast %357 : vector<4xf32> to vector<4x1xf32>
    %cst_162 = arith.constant 1.280000e+02 : f32
    %359 = vector.broadcast %cst_162 : f32 to vector<4x1xf32>
    %360 = arith.divf %358, %359 : vector<4x1xf32>
    %361 = vector.broadcast %360 : vector<4x1xf32> to vector<4x128xf32>
    %362 = arith.subf %356, %361 : vector<4x128xf32>
    %363 = arith.mulf %362, %362 : vector<4x128xf32>
    %cst_163 = arith.constant dense<0.000000e+00> : vector<4xf32>
    %364 = vector.multi_reduction <add>, %363, %cst_163 [1] : vector<4x128xf32> to vector<4xf32>
    %365 = vector.shape_cast %364 : vector<4xf32> to vector<4x1xf32>
    %cst_164 = arith.constant 1.280000e+02 : f32
    %366 = vector.broadcast %cst_164 : f32 to vector<4x1xf32>
    %367 = arith.divf %365, %366 : vector<4x1xf32>
    %368 = vector.broadcast %360 : vector<4x1xf32> to vector<4x128xf32>
    %369 = arith.subf %356, %368 : vector<4x128xf32>
    %cst_165 = arith.constant 9.99999974E-6 : f32
    %370 = vector.broadcast %cst_165 : f32 to vector<4x1xf32>
    %371 = arith.addf %367, %370 : vector<4x1xf32>
    %372 = math.rsqrt %371 : vector<4x1xf32>
    %373 = vector.broadcast %372 : vector<4x1xf32> to vector<4x128xf32>
    %374 = arith.mulf %369, %373 : vector<4x128xf32>
    %375 = vector.broadcast %32 : vector<1x128xf32> to vector<4x128xf32>
    %376 = arith.mulf %374, %375 : vector<4x128xf32>
    %377 = vector.broadcast %33 : vector<1x128xf32> to vector<4x128xf32>
    %378 = arith.addf %376, %377 : vector<4x128xf32>
    %c0_166 = arith.constant 0 : index
    %c0_167 = arith.constant 0 : index
    %c0_168 = arith.constant 0 : index
    %379 = vector.load %arg42[%c0_166, %c0_167, %c0_168] : memref<1x4x128xf32, #tpu.memory_space<vmem>>, vector<1x4x128xf32>
    %380 = vector.shape_cast %379 : vector<1x4x128xf32> to vector<4x128xf32>
    %381 = vector.shape_cast %378 : vector<4x128xf32> to vector<1x4x128xf32>
    tpu.vector_store %arg42[%c0_166, %c0_167, %c0_168], %381 {strides = array<i32>} : memref<1x4x128xf32, #tpu.memory_space<vmem>>, vector<1x4x128xf32>,
    %382 = arith.truncf %226 : vector<4x128xf32> to vector<4x128xbf16>
    %cst_169 = arith.constant dense<0.000000e+00> : vector<4x128xf32>
    %383 = tpu.matmul %382, %35, %cst_169 {dimension_numbers = #tpu.dot_dimension_numbers<[1], [0], [0], [1], [0, 0, 1, 1], [], []>} : vector<4x128xbf16>, vector<128x128xbf16>, vector<4x128xf32> -> vector<4x128xf32>
    %384 = arith.truncf %378 : vector<4x128xf32> to vector<4x128xbf16>
    %cst_170 = arith.constant dense<0.000000e+00> : vector<4x128xf32>
    %385 = tpu.matmul %384, %36, %cst_170 {dimension_numbers = #tpu.dot_dimension_numbers<[1], [0], [0], [1], [0, 0, 1, 1], [], []>} : vector<4x128xbf16>, vector<128x128xbf16>, vector<4x128xf32> -> vector<4x128xf32>
    %386 = arith.addf %383, %385 : vector<4x128xf32>
    %387 = vector.broadcast %37 : vector<1x128xf32> to vector<4x128xf32>
    %388 = arith.addf %386, %387 : vector<4x128xf32>
    %c0_171 = arith.constant 0 : index
    %c0_172 = arith.constant 0 : index
    %c0_173 = arith.constant 0 : index
    %389 = vector.load %arg41[%c0_171, %c0_172, %c0_173] : memref<1x4x128xf32, #tpu.memory_space<vmem>>, vector<1x4x128xf32>
    %390 = vector.shape_cast %389 : vector<1x4x128xf32> to vector<4x128xf32>
    %391 = vector.shape_cast %388 : vector<4x128xf32> to vector<1x4x128xf32>
    tpu.vector_store %arg41[%c0_171, %c0_172, %c0_173], %391 {strides = array<i32>} : memref<1x4x128xf32, #tpu.memory_space<vmem>>, vector<1x4x128xf32>,
    return
  }
  func.func @transform_0(%arg0: i32) -> (i32, i32, i32) {
    %c0_i32 = arith.constant 0 : i32
    %c0_i32_0 = arith.constant 0 : i32
    %c0_i32_1 = arith.constant 0 : i32
    return %arg0, %c0_i32, %c0_i32_0 : i32, i32, i32
  }
  func.func @transform_1(%arg0: i32) -> (i32, i32, i32) {
    %c0_i32 = arith.constant 0 : i32
    %c0_i32_0 = arith.constant 0 : i32
    %c0_i32_1 = arith.constant 0 : i32
    return %arg0, %c0_i32, %c0_i32_0 : i32, i32, i32
  }
  func.func @transform_2(%arg0: i32) -> (i32, i32) {
    %c0_i32 = arith.constant 0 : i32
    %c0_i32_0 = arith.constant 0 : i32
    %c0_i32_1 = arith.constant 0 : i32
    return %c0_i32, %c0_i32_0 : i32, i32
  }
  func.func @transform_3(%arg0: i32) -> (i32, i32) {
    %c0_i32 = arith.constant 0 : i32
    %c0_i32_0 = arith.constant 0 : i32
    %c0_i32_1 = arith.constant 0 : i32
    return %c0_i32, %c0_i32_0 : i32, i32
  }
  func.func @transform_4(%arg0: i32) -> (i32, i32) {
    %c0_i32 = arith.constant 0 : i32
    %c0_i32_0 = arith.constant 0 : i32
    %c0_i32_1 = arith.constant 0 : i32
    return %c0_i32, %c0_i32_0 : i32, i32
  }
  func.func @transform_5(%arg0: i32) -> (i32, i32) {
    %c0_i32 = arith.constant 0 : i32
    %c0_i32_0 = arith.constant 0 : i32
    %c0_i32_1 = arith.constant 0 : i32
    return %c0_i32, %c0_i32_0 : i32, i32
  }
  func.func @transform_6(%arg0: i32) -> (i32, i32) {
    %c0_i32 = arith.constant 0 : i32
    %c0_i32_0 = arith.constant 0 : i32
    %c0_i32_1 = arith.constant 0 : i32
    return %c0_i32, %c0_i32_0 : i32, i32
  }
  func.func @transform_7(%arg0: i32) -> (i32, i32) {
    %c0_i32 = arith.constant 0 : i32
    %c0_i32_0 = arith.constant 0 : i32
    %c0_i32_1 = arith.constant 0 : i32
    return %c0_i32, %c0_i32_0 : i32, i32
  }
  func.func @transform_8(%arg0: i32) -> (i32, i32) {
    %c0_i32 = arith.constant 0 : i32
    %c0_i32_0 = arith.constant 0 : i32
    %c0_i32_1 = arith.constant 0 : i32
    return %c0_i32, %c0_i32_0 : i32, i32
  }
  func.func @transform_9(%arg0: i32) -> (i32, i32) {
    %c0_i32 = arith.constant 0 : i32
    %c0_i32_0 = arith.constant 0 : i32
    %c0_i32_1 = arith.constant 0 : i32
    return %c0_i32, %c0_i32_0 : i32, i32
  }
  func.func @transform_10(%arg0: i32) -> (i32, i32) {
    %c0_i32 = arith.constant 0 : i32
    %c0_i32_0 = arith.constant 0 : i32
    %c0_i32_1 = arith.constant 0 : i32
    return %c0_i32, %c0_i32_0 : i32, i32
  }
  func.func @transform_11(%arg0: i32) -> (i32, i32) {
    %c0_i32 = arith.constant 0 : i32
    %c0_i32_0 = arith.constant 0 : i32
    %c0_i32_1 = arith.constant 0 : i32
    return %c0_i32, %c0_i32_0 : i32, i32
  }
  func.func @transform_12(%arg0: i32) -> (i32, i32) {
    %c0_i32 = arith.constant 0 : i32
    %c0_i32_0 = arith.constant 0 : i32
    %c0_i32_1 = arith.constant 0 : i32
    return %c0_i32, %c0_i32_0 : i32, i32
  }
  func.func @transform_13(%arg0: i32) -> (i32, i32) {
    %c0_i32 = arith.constant 0 : i32
    %c0_i32_0 = arith.constant 0 : i32
    %c0_i32_1 = arith.constant 0 : i32
    return %c0_i32, %c0_i32_0 : i32, i32
  }
  func.func @transform_14(%arg0: i32) -> (i32, i32) {
    %c0_i32 = arith.constant 0 : i32
    %c0_i32_0 = arith.constant 0 : i32
    %c0_i32_1 = arith.constant 0 : i32
    return %c0_i32, %c0_i32_0 : i32, i32
  }
  func.func @transform_15(%arg0: i32) -> (i32, i32) {
    %c0_i32 = arith.constant 0 : i32
    %c0_i32_0 = arith.constant 0 : i32
    %c0_i32_1 = arith.constant 0 : i32
    return %c0_i32, %c0_i32_0 : i32, i32
  }
  func.func @transform_16(%arg0: i32) -> (i32, i32) {
    %c0_i32 = arith.constant 0 : i32
    %c0_i32_0 = arith.constant 0 : i32
    %c0_i32_1 = arith.constant 0 : i32
    return %c0_i32, %c0_i32_0 : i32, i32
  }
  func.func @transform_17(%arg0: i32) -> (i32, i32) {
    %c0_i32 = arith.constant 0 : i32
    %c0_i32_0 = arith.constant 0 : i32
    %c0_i32_1 = arith.constant 0 : i32
    return %c0_i32, %c0_i32_0 : i32, i32
  }
  func.func @transform_18(%arg0: i32) -> (i32, i32) {
    %c0_i32 = arith.constant 0 : i32
    %c0_i32_0 = arith.constant 0 : i32
    %c0_i32_1 = arith.constant 0 : i32
    return %c0_i32, %c0_i32_0 : i32, i32
  }
  func.func @transform_19(%arg0: i32) -> (i32, i32) {
    %c0_i32 = arith.constant 0 : i32
    %c0_i32_0 = arith.constant 0 : i32
    %c0_i32_1 = arith.constant 0 : i32
    return %c0_i32, %c0_i32_0 : i32, i32
  }
  func.func @transform_20(%arg0: i32) -> (i32, i32) {
    %c0_i32 = arith.constant 0 : i32
    %c0_i32_0 = arith.constant 0 : i32
    %c0_i32_1 = arith.constant 0 : i32
    return %c0_i32, %c0_i32_0 : i32, i32
  }
  func.func @transform_21(%arg0: i32) -> (i32, i32) {
    %c0_i32 = arith.constant 0 : i32
    %c0_i32_0 = arith.constant 0 : i32
    %c0_i32_1 = arith.constant 0 : i32
    return %c0_i32, %c0_i32_0 : i32, i32
  }
  func.func @transform_22(%arg0: i32) -> (i32, i32) {
    %c0_i32 = arith.constant 0 : i32
    %c0_i32_0 = arith.constant 0 : i32
    %c0_i32_1 = arith.constant 0 : i32
    return %c0_i32, %c0_i32_0 : i32, i32
  }
  func.func @transform_23(%arg0: i32) -> (i32, i32) {
    %c0_i32 = arith.constant 0 : i32
    %c0_i32_0 = arith.constant 0 : i32
    %c0_i32_1 = arith.constant 0 : i32
    return %c0_i32, %c0_i32_0 : i32, i32
  }
  func.func @transform_24(%arg0: i32) -> (i32, i32) {
    %c0_i32 = arith.constant 0 : i32
    %c0_i32_0 = arith.constant 0 : i32
    %c0_i32_1 = arith.constant 0 : i32
    return %c0_i32, %c0_i32_0 : i32, i32
  }
  func.func @transform_25(%arg0: i32) -> (i32, i32) {
    %c0_i32 = arith.constant 0 : i32
    %c0_i32_0 = arith.constant 0 : i32
    %c0_i32_1 = arith.constant 0 : i32
    return %c0_i32, %c0_i32_0 : i32, i32
  }
  func.func @transform_26(%arg0: i32) -> (i32, i32) {
    %c0_i32 = arith.constant 0 : i32
    %c0_i32_0 = arith.constant 0 : i32
    %c0_i32_1 = arith.constant 0 : i32
    return %c0_i32, %c0_i32_0 : i32, i32
  }
  func.func @transform_27(%arg0: i32) -> (i32, i32) {
    %c0_i32 = arith.constant 0 : i32
    %c0_i32_0 = arith.constant 0 : i32
    %c0_i32_1 = arith.constant 0 : i32
    return %c0_i32, %c0_i32_0 : i32, i32
  }
  func.func @transform_28(%arg0: i32) -> (i32, i32) {
    %c0_i32 = arith.constant 0 : i32
    %c0_i32_0 = arith.constant 0 : i32
    %c0_i32_1 = arith.constant 0 : i32
    return %c0_i32, %c0_i32_0 : i32, i32
  }
  func.func @transform_29(%arg0: i32) -> (i32, i32) {
    %c0_i32 = arith.constant 0 : i32
    %c0_i32_0 = arith.constant 0 : i32
    %c0_i32_1 = arith.constant 0 : i32
    return %c0_i32, %c0_i32_0 : i32, i32
  }
  func.func @transform_30(%arg0: i32) -> (i32, i32) {
    %c0_i32 = arith.constant 0 : i32
    %c0_i32_0 = arith.constant 0 : i32
    %c0_i32_1 = arith.constant 0 : i32
    return %c0_i32, %c0_i32_0 : i32, i32
  }
  func.func @transform_31(%arg0: i32) -> (i32, i32) {
    %c0_i32 = arith.constant 0 : i32
    %c0_i32_0 = arith.constant 0 : i32
    %c0_i32_1 = arith.constant 0 : i32
    return %c0_i32, %c0_i32_0 : i32, i32
  }
  func.func @transform_32(%arg0: i32) -> (i32, i32) {
    %c0_i32 = arith.constant 0 : i32
    %c0_i32_0 = arith.constant 0 : i32
    %c0_i32_1 = arith.constant 0 : i32
    return %c0_i32, %c0_i32_0 : i32, i32
  }
  func.func @transform_33(%arg0: i32) -> (i32, i32) {
    %c0_i32 = arith.constant 0 : i32
    %c0_i32_0 = arith.constant 0 : i32
    %c0_i32_1 = arith.constant 0 : i32
    return %c0_i32, %c0_i32_0 : i32, i32
  }
  func.func @transform_34(%arg0: i32) -> (i32, i32) {
    %c0_i32 = arith.constant 0 : i32
    %c0_i32_0 = arith.constant 0 : i32
    %c0_i32_1 = arith.constant 0 : i32
    return %c0_i32, %c0_i32_0 : i32, i32
  }
  func.func @transform_35(%arg0: i32) -> (i32, i32) {
    %c0_i32 = arith.constant 0 : i32
    %c0_i32_0 = arith.constant 0 : i32
    %c0_i32_1 = arith.constant 0 : i32
    return %c0_i32, %c0_i32_0 : i32, i32
  }
  func.func @transform_36(%arg0: i32) -> (i32, i32) {
    %c0_i32 = arith.constant 0 : i32
    %c0_i32_0 = arith.constant 0 : i32
    %c0_i32_1 = arith.constant 0 : i32
    return %c0_i32, %c0_i32_0 : i32, i32
  }
  func.func @transform_37(%arg0: i32) -> (i32, i32) {
    %c0_i32 = arith.constant 0 : i32
    %c0_i32_0 = arith.constant 0 : i32
    %c0_i32_1 = arith.constant 0 : i32
    return %c0_i32, %c0_i32_0 : i32, i32
  }
  func.func @transform_38(%arg0: i32) -> (i32, i32) {
    %c0_i32 = arith.constant 0 : i32
    %c0_i32_0 = arith.constant 0 : i32
    %c0_i32_1 = arith.constant 0 : i32
    return %c0_i32, %c0_i32_0 : i32, i32
  }
  func.func @transform_39(%arg0: i32) -> (i32, i32) {
    %c0_i32 = arith.constant 0 : i32
    %c0_i32_0 = arith.constant 0 : i32
    %c0_i32_1 = arith.constant 0 : i32
    return %c0_i32, %c0_i32_0 : i32, i32
  }
  func.func @transform_40(%arg0: i32) -> (i32, i32, i32) {
    %c0_i32 = arith.constant 0 : i32
    %c0_i32_0 = arith.constant 0 : i32
    %c0_i32_1 = arith.constant 0 : i32
    return %arg0, %c0_i32, %c0_i32_0 : i32, i32, i32
  }
  func.func @transform_41(%arg0: i32) -> (i32, i32, i32) {
    %c0_i32 = arith.constant 0 : i32
    %c0_i32_0 = arith.constant 0 : i32
    %c0_i32_1 = arith.constant 0 : i32
    return %arg0, %c0_i32, %c0_i32_0 : i32, i32, i32
  }
}

</mosaic_0001>

<bundles_post_ra>
// kernel: chain_of_experts_forward.1
= control target key start
LH: loop header
LB: loop body
LE: loop exit
PB: predicated region body
PF: predicated region fallthrough
CT: control target
= control target key end

     0   :  { %s7175_s6 = smov 1   ;;  %s7176_s10 = smov 2   ;;  %s8230_s0 = inlined_call_operand.smem [shape: u32[42], index: -1, kind: input, shape index: {}] }
   0x1   :  { %s7232_s5 = sld [smem:[%s8230_s0]]   ;;  %s7177_s14 = smov 3  }
   0x2   :  { %s7237_s9 = sld [smem:[%s8230_s0 + %s7175_s6]]   ;;  %s7178_s18 = smov 4  }
   0x3   :  { %s7242_s13 = sld [smem:[%s8230_s0 + %s7176_s10]]   ;;  %s7179_s22 = smov 5  }
   0x4   :  { %s7247_s17 = sld [smem:[%s8230_s0 + %s7177_s14]]   ;;  %s7180_s26 = smov 6  }
   0x5   :  { %s7252_s21 = sld [smem:[%s8230_s0 + %s7178_s18]]   ;;  %s7181_s30 = smov 7  }
   0x6   :  { %s7257_s25 = sld [smem:[%s8230_s0 + %s7179_s22]]   ;;  %s7182_s4 = smov 8  }
   0x7   :  { %8253 = sst [smem:[#allocation5_spill]] %s7232_s5  ;;  %s7183_s10 = smov 9  }
   0x8   :  { %8254 = sst [smem:[#allocation6_spill]] %s7237_s9  ;;  %s7184_s15 = smov 10  }
   0x9   :  { %8255 = sst [smem:[#allocation7_spill]] %s7242_s13  ;;  %s7185_s20 = smov 11  }
   0xa   :  { %8256 = sst [smem:[#allocation8_spill]] %s7247_s17  ;;  %s7187_s1 = smov 13  }
   0xb   :  { %s7262_s29 = sld [smem:[%s8230_s0 + %s7180_s26]]   ;;  %s7186_s26 = smov 12  }
   0xc   :  { %s7267_s3 = sld [smem:[%s8230_s0 + %s7181_s30]]   ;;  %s7188_s7 = smov 14  }
   0xd   :  { %s7272_s8 = sld [smem:[%s8230_s0 + %s7182_s4]]   ;;  %s7190_s22 = smov 16  }
   0xe   :  { %s7277_s14 = sld [smem:[%s8230_s0 + %s7183_s10]]   ;;  %s7191_s28 = smov 17  }
   0xf   :  { %s7282_s19 = sld [smem:[%s8230_s0 + %s7184_s15]]   ;;  %s7189_s15 = smov 15  }
  0x10   :  { %s7287_s24 = sld [smem:[%s8230_s0 + %s7185_s20]]  }
  0x11   :  { %s7292_s30 = sld [smem:[%s8230_s0 + %s7186_s26]]  }
  0x12   :  { %8257 = sst [smem:[#allocation9_spill]] %s7267_s3 }
  0x13   :  { %8258 = sst [smem:[#allocation10_spill]] %s7272_s8 }
  0x14   :  { %8259 = sst [smem:[#allocation11_spill]] %s7277_s14 }
  0x15   :  { %s7297_s6 = sld [smem:[%s8230_s0 + %s7187_s1]]  }
  0x16   :  { %s7302_s12 = sld [smem:[%s8230_s0 + %s7188_s7]]   ;;  %s7192_s7 = smov 18  }
  0x17   :  { %8260 = sst [smem:[#allocation12_spill]] %s7292_s30 }
  0x18   :  { %s7307_s20 = sld [smem:[%s8230_s0 + %s7189_s15]]   ;;  %s7193_s15 = smov 19  }
  0x19   :  { %s7312_s27 = sld [smem:[%s8230_s0 + %s7190_s22]]   ;;  %s7194_s22 = smov 20  }
  0x1a   :  { %s7317_s4 = sld [smem:[%s8230_s0 + %s7191_s28]]   ;;  %s7195_s28 = smov 21  }
  0x1b   :  { %8261 = sst [smem:[#allocation13_spill]] %s7297_s6 }
  0x1c   :  { %8262 = sst [smem:[#allocation14_spill]] %s7302_s12 }
  0x1d   :  { %s7322_s6 = sld [smem:[%s8230_s0 + %s7192_s7]]   ;;  %s7196_s7 = smov 22  }
  0x1e   :  { %8263 = sst [smem:[#allocation15_spill]] %s7307_s20 }
  0x1f   :  { %s7327_s20 = sld [smem:[%s8230_s0 + %s7193_s15]]   ;;  %s7197_s15 = smov 23  }
  0x20   :  { %8264 = sst [smem:[#allocation16_spill]] %s7317_s4 }
  0x21   :  { %s7332_s30 = sld [smem:[%s8230_s0 + %s7194_s22]]   ;;  %s7198_s22 = smov 24  }
  0x22   :  { %s7337_s4 = sld [smem:[%s8230_s0 + %s7195_s28]]   ;;  %s7199_s28 = smov 25  }
  0x23   :  { %8265 = sst [smem:[#allocation17_spill]] %s7322_s6 }
  0x24   :  { %s7342_s6 = sld [smem:[%s8230_s0 + %s7196_s7]]   ;;  %s7200_s7 = smov 26  }
  0x25   :  { %8266 = sst [smem:[#allocation18_spill]] %s7327_s20 }
  0x26   :  { %s7347_s20 = sld [smem:[%s8230_s0 + %s7197_s15]]   ;;  %s7201_s15 = smov 27  }
  0x27   :  { %8267 = sst [smem:[#allocation19_spill]] %s7332_s30 }
  0x28   :  { %8268 = sst [smem:[#allocation20_spill]] %s7337_s4 }
  0x29   :  { %s7352_s30 = sld [smem:[%s8230_s0 + %s7198_s22]]   ;;  %s7202_s22 = smov 28  }
  0x2a   :  { %8269 = sst [smem:[#allocation21_spill]] %s7342_s6 }
  0x2b   :  { %s7357_s4 = sld [smem:[%s8230_s0 + %s7199_s28]]   ;;  %s7203_s28 = smov 29  }
  0x2c   :  { %8270 = sst [smem:[#allocation22_spill]] %s7347_s20 }
  0x2d   :  { %s7362_s6 = sld [smem:[%s8230_s0 + %s7200_s7]]   ;;  %s7204_s7 = smov 30  }
  0x2e   :  { %s7367_s20 = sld [smem:[%s8230_s0 + %s7201_s15]]   ;;  %s7205_s15 = smov 31  }
  0x2f   :  { %8271 = sst [smem:[#allocation23_spill]] %s7352_s30 }
  0x30   :  { %s7372_s30 = sld [smem:[%s8230_s0 + %s7202_s22]]   ;;  %s7206_s22 = smov 32  }
  0x31   :  { %8272 = sst [smem:[#allocation24_spill]] %s7357_s4 }
  0x32   :  { %s7377_s4 = sld [smem:[%s8230_s0 + %s7203_s28]]   ;;  %s7207_s28 = smov 33  }
  0x33   :  { %8273 = sst [smem:[#allocation25_spill]] %s7362_s6 }
  0x34   :  { %8274 = sst [smem:[#allocation26_spill]] %s7367_s20 }
  0x35   :  { %s7382_s6 = sld [smem:[%s8230_s0 + %s7204_s7]]   ;;  %s7208_s7 = smov 34  }
  0x36   :  { %8275 = sst [smem:[#allocation27_spill]] %s7372_s30 }
  0x37   :  { %s7387_s20 = sld [smem:[%s8230_s0 + %s7205_s15]]   ;;  %s7209_s15 = smov 35  }
  0x38   :  { %8276 = sst [smem:[#allocation28_spill]] %s7377_s4 }
  0x39   :  { %s7392_s30 = sld [smem:[%s8230_s0 + %s7206_s22]]   ;;  %s7210_s22 = smov 36  }
  0x3a   :  { %s7397_s4 = sld [smem:[%s8230_s0 + %s7207_s28]]   ;;  %s7211_s28 = smov 37  }
  0x3b   :  { %8277 = sst [smem:[#allocation29_spill]] %s7382_s6 }
  0x3c   :  { %s7402_s6 = sld [smem:[%s8230_s0 + %s7208_s7]]   ;;  %s7212_s7 = smov 38  }
  0x3d   :  { %8278 = sst [smem:[#allocation30_spill]] %s7387_s20 }
  0x3e   :  { %s7407_s20 = sld [smem:[%s8230_s0 + %s7209_s15]]   ;;  %s7213_s15 = smov 39  }
  0x3f   :  { %8279 = sst [smem:[#allocation31_spill]] %s7392_s30 }
  0x40   :  { %8280 = sst [smem:[#allocation32_spill]] %s7397_s4 }
  0x41   :  { %s7412_s30 = sld [smem:[%s8230_s0 + %s7210_s22]]   ;;  %s7214_s22 = smov 40  }
  0x42   :  { %8281 = sst [smem:[#allocation33_spill]] %s7402_s6 }
  0x43   :  { %s7417_s4 = sld [smem:[%s8230_s0 + %s7211_s28]]   ;;  %s7215_s28 = smov 41  }
  0x44   :  { %8282 = sst [smem:[#allocation34_spill]] %s7407_s20 }
  0x45   :  { %s7422_s6 = sld [smem:[%s8230_s0 + %s7212_s7]]  }
  0x46   :  { %s7427_s20 = sld [smem:[%s8230_s0 + %s7213_s15]]  }
  0x47   :  { %8283 = sst [smem:[#allocation35_spill]] %s7412_s30 }
  0x48   :  { %s7432_s30 = sld [smem:[%s8230_s0 + %s7214_s22]]  }
  0x49   :  { %8284 = sst [smem:[#allocation36_spill]] %s7417_s4 }
  0x4a   :  { %s7437_s4 = sld [smem:[%s8230_s0 + %s7215_s28]]  }
  0x4b   :  { %8285 = sst [smem:[#allocation37_spill]] %s7422_s6 }
  0x4c   :  { %89 = vsyncpa [#allocation3], 0 }
  0x4d   :  { %91 = vsyncpa [#allocation3 + $0x1], 0  ;;  %s7439_s7 = smov 0   ;;  %s7441_s10 = smov 0  }
  0x4e   :  { %s7443_s11 = smov 0   ;;  %s7445_s15 = smov 0  }
  0x4f LB: > { %s8286_s12 = sld [smem:[#allocation14_spill]]  ;;  %s8287_s6 = sld [smem:[#allocation37_spill]]  ;;  %s7169_s11 = sphi %s7443_s11, %s8328_s11   ;;  %s7165_s10 = sphi %s7441_s10, %s8327_s10   ;;  %s7161_s7 = sphi %s7439_s7, %s8326_s7   ;;  %s7173_s15 = sphi %s7445_s15, %s8329_s15  }
  0x50   : > { %s8288_s8 = sld [smem:[#allocation10_spill]]  ;;  %s7460_s0 = sadd.s32 4294967295, %s7173_s15  }
  0x51   : > { %s5714_s16 = sadd.s32 4294967294, %s7173_s15   ;;  %s7464_s18 = sadd.s32 1, %s7173_s15  }
  0x52   : > { %s980_s22 = sadd.s32 1, %s7169_s11  ;;  %s977_s23 = ssub.s32 %s7173_s15, %s7464_s18 }
  0x53   : > { %p990_p0 = scmp.ne.s32.totalorder %s7169_s11, %s7165_s10  ;;  %p978_p1 = scmp.eq.s32.totalorder %s977_s23, 0 }
  0x54   : > { %p991_p2 = scmp.eq.s32.totalorder %s7460_s0, 1  ;;  %p996_p3 = scmp.ne.s32.totalorder %s7165_s10, %s7161_s7 }
  0x55   : > { %p997_p4 = scmp.eq.s32.totalorder %s5714_s16, 1  ;;  %p5717_p7 = scmp.ge.s32.totalorder %s7173_s15, 1 }
  0x56   : > { %s7475_s26 = scalar_select %p978_p1, %s7169_s11, %s980_s22  }
  0x57   : > { %p7477_p5 = por %p991_p2, %p990_p0  ;;  %p7481_p6 = por %p997_p4, %p996_p3 }
  0x58   : > { %p1145_p8 = scmp.lt.s32.totalorder %s7173_s15, 3 }
  0x5a   : > { %p1146_p9 = pnand %p5717_p7, %p1145_p8 }
  0x5b   : > { %s8291_s5 = sld [smem:[#allocation5_spill]] (!%p1146_p9)  ;;  %p1254_p10 = scmp.lt.s32.totalorder (!%p1146_p9), %s7460_s0, 1  ;;  %v6843_v4 = vld [vmem:[%s7252_s21] sm:$0xff] (!%p1146_p9)   ;;  %v6845_v22 = vld [vmem:[%s7252_s21 + $0x8] sm:$0xff] (!%p1146_p9)   ;;  %v6847_v24 = vld [vmem:[%s7252_s21 + $0x10] sm:$0xff] (!%p1146_p9)   ;;  %vm1933_vm0 = vcmask (!%p1146_p9), 261120  }
  0x5c   : > { %1149 = sbr.rel (%p1146_p9) target bundleno = 7145 (0x1be9), region = 180  ;;  %v6844_v5 = vld [vmem:[%s7262_s29] sm:$0xff] (!%p1146_p9)   ;;  %6211 = vmatprep.subr.bf16.mxu0 (!%p1146_p9), %v6843_v4  ;;  %v6846_v23 = vld [vmem:[%s7262_s29 + $0x8] sm:$0xff] (!%p1146_p9)   ;;  %v6848_v25 = vld [vmem:[%s7262_s29 + $0x10] sm:$0xff] (!%p1146_p9)   ;;  %s8292_s13 = sld [smem:[#allocation7_spill]] (!%p1146_p9)  ;;  %vm7221_vm2 = vmmov (!%p1146_p9), 0  }
  0x5d   : > { %6231 = vmatprep.subr.bf16.mxu1 (!%p1146_p9), %v6844_v5  ;;  %6212 = vmatpush3.bf16.msra.mxu0 (!%p1146_p9), %v6843_v4  ;;  %v6849_v26 = vld [vmem:[%s7252_s21 + $0x18] sm:$0xff] (!%p1146_p9)   ;;  %v6851_v28 = vld [vmem:[%s7252_s21 + $0x20] sm:$0xff] (!%p1146_p9)   ;;  %v6853_v30 = vld [vmem:[%s7252_s21 + $0x28] sm:$0xff] (!%p1146_p9)   ;;  %s8293_s17 = sld [smem:[#allocation8_spill]] (!%p1146_p9)  ;;  %s8294_s3 = sld [smem:[#allocation9_spill]] (!%p1146_p9)  ;;  %vm4227_vm4 = vcmask (!%p1146_p9), 1043456  }
  0x5e   : > { %6232 = vmatpush3.bf16.msra.mxu1 (!%p1146_p9), %v6844_v5  ;;  %6213 = vmatprep.subr.bf16.mxu0 (!%p1146_p9), %v6845_v22  ;;  %v6850_v27 = vld [vmem:[%s7262_s29 + $0x18] sm:$0xff] (!%p1146_p9)   ;;  %v6852_v29 = vld [vmem:[%s7262_s29 + $0x20] sm:$0xff] (!%p1146_p9)   ;;  %v6854_v31 = vld [vmem:[%s7262_s29 + $0x28] sm:$0xff] (!%p1146_p9)   ;;  %s8297_s14 = sld [smem:[#allocation11_spill]] (!%p1146_p9)  ;;  %s8298_s9 = sld [smem:[#allocation6_spill]] (!%p1146_p9)  ;;  %vm4211_vm5 = vcmask (!%p1146_p9), 27648  }
  0x5f   : > { %6233 = vmatprep.subr.bf16.mxu1 (!%p1146_p9), %v6846_v23  ;;  %v6855_v32 = vld [vmem:[%s7252_s21 + $0x30] sm:$0xff] (!%p1146_p9)   ;;  %v6857_v34 = vld [vmem:[%s7252_s21 + $0x38] sm:$0xff] (!%p1146_p9)   ;;  %v6859_v36 = vld [vmem:[%s8288_s8] sm:$0xff] (!%p1146_p9)   ;;  %vm4223_vm6 = vcmask (!%p1146_p9), 31744  }
  0x60   : > { %v6856_v33 = vld [vmem:[%s7262_s29 + $0x30] sm:$0xff] (!%p1146_p9)   ;;  %v6858_v35 = vld [vmem:[%s7262_s29 + $0x38] sm:$0xff] (!%p1146_p9)   ;;  %v6860_v5 = vld [vmem:[%s8288_s8 + $0x8] sm:$0xff] (!%p1146_p9)  }
  0x61   : > { %6214 = vmatpush3.bf16.msra.mxu0 (!%p1146_p9), %v6845_v22  ;;  %vm7561_vm1 = vmpackc.low (!%p1146_p9), %vm1933_vm0, %vm1933_vm0 }
  0x62   : > { %6234 = vmatpush3.bf16.msra.mxu1 (!%p1146_p9), %v6846_v23  ;;  %6215 = vmatprep.subr.bf16.mxu0 (!%p1146_p9), %v6847_v24  ;;  %v5724_v51 = vld [vmem:[%s8292_s13] ss:$0 sm:$0xff] (!%p1146_p9) }
  0x63   : > { %s7489_s2 = scalar_select %p1254_p10, %s7460_s0, 1  ;;  %6235 = vmatprep.subr.bf16.mxu1 %v6848_v25  ;;  %v5725_v56 = vld [vmem:[%s8293_s17] ss:$0 sm:$0xff] }
  0x65   : > { %s5971_s16 = sshll.u32 %s7489_s2, 5  ;;  %6216 = vmatpush3.bf16.msra.mxu0 %v6847_v24 }
  0x66   : > { %s1258_s22 = scalar_lea.vmem %s8291_s5, %s5971_s16  ;;  %6236 = vmatpush3.bf16.msra.mxu1 %v6848_v25  ;;  %6217 = vmatprep.subr.bf16.mxu0 %v6849_v26  ;;  %s1263_s23 = scalar_lea.vmem %s8298_s9, %s5971_s16 }
  0x67   : > { %v1549_v0 = vld [vmem:[%s1258_s22] sm:$0xff]  ;;  %v1551_v1 = vld [vmem:[%s1258_s22 + $0x10] sm:$0xff]  ;;  %v1550_v2 = vld [vmem:[%s1258_s22 + $0x8] sm:$0xff]  ;;  %6237 = vmatprep.subr.bf16.mxu1 %v6850_v27  ;;  %s8240_s16 = smov 96   ;;  %s8311_s5 = sld [smem:[#allocation24_spill]] }
  0x68   : > { %1557 = vadd.xlane.f32.xlu0 %v1549_v0  ;;  %1561 = vadd.xlane.f32.xlu1 %v1551_v1  ;;  %v1552_v3 = vld [vmem:[%s1258_s22 + $0x18] sm:$0xff]  ;;  %s8242_s22 = smov 64   ;;  %s8322_s9 = sld [smem:[#allocation36_spill]] }
  0x69   : > { %6218 = vmatpush3.bf16.msra.mxu0 %v6849_v26 }
  0x6a   : > { %6238 = vmatpush3.bf16.msra.mxu1 %v6850_v27  ;;  %6219 = vmatprep.subr.bf16.mxu0 %v6851_v28 }
  0x6b   : > { %6239 = vmatprep.subr.bf16.mxu1 %v6852_v29 }
  0x6c   : > { %1559 = vadd.xlane.f32.xlu0 %v1550_v2  ;;  %1563 = vadd.xlane.f32.xlu1 %v1552_v3 }
  0x6d   : > { %6220 = vmatpush3.bf16.msra.mxu0 %v6851_v28 }
  0x6e   : > { %6240 = vmatpush3.bf16.msra.mxu1 %v6852_v29  ;;  %6221 = vmatprep.subr.bf16.mxu0 %v6853_v30 }
  0x6f   : > { %6241 = vmatprep.subr.bf16.mxu1 %v6854_v31 }
  0x71   : > { %6222 = vmatpush3.bf16.msra.mxu0 %v6853_v30 }
  0x72   : > { %6242 = vmatpush3.bf16.msra.mxu1 %v6854_v31  ;;  %6223 = vmatprep.subr.bf16.mxu0 %v6855_v32 }
  0x73   : > { %6243 = vmatprep.subr.bf16.mxu1 %v6856_v33 }
  0x75   : > { %6224 = vmatpush3.bf16.msra.mxu0 %v6855_v32 }
  0x76   : > { %6244 = vmatpush3.bf16.msra.mxu1 %v6856_v33  ;;  %6225 = vmatprep.subr.bf16.mxu0 %v6857_v34 }
  0x77   : > { %6245 = vmatprep.subr.bf16.mxu1 %v6858_v35 }
  0x79   : > { %6226 = vmatpush3.bf16.msra.mxu0 %v6857_v34 }
  0x7a   : > { %6246 = vmatpush3.bf16.msra.mxu1 %v6858_v35  ;;  %6251 = vmatprep.subr.bf16.mxu0 %v6859_v36 }
  0xf5   : > { %v1558_v6 = vpop.xlane.xlu0 %1557  ;;  %v1562_v7 = vpop.xlane.xlu1 %1561 }
  0xf6   : > { %v1566_v8 = vmul.f32 0.0078125, %v1558_v6  ;;  %v1568_v9 = vmul.f32 0.0078125, %v1562_v7  ;;  %v6861_v6 = vld [vmem:[%s8288_s8 + $0x10] sm:$0xff]   ;;  %v6862_v7 = vld [vmem:[%s8288_s8 + $0x18] sm:$0xff]  }
  0xf8   : > { %v7497_v10 = vsub.f32 %v1549_v0, %v1566_v8  ;;  %v7499_v11 = vsub.f32 %v1551_v1, %v1568_v9  ;;  %v6863_v8 = vld [vmem:[%s8288_s8 + $0x20] sm:$0xff]   ;;  %v6864_v9 = vld [vmem:[%s8288_s8 + $0x28] sm:$0xff]  }
  0xf9   : > { %v1560_v12 = vpop.xlane.xlu0 %1559  ;;  %v1564_v13 = vpop.xlane.xlu1 %1563 }
  0xfa   : > { %v1567_v14 = vmul.f32 0.0078125, %v1560_v12  ;;  %v1574_v15 = vmul.f32 %v7497_v10, %v7497_v10  ;;  %v1569_v16 = vmul.f32 0.0078125, %v1564_v13  ;;  %v1576_v18 = vmul.f32 %v7499_v11, %v7499_v11  ;;  %v5726_v12 = vld [vmem:[%s7257_s25] ss:$0 sm:$0xff] }
  0xfc   : > { %1578 = vadd.xlane.f32.xlu0 %v1574_v15  ;;  %v7503_v17 = vsub.f32 %v1552_v3, %v1569_v16  ;;  %v7507_v19 = vsub.f32 %v1550_v2, %v1567_v14  ;;  %v5735_v15 = vld [vmem:[%s8294_s3] ss:$0 sm:$0xff]  ;;  %s8306_s3 = sld [smem:[#allocation21_spill]] }
  0xfe   : > { %v1575_v20 = vmul.f32 %v7507_v19, %v7507_v19  ;;  %v1577_v21 = vmul.f32 %v7503_v17, %v7503_v17 }
 0x100   : > { %1582 = vadd.xlane.f32.xlu0 %v1576_v18  ;;  %1580 = vadd.xlane.f32.xlu1 %v1575_v20 }
 0x104   : > { %1584 = vadd.xlane.f32.xlu1 %v1577_v21 }
 0x189   : > { %v1579_v37 = vpop.xlane.xlu0 %1578 }
 0x18a   : > { %v1586_v38 = vmul.f32 0.0078125, %v1579_v37 }
 0x18c   : > { %v1590_v39 = vadd.f32 1e-12, %v1586_v38 }
 0x18d   : > { %v1581_v40 = vpop.xlane.xlu1 %1580  ;;  %v1583_v41 = vpop.xlane.xlu0 %1582 }
 0x18e   : > { %7003 = vrsqrt.f32 %v1590_v39  ;;  %v1587_v42 = vmul.f32 0.0078125, %v1581_v40  ;;  %v1588_v43 = vmul.f32 0.0078125, %v1583_v41 }
 0x190   : > { %v1591_v44 = vadd.f32 1e-12, %v1587_v42  ;;  %v1592_v45 = vadd.f32 1e-12, %v1588_v43 }
 0x191   : > { %v1585_v46 = vpop.xlane.xlu1 %1584 }
 0x192   : > { %7005 = vrsqrt.f32 %v1591_v44  ;;  %v1589_v47 = vmul.f32 0.0078125, %v1585_v46 }
 0x193   : > { %7007 = vrsqrt.f32 %v1592_v45 }
 0x194   : > { %v1593_v48 = vadd.f32 1e-12, %v1589_v47 }
 0x196   : > { %7009 = vrsqrt.f32 %v1593_v48 }
 0x198   : > { %v7004_v49 = vpop.eup %7003 }
 0x199   : > { %v1598_v50 = vmul.f32 %v7004_v49, %v7497_v10  ;;  %v6865_v10 = vld [vmem:[%s8288_s8 + $0x30] sm:$0xff]   ;;  %v7597_v49 = vld [vmem:[%s1263_s23 + $0x8] sm:$0xff] }
 0x19b   : > { %v1608_v55 = vmul.f32 %v5724_v51, %v1598_v50 }
 0x19c   : > { %v7006_v52 = vpop.eup %7005 }
 0x19d   : > { %v7008_v53 = vpop.eup %7007  ;;  %v1599_v54 = vmul.f32 %v7006_v52, %v7507_v19  ;;  %v7533_v60 = vadd.f32 %v5725_v56, %v1608_v55  ;;  %v7599_v52 = vld [vmem:[%s1263_s23] sm:$0xff] }
 0x19e   : > { %v1600_v57 = vmul.f32 %v7008_v53, %v7499_v11  ;;  %v6866_v11 = vld [vmem:[%s8288_s8 + $0x38] sm:$0xff]   ;;  %s8312_s8 = smov 64  }
 0x19f   : > { %v1609_v58 = vmul.f32 %v5724_v51, %v1599_v54 }
 0x1a0   : > { %v7010_v59 = vpop.eup %7009  ;;  %v1610_v63 = vmul.f32 %v5724_v51, %v1600_v57  ;;  %v7603_v57 = vld [vmem:[%s1263_s23 + $0x18] sm:$0xff] }
 0x1a1   : > { %v7535_v61 = vadd.f32 %v5725_v56, %v1609_v58  ;;  %v1601_v62 = vmul.f32 %v7010_v59, %v7503_v17 }
 0x1a2   : > { %v7540_v2 = vadd.f32 %v5725_v56, %v1610_v63  ;;  %v7606_v63 = vld [vmem:[%s1263_s23 + $0x10] sm:$0xff]  ;;  %s8238_s23 = smov 32  }
 0x1a3   : > { %v1622_v0 = vpack.c.bf16 %v7535_v61, %v7533_v60  ;;  %v1611_v1 = vmul.f32 %v5724_v51, %v1601_v62 }
 0x1a5   : > { %6227 = vmatprep.mubr.bf16.mxu0 %v1622_v0  ;;  %6247 = vmatprep.mubr.bf16.mxu1 %v1622_v0  ;;  %v7542_v3 = vadd.f32 %v5725_v56, %v1611_v1 }
 0x1a7   : > { %v1623_v4 = vpack.c.bf16 %v7542_v3, %v7540_v2 }
 0x1a9   : > { %6228 = vmatmul.mubr.bf16.vlgmr.msra.gmra.mrb[0].mxu0 %v1623_v4  ;;  %6248 = vmatmul.mubr.bf16.vlgmr.msra.gmra.mrb[0].mxu1 %v1623_v4 }
 0x1aa   : > { %6252 = vmatpush3.bf16.msra.mxu0 %v6859_v36  ;;  %6267 = vmatprep.mubr.bf16.mxu0 %v1622_v0  ;;  %v5744_v36 = vld [vmem:[%s8297_s14] ss:$0 sm:$0xff] }
 0x1ab   : > { %6253 = vmatprep.subr.bf16.mxu0 %v6860_v5 }
 0x1ae   : > { %6254 = vmatpush3.bf16.msra.mxu0 %v6860_v5 }
 0x1af   : > { %6255 = vmatprep.subr.bf16.mxu0 %v6861_v6 }
 0x1b2   : > { %6256 = vmatpush3.bf16.msra.mxu0 %v6861_v6 }
 0x1b3   : > { %6257 = vmatprep.subr.bf16.mxu0 %v6862_v7 }
 0x1b6   : > { %6258 = vmatpush3.bf16.msra.mxu0 %v6862_v7 }
 0x1b7   : > { %6259 = vmatprep.subr.bf16.mxu0 %v6863_v8 }
 0x1ba   : > { %6260 = vmatpush3.bf16.msra.mxu0 %v6863_v8 }
 0x1bb   : > { %6261 = vmatprep.subr.bf16.mxu0 %v6864_v9 }
 0x1be   : > { %6262 = vmatpush3.bf16.msra.mxu0 %v6864_v9 }
 0x1bf   : > { %6263 = vmatprep.subr.bf16.mxu0 %v6865_v10 }
 0x1c2   : > { %6264 = vmatpush3.bf16.msra.mxu0 %v6865_v10 }
 0x1c3   : > { %6265 = vmatprep.subr.bf16.mxu0 %v6866_v11 }
 0x1c6   : > { %6266 = vmatpush3.bf16.msra.mxu0 %v6866_v11 }
 0x1c9   : > { %6268 = vmatmul.mubr.bf16.vlgmr.msra.gmra.mrb[4].mxu0 %v1623_v4 }
 0x27c   : > { %v6229_v13 = vpop.f32.mrb[0].mxu0  ;;  %v6249_v14 = vpop.f32.mrb[0].mxu1 }
 0x27d   : > { %v1712_v16 = vpop.f32.mrb[1].mxu0  ;;  %v1815_v17 = vpop.f32.mrb[1].mxu1  ;;  %v1824_v21 = vadd.f32 %v6249_v14, %v5735_v15  ;;  %v7579_v33 = vadd.f32 %v6229_v13, %v5726_v12 }
 0x27e   : > { %v7555_v18 = vadd.f32 %v5726_v12, %v1712_v16  ;;  %v6230_v19 = vpop.f32.mrb[2].mxu0  ;;  %v6250_v20 = vpop.f32.mrb[2].mxu1  ;;  %v1816_v25 = vadd.f32 %v5735_v15, %v1815_v17 }
 0x27f   : > { %v1827_v22 = vadd.f32 %v6250_v20, %v5735_v15  ;;  %v1715_v23 = vpop.f32.mrb[3].mxu0  ;;  %v1818_v24 = vpop.f32.mrb[3].mxu1  ;;  %v7585_v34 = vadd.f32 %v6230_v19, %v5726_v12 }
 0x280   : > { %v1819_v26 = vadd.f32 %v5735_v15, %v1818_v24  ;;  %6279 = vmatprep.mubr.msk.f32.mxu1 %vm1933_vm0, %v7555_v18  ;;  %v7577_v32 = vadd.f32 %v5726_v12, %v1715_v23 }
 0x281   : > { %v6604_v28 = vpack.c.bf16 %v1827_v22, %v1824_v21  ;;  %v7565_v29 = vpack.i.bf16 %v1827_v22, %v1824_v21 }
 0x282   : > { %v6598_v30 = vpack.c.bf16 %v1819_v26, %v1816_v25  ;;  %v7567_v31 = vpack.i.bf16 %v1819_v26, %v1816_v25 }
 0x284   : > { %6600 = vmatprep.subr.msk.bf16.mxu1 %vm7561_vm1, %v6598_v30 }
 0x285   : > { %6603 = vmatpush3.bf16.xpose.msk.msra.mxu1 %vm7561_vm1, %v6598_v30 }
 0x286   : > { %6606 = vmatprep.subr.msk.bf16.mxu1 %vm7561_vm1, %v6604_v28 }
 0x28d   : > { %6609 = vmatpush3.bf16.xpose.msk.msra.mxu1 %vm7561_vm1, %v6604_v28 }
 0x294   : > { %6280 = vmatmul.mubr.msk.f32.vlgmr.msra.gmra.mrb[4].mxu1 %vm1933_vm0, %v7577_v32 }
 0x295   : > { %6282 = vmatprep.mubr.msk.f32.mxu1 %vm1933_vm0, %v7579_v33 }
 0x298   : > { %6283 = vmatmul.mubr.msk.f32.gmra.mrb[6].mxu1 %vm1933_vm0, %v7585_v34 }
 0x29c   : > { %v6269_v35 = vpop.f32.mrb[4].mxu0 }
 0x29d   : > { %v1918_v37 = vpop.f32.mrb[5].mxu0  ;;  %v1927_v39 = vadd.f32 %v6269_v35, %v5744_v36 }
 0x29e   : > { %v6270_v38 = vpop.f32.mrb[6].mxu0  ;;  %v1919_v42 = vadd.f32 %v5744_v36, %v1918_v37 }
 0x29f   : > { %v1930_v40 = vadd.f32 %v6270_v38, %v5744_v36  ;;  %v1921_v41 = vpop.f32.mrb[7].mxu0 }
 0x2a0   : > { %v1922_v43 = vadd.f32 %v5744_v36, %v1921_v41 }
 0x2a1   : > { %v6614_v44 = vpack.c.bf16 %v1930_v40, %v1927_v39  ;;  %v7590_v45 = vpack.i.bf16 %v1930_v40, %v1927_v39 }
 0x2a2   : > { %v6610_v46 = vpack.c.bf16 %v1922_v43, %v1919_v42  ;;  %v7592_v47 = vpack.i.bf16 %v1922_v43, %v1919_v42 }
 0x2a4   : > { %6611 = vmatprep.subr.bf16.mxu1 %v6610_v46 }
 0x2a5   : > { %6613 = vmatpush3.bf16.msra.mxu1 %v6610_v46 }
 0x2a6   : > { %6615 = vmatprep.subr.bf16.mxu1 %v6614_v44 }
 0x2a9   : > { %6617 = vmatpush3.bf16.msra.mxu1 %v6614_v44 }
 0x367   : > { %v6281_v48 = vpop.f32.mrb[4].mxu1 }
 0x368   : > { %v2044_v50 = vmul.f32 0.17677669, %v6281_v48  ;;  %v2024_v51 = vpop.f32.mrb[5].mxu1 }
 0x369   : > { %v2043_v53 = vmul.f32 0.17677669, %v2024_v51 }
 0x36a   : > { %v2048_v54 = vadd.f32 %v2044_v50, %v7597_v49 }
 0x36b   : > { %v6284_v55 = vpop.f32.mrb[6].mxu1  ;;  %v2047_v56 = vadd.f32 %v2043_v53, %v7599_v52 }
 0x36c   : > { %v2046_v58 = vmul.f32 0.17677669, %v6284_v55  ;;  %v2034_v59 = vpop.f32.mrb[7].mxu1  ;;  %v2054_v62 = vsel %vm1933_vm0, %v2048_v54, -inf }
 0x36d   : > { %v2045_v0 = vmul.f32 0.17677669, %v2034_v59  ;;  %2055 = vmax.xlane.f32.xlu1 %v2054_v62  ;;  %v2051_v1 = vsel %vm1933_vm0, %v2047_v56, -inf }
 0x36e   : > { %2052 = vmax.xlane.f32.xlu0 %v2051_v1  ;;  %v2050_v4 = vadd.f32 %v2046_v58, %v7603_v57 }
 0x36f   : > { %v2049_v5 = vadd.f32 %v2045_v0, %v7606_v63 }
 0x370   : > { %v2060_v6 = vsel %vm1933_vm0, %v2050_v4, -inf }
 0x371   : > { %2061 = vmax.xlane.f32.xlu1 %v2060_v6  ;;  %v2057_v7 = vsel %vm1933_vm0, %v2049_v5, -inf }
 0x372   : > { %2058 = vmax.xlane.f32.xlu0 %v2057_v7 }
 0x3fa   : > { %v2056_v8 = vpop.xlane.xlu1 %2055 }
 0x3fb   : > { %v2064_v9 = vsub.f32 %v2048_v54, %v2056_v8  ;;  %v2053_v10 = vpop.xlane.xlu0 %2052 }
 0x3fc   : > { %v2063_v11 = vsub.f32 %v2047_v56, %v2053_v10 }
 0x3fd   : > { %v2069_v12 = vmul.f32 1.442695, %v2064_v9 }
 0x3fe   : > { %v2067_v13 = vmul.f32 1.442695, %v2063_v11  ;;  %v2062_v14 = vpop.xlane.xlu1 %2061 }
 0x3ff   : > { %7011 = vpow2.f32 %v2069_v12  ;;  %v2066_v15 = vsub.f32 %v2050_v4, %v2062_v14  ;;  %v2059_v16 = vpop.xlane.xlu0 %2058 }
 0x400   : > { %7013 = vpow2.f32 %v2067_v13  ;;  %v2065_v17 = vsub.f32 %v2049_v5, %v2059_v16 }
 0x401   : > { %v2073_v19 = vmul.f32 1.442695, %v2066_v15 }
 0x402   : > { %v2071_v20 = vmul.f32 1.442695, %v2065_v17 }
 0x403   : > { %7015 = vpow2.f32 %v2073_v19 }
 0x404   : > { %7017 = vpow2.f32 %v2071_v20 }
 0x409   : > { %v7012_v21 = vpop.eup %7011 }
 0x40a   : > { %v7014_v22 = vpop.eup %7013  ;;  %v2078_v23 = vsel %vm1933_vm0, %v7012_v21, 0.0 }
 0x40b   : > { %2079 = vadd.xlane.f32.xlu1 %v2078_v23  ;;  %v2075_v24 = vsel %vm1933_vm0, %v7014_v22, 0.0 }
 0x40c   : > { %2076 = vadd.xlane.f32.xlu0 %v2075_v24 }
 0x40d   : > { %v7016_v25 = vpop.eup %7015 }
 0x40e   : > { %v7018_v26 = vpop.eup %7017  ;;  %v2084_v28 = vsel %vm1933_vm0, %v7016_v25, 0.0 }
 0x40f   : > { %2085 = vadd.xlane.f32.xlu1 %v2084_v28  ;;  %v2081_v30 = vsel %vm1933_vm0, %v7018_v26, 0.0 }
 0x410   : > { %2082 = vadd.xlane.f32.xlu0 %v2081_v30 }
 0x420   : > { %6789 = vrot.lane.b32.xlu1 %v7565_v29, %s8240_s16 }
 0x424   : > { %2194 = vrot.lane.b32.xlu1 %v7555_v18, %s8240_s16 }
 0x426   : > { %6784 = vrot.lane.b32.xlu0 %v7567_v31, %s8240_s16 }
 0x428   : > { %2196 = vrot.lane.b32.xlu1 %v7577_v32, %s8240_s16 }
 0x42a   : > { %2198 = vrot.lane.b32.xlu0 %v7579_v33, %s8240_s16 }
 0x42c   : > { %2200 = vrot.lane.b32.xlu1 %v7585_v34, %s8240_s16 }
 0x42e   : > { %6794 = vrot.lane.b32.xlu0 %v7567_v31, %s8242_s22 }
 0x430   : > { %6799 = vrot.lane.b32.xlu1 %v7565_v29, %s8242_s22 }
 0x432   : > { %2612 = vrot.lane.b32.xlu0 %v7555_v18, %s8242_s22 }
 0x434   : > { %2614 = vrot.lane.b32.xlu1 %v7577_v32, %s8242_s22 }
 0x436   : > { %2616 = vrot.lane.b32.xlu0 %v7579_v33, %s8242_s22 }
 0x438   : > { %2618 = vrot.lane.b32.xlu1 %v7585_v34, %s8242_s22 }
 0x498   : > { %v2080_v35 = vpop.xlane.xlu1 %2079 }
 0x499   : > { %7019 = vrcp.f32 %v2080_v35  ;;  %v2077_v36 = vpop.xlane.xlu0 %2076 }
 0x49a   : > { %7021 = vrcp.f32 %v2077_v36 }
 0x49c   : > { %v2086_v37 = vpop.xlane.xlu1 %2085 }
 0x49d   : > { %7023 = vrcp.f32 %v2086_v37  ;;  %v2083_v38 = vpop.xlane.xlu0 %2082 }
 0x49e   : > { %7025 = vrcp.f32 %v2083_v38 }
 0x4a0   : > { %v6790_v39 = vpop.permute.xlu1 %6789 }
 0x4a1   : > { %v6785_v40 = vpop.permute.xlu0 %6784  ;;  %v6792_v46 = vunpack.i.h.bf16 %v6790_v39  ;;  %v6791_v48 = vunpack.i.l.bf16 %v6790_v39 }
 0x4a2   : > { %v6787_v41 = vunpack.i.h.bf16 %v6785_v40  ;;  %v6786_v42 = vunpack.i.l.bf16 %v6785_v40 }
 0x4a3   : > { %v7020_v43 = vpop.eup %7019  ;;  %v6624_v59 = vpack.c.bf16 %v6792_v46, %v6791_v48 }
 0x4a4   : > { %v7022_v44 = vpop.eup %7021  ;;  %v6618_v50 = vpack.c.bf16 %v6787_v41, %v6786_v42  ;;  %v2195_v51 = vpop.permute.xlu1 %2194  ;;  %v2092_v55 = vmul.f32 %v7020_v43, %v7012_v21 }
 0x4a5   : > { %v2199_v53 = vpop.permute.xlu0 %2198  ;;  %v2091_v54 = vmul.f32 %v7022_v44, %v7014_v22 }
 0x4a6   : > { %6620 = vmatprep.subr.msk.bf16.mxu1 %vm7561_vm1, %v6618_v50 }
 0x4a7   : > { %v7024_v56 = vpop.eup %7023  ;;  %6293 = vmatprep.mubr.msk.f32.mxu1 %vm1933_vm0, %v2091_v54 }
 0x4a8   : > { %v7026_v58 = vpop.eup %7025  ;;  %v2197_v62 = vpop.permute.xlu1 %2196  ;;  %6294 = vmatmul.mubr.msk.f32.vlgmr.msra.gmra.mrb[8].mxu1 %vm1933_vm0, %v2092_v55  ;;  %v2094_v4 = vmul.f32 %v7024_v56, %v7016_v25 }
 0x4a9   : > { %6623 = vmatpush3.bf16.xpose.msk.msra.mxu1 %vm7561_vm1, %v6618_v50  ;;  %v6795_v0 = vpop.permute.xlu0 %6794  ;;  %v2093_v1 = vmul.f32 %v7026_v58, %v7018_v26 }
 0x4aa   : > { %6626 = vmatprep.subr.msk.bf16.mxu1 %vm7561_vm1, %v6624_v59  ;;  %v6797_v5 = vunpack.i.h.bf16 %v6795_v0  ;;  %v6796_v6 = vunpack.i.l.bf16 %v6795_v0 }
 0x4ab   : > { %6296 = vmatprep.mubr.msk.f32.mxu1 %vm1933_vm0, %v2093_v1 }
 0x4ac   : > { %v2201_v7 = vpop.permute.xlu1 %2200  ;;  %6297 = vmatmul.mubr.msk.f32.gmra.mrb[10].mxu1 %vm1933_vm0, %v2094_v4  ;;  %v6638_v8 = vpack.c.bf16 %v6797_v5, %v6796_v6 }
 0x4ad   : > { %6307 = vmatprep.mubr.msk.f32.mxu1 %vm1933_vm0, %v2195_v51  ;;  %v2613_v13 = vpop.permute.xlu0 %2612 }
 0x4b0   : > { %v6800_v9 = vpop.permute.xlu1 %6799 }
 0x4b1   : > { %6629 = vmatpush3.bf16.xpose.msk.msra.mxu1 %vm7561_vm1, %v6624_v59  ;;  %v6802_v10 = vunpack.i.h.bf16 %v6800_v9  ;;  %v6801_v11 = vunpack.i.l.bf16 %v6800_v9  ;;  %v2617_v15 = vpop.permute.xlu0 %2616 }
 0x4b2   : > { %6640 = vmatprep.subr.msk.bf16.mxu1 %vm7561_vm1, %v6638_v8 }
 0x4b3   : > { %v6644_v12 = vpack.c.bf16 %v6802_v10, %v6801_v11 }
 0x4b4   : > { %v2615_v14 = vpop.permute.xlu1 %2614 }
 0x4b8   : > { %6308 = vmatmul.mubr.msk.f32.vlgmr.msra.gmra.mrb[12].mxu1 %vm1933_vm0, %v2197_v62  ;;  %v2619_v16 = vpop.permute.xlu1 %2618 }
 0x4b9   : > { %6310 = vmatprep.mubr.msk.f32.mxu1 %vm1933_vm0, %v2199_v53  ;;  %6643 = vmatpush3.bf16.xpose.msk.msra.mxu1 %vm7561_vm1, %v6638_v8 }
 0x4ba   : > { %6646 = vmatprep.subr.msk.bf16.mxu1 %vm7561_vm1, %v6644_v12 }
 0x4bc   : > { %6311 = vmatmul.mubr.msk.f32.gmra.mrb[14].mxu1 %vm1933_vm0, %v2201_v7 }
 0x4bd   : > { %6351 = vmatprep.mubr.msk.f32.mxu1 %vm1933_vm0, %v2613_v13 }
 0x4c1   : > { %6649 = vmatpush3.bf16.xpose.msk.msra.mxu1 %vm7561_vm1, %v6644_v12 }
 0x4c8   : > { %6352 = vmatmul.mubr.msk.f32.vlgmr.msra.gmra.mrb[16].mxu1 %vm1933_vm0, %v2615_v14 }
 0x4c9   : > { %6354 = vmatprep.mubr.msk.f32.mxu1 %vm1933_vm0, %v2617_v15 }
 0x4cc   : > { %6355 = vmatmul.mubr.msk.f32.gmra.mrb[18].mxu1 %vm1933_vm0, %v2619_v16 }
 0x57b   : > { %v7669_v17 = vpop.f32.mrb[8].mxu1 }
 0x57c   : > { %v7671_v19 = vpop.f32.mrb[9].mxu1 }
 0x57d   : > { %v2192_v20 = vpack.c.bf16 %v7669_v17, %v7671_v19 }
 0x57f   : > { %v7675_v21 = vpop.f32.mrb[10].mxu1 }
 0x580   : > { %v7677_v22 = vpop.f32.mrb[11].mxu1 }
 0x581   : > { %v2193_v23 = vpack.c.bf16 %v7675_v21, %v7677_v22 }
 0x58b   : > { %v6309_v24 = vpop.f32.mrb[12].mxu1 }
 0x58c   : > { %v2312_v25 = vmul.f32 0.17677669, %v6309_v24  ;;  %v2292_v26 = vpop.f32.mrb[13].mxu1 }
 0x58d   : > { %v2311_v28 = vmul.f32 0.17677669, %v2292_v26 }
 0x58e   : > { %v2316_v30 = vadd.f32 %v2312_v25, %v7597_v49 }
 0x58f   : > { %v6312_v35 = vpop.f32.mrb[14].mxu1  ;;  %v2315_v36 = vadd.f32 %v2311_v28, %v7599_v52 }
 0x590   : > { %v2302_v37 = vpop.f32.mrb[15].mxu1  ;;  %v2322_v38 = vsel %vm1933_vm0, %v2316_v30, -inf  ;;  %v2314_v39 = vmul.f32 0.17677669, %v6312_v35 }
 0x591   : > { %v2313_v40 = vmul.f32 0.17677669, %v2302_v37  ;;  %2323 = vmax.xlane.f32.xlu1 %v2322_v38  ;;  %v2319_v41 = vsel %vm1933_vm0, %v2315_v36, -inf }
 0x592   : > { %2320 = vmax.xlane.f32.xlu0 %v2319_v41  ;;  %v2318_v44 = vadd.f32 %v2314_v39, %v7603_v57 }
 0x593   : > { %v2317_v42 = vadd.f32 %v2313_v40, %v7606_v63 }
 0x594   : > { %v2328_v46 = vsel %vm1933_vm0, %v2318_v44, -inf }
 0x595   : > { %v2325_v43 = vsel %vm1933_vm0, %v2317_v42, -inf }
 0x596   : > { %2326 = vmax.xlane.f32.xlu0 %v2325_v43 }
 0x59a   : > { %2329 = vmax.xlane.f32.xlu0 %v2328_v46 }
 0x59b   : > { %v6353_v48 = vpop.f32.mrb[16].mxu1 }
 0x59c   : > { %v2710_v50 = vpop.f32.mrb[17].mxu1 }
 0x59d   : > { %v2729_v16 = vmul.f32 0.17677669, %v2710_v50 }
 0x59f   : > { %v6356_v51 = vpop.f32.mrb[18].mxu1  ;;  %v7719_v25 = vadd.f32 %v2729_v16, %v7599_v52 }
 0x5a0   : > { %v2720_v53 = vpop.f32.mrb[19].mxu1 }
 0x5a1   : > { %v2731_v24 = vmul.f32 0.17677669, %v2720_v53 }
 0x61e   : > { %v2324_v54 = vpop.xlane.xlu1 %2323 }
 0x61f   : > { %v2332_v55 = vsub.f32 %v2316_v30, %v2324_v54  ;;  %v2321_v56 = vpop.xlane.xlu0 %2320 }
 0x620   : > { %v2331_v58 = vsub.f32 %v2315_v36, %v2321_v56 }
 0x621   : > { %v2337_v59 = vmul.f32 1.442695, %v2332_v55 }
 0x622   : > { %v2335_v62 = vmul.f32 1.442695, %v2331_v58 }
 0x623   : > { %7027 = vpow2.f32 %v2337_v59  ;;  %v2327_v0 = vpop.xlane.xlu0 %2326 }
 0x624   : > { %7029 = vpow2.f32 %v2335_v62  ;;  %v2333_v1 = vsub.f32 %v2317_v42, %v2327_v0 }
 0x626   : > { %v2339_v4 = vmul.f32 1.442695, %v2333_v1 }
 0x627   : > { %v2330_v5 = vpop.xlane.xlu0 %2329 }
 0x628   : > { %7031 = vpow2.f32 %v2339_v4  ;;  %v2334_v6 = vsub.f32 %v2318_v44, %v2330_v5 }
 0x62a   : > { %v2341_v7 = vmul.f32 1.442695, %v2334_v6 }
 0x62c   : > { %7033 = vpow2.f32 %v2341_v7 }
 0x62d   : > { %v7689_v8 = vpop.eup %7027 }
 0x62e   : > { %v7030_v9 = vpop.eup %7029  ;;  %v2346_v10 = vsel %vm1933_vm0, %v7689_v8, 0.0 }
 0x62f   : > { %2347 = vadd.xlane.f32.xlu1 %v2346_v10  ;;  %v2343_v11 = vsel %vm1933_vm0, %v7030_v9, 0.0 }
 0x630   : > { %2344 = vadd.xlane.f32.xlu0 %v2343_v11 }
 0x632   : > { %v7694_v12 = vpop.eup %7031 }
 0x633   : > { %v2349_v13 = vsel %vm1933_vm0, %v7694_v12, 0.0 }
 0x634   : > { %2350 = vadd.xlane.f32.xlu0 %v2349_v13 }
 0x636   : > { %v7698_v14 = vpop.eup %7033 }
 0x637   : > { %v2352_v15 = vsel %vm1933_vm0, %v7698_v14, 0.0 }
 0x638   : > { %2353 = vadd.xlane.f32.xlu1 %v2352_v15 }
 0x649   : > { %6809 = vrot.lane.b32.xlu1 %v7590_v45, %s8240_s16 }
 0x64a   : > { %6804 = vrot.lane.b32.xlu0 %v7592_v47, %s8240_s16  ;;  %s8300_s16 = sld [smem:[#allocation13_spill]] }
 0x64d   : > { %6814 = vrot.lane.b32.xlu1 %v7567_v31, %s8238_s23  ;;  %v2732_v31 = vmul.f32 0.17677669, %v6356_v51 }
 0x64e   : > { %2963 = vrot.lane.b32.xlu0 %v7555_v18, %s8238_s23  ;;  %v2737_v18 = vsel %vm1933_vm0, %v7719_v25, -inf }
 0x64f   : > { %v7729_v26 = vadd.f32 %v2732_v31, %v7603_v57 }
 0x651   : > { %6819 = vrot.lane.b32.xlu1 %v7565_v29, %s8238_s23  ;;  %v7724_v29 = vadd.f32 %v2731_v24, %v7606_v63 }
 0x652   : > { %2967 = vrot.lane.b32.xlu0 %v7579_v33, %s8238_s23  ;;  %v2730_v33 = vmul.f32 0.17677669, %v6353_v48 }
 0x654   : > { %v7734_v28 = vadd.f32 %v2730_v33, %v7597_v49 }
 0x655   : > { %2965 = vrot.lane.b32.xlu1 %v7577_v32, %s8238_s23  ;;  %v2743_v32 = vsel %vm1933_vm0, %v7724_v29, -inf }
 0x656   : > { %v2740_v30 = vsel %vm1933_vm0, %v7734_v28, -inf }
 0x659   : > { %2969 = vrot.lane.b32.xlu1 %v7585_v34, %s8238_s23  ;;  %v2746_v34 = vsel %vm1933_vm0, %v7729_v26, -inf }
 0x671   : > { %2738 = vmax.xlane.f32.xlu0 %v2737_v18 }
 0x675   : > { %2744 = vmax.xlane.f32.xlu0 %v2743_v32 }
 0x679   : > { %2747 = vmax.xlane.f32.xlu0 %v2746_v34 }
 0x67d   : > { %2741 = vmax.xlane.f32.xlu1 %v2740_v30 }
 0x6bc   : > { %v2348_v36 = vpop.xlane.xlu1 %2347 }
 0x6bd   : > { %v2345_v35 = vpop.xlane.xlu0 %2344 }
 0x6be   : > { %7035 = vrcp.f32 %v2345_v35 }
 0x6bf   : > { %7037 = vrcp.f32 %v2348_v36 }
 0x6c1   : > { %v2351_v37 = vpop.xlane.xlu0 %2350 }
 0x6c2   : > { %7039 = vrcp.f32 %v2351_v37 }
 0x6c5   : > { %v2354_v38 = vpop.xlane.xlu1 %2353  ;;  %v6805_v39 = vpop.permute.xlu0 %6804 }
 0x6c6   : > { %v6807_v40 = vunpack.i.h.bf16 %v6805_v39  ;;  %v6806_v41 = vunpack.i.l.bf16 %v6805_v39  ;;  %7041 = vrcp.f32 %v2354_v38  ;;  %v6867_v39 = vld [vmem:[%s7282_s19 + $0x10] sm:$0xff]  }
 0x6c8   : > { %v7036_v42 = vpop.eup %7035  ;;  %v6630_v43 = vpack.c.bf16 %v6807_v40, %v6806_v41  ;;  %v6868_v40 = vld [vmem:[%s7282_s19 + $0x18] sm:$0xff]   ;;  %v6869_v41 = vld [vmem:[%s7282_s19] sm:$0xff]  }
 0x6c9   : > { %v6810_v44 = vpop.permute.xlu1 %6809  ;;  %v2964_v46 = vpop.permute.xlu0 %2963  ;;  %v2359_v48 = vmul.f32 %v7036_v42, %v7030_v9 }
 0x6ca   : > { %v6812_v50 = vunpack.i.h.bf16 %v6810_v44  ;;  %v6811_v51 = vunpack.i.l.bf16 %v6810_v44  ;;  %6631 = vmatprep.subr.bf16.mxu0 %v6630_v43  ;;  %6387 = vmatprep.mubr.msk.f32.mxu1 %vm1933_vm0, %v2964_v46  ;;  %v7038_v54 = vpop.eup %7037 }
 0x6cb   : > { %6633 = vmatpush3.bf16.msra.mxu0 %v6630_v43  ;;  %6321 = vmatprep.mubr.msk.f32.mxu0 %vm1933_vm0, %v2359_v48  ;;  %v2360_v62 = vmul.f32 %v7038_v54, %v7689_v8 }
 0x6cc   : > { %v6634_v53 = vpack.c.bf16 %v6812_v50, %v6811_v51  ;;  %v7040_v56 = vpop.eup %7039 }
 0x6cd   : > { %v6815_v55 = vpop.permute.xlu1 %6814  ;;  %v2361_v5 = vmul.f32 %v7040_v56, %v7694_v12  ;;  %v2968_v11 = vpop.permute.xlu0 %2967  ;;  %v6870_v56 = vld [vmem:[%s7282_s19 + $0x8] sm:$0xff]  }
 0x6ce   : > { %v6817_v58 = vunpack.i.h.bf16 %v6815_v55  ;;  %v6816_v59 = vunpack.i.l.bf16 %v6815_v55  ;;  %6635 = vmatprep.subr.bf16.mxu0 %v6634_v53 }
 0x6cf   : > { %6637 = vmatpush3.bf16.msra.mxu0 %v6634_v53 }
 0x6d0   : > { %v6658_v0 = vpack.c.bf16 %v6817_v58, %v6816_v59  ;;  %v7042_v1 = vpop.eup %7041  ;;  %6327 = vmatprep.subr.bf16.mxu0 %v6867_v39 }
 0x6d1   : > { %v6820_v4 = vpop.permute.xlu1 %6819  ;;  %v2362_v8 = vmul.f32 %v7042_v1, %v7698_v14 }
 0x6d2   : > { %v6822_v6 = vunpack.i.h.bf16 %v6820_v4  ;;  %v6821_v7 = vunpack.i.l.bf16 %v6820_v4  ;;  %6322 = vmatmul.mubr.msk.f32.vlgmr.msra.gmra.mrb[8].mxu0 %vm1933_vm0, %v2360_v62  ;;  %6660 = vmatprep.subr.msk.bf16.mxu1 %vm7561_vm1, %v6658_v0 }
 0x6d3   : > { %6324 = vmatprep.mubr.msk.f32.mxu0 %vm1933_vm0, %v2361_v5  ;;  %6663 = vmatpush3.bf16.xpose.msk.msra.mxu1 %vm7561_vm1, %v6658_v0 }
 0x6d4   : > { %v6664_v9 = vpack.c.bf16 %v6822_v6, %v6821_v7  ;;  %6328 = vmatpush3.bf16.msra.mxu0 %v6867_v39 }
 0x6d5   : > { %v2966_v10 = vpop.permute.xlu1 %2965  ;;  %6329 = vmatprep.subr.bf16.mxu0 %v6868_v40 }
 0x6d6   : > { %6325 = vmatmul.mubr.msk.f32.gmra.mrb[10].mxu0 %vm1933_vm0, %v2362_v8  ;;  %6666 = vmatprep.subr.msk.bf16.mxu1 %vm7561_vm1, %v6664_v9 }
 0x6d8   : > { %6330 = vmatpush3.bf16.msra.mxu0 %v6868_v40 }
 0x6d9   : > { %v2970_v12 = vpop.permute.xlu1 %2969  ;;  %6335 = vmatprep.subr.bf16.mxu0 %v6869_v41 }
 0x6db   : > { %6669 = vmatpush3.bf16.xpose.msk.msra.mxu1 %vm7561_vm1, %v6664_v9 }
 0x6e2   : > { %6388 = vmatmul.mubr.msk.f32.vlgmr.msra.gmra.mrb[20].mxu1 %vm1933_vm0, %v2966_v10 }
 0x6e3   : > { %6390 = vmatprep.mubr.msk.f32.mxu1 %vm1933_vm0, %v2968_v11 }
 0x6e6   : > { %6391 = vmatmul.mubr.msk.f32.gmra.mrb[22].mxu1 %vm1933_vm0, %v2970_v12 }
 0x6fe   : > { %v2739_v13 = vpop.xlane.xlu0 %2738 }
 0x6ff   : > { %v2749_v14 = vsub.f32 %v7719_v25, %v2739_v13 }
 0x701   : > { %v2753_v15 = vmul.f32 1.442695, %v2749_v14 }
 0x702   : > { %v2745_v16 = vpop.xlane.xlu0 %2744 }
 0x703   : > { %7043 = vpow2.f32 %v2753_v15  ;;  %v2751_v24 = vsub.f32 %v7724_v29, %v2745_v16 }
 0x705   : > { %v2757_v31 = vmul.f32 1.442695, %v2751_v24 }
 0x706   : > { %v2748_v27 = vpop.xlane.xlu0 %2747 }
 0x707   : > { %7045 = vpow2.f32 %v2757_v31  ;;  %v2752_v18 = vsub.f32 %v7729_v26, %v2748_v27 }
 0x709   : > { %v2759_v30 = vmul.f32 1.442695, %v2752_v18 }
 0x70a   : > { %v2742_v33 = vpop.xlane.xlu1 %2741 }
 0x70b   : > { %v2750_v32 = vsub.f32 %v7734_v28, %v2742_v33 }
 0x70d   : > { %v7044_v34 = vpop.eup %7043  ;;  %v2755_v35 = vmul.f32 1.442695, %v2750_v32  ;;  %v6872_v32 = vld [vmem:[%s7282_s19 + $0x28] sm:$0xff]  }
 0x70e   : > { %v2761_v36 = vsel %vm1933_vm0, %v7044_v34, 0.0 }
 0x70f   : > { %7047 = vpow2.f32 %v2755_v35  ;;  %2762 = vadd.xlane.f32.xlu0 %v2761_v36 }
 0x710   : > { %7049 = vpow2.f32 %v2759_v30 }
 0x711   : > { %v7762_v25 = vpop.eup %7045 }
 0x712   : > { %v2767_v29 = vsel %vm1933_vm0, %v7762_v25, 0.0 }
 0x713   : > { %2768 = vadd.xlane.f32.xlu0 %v2767_v29 }
 0x719   : > { %v7766_v26 = vpop.eup %7047 }
 0x71a   : > { %v2764_v28 = vsel %vm1933_vm0, %v7766_v26, 0.0  ;;  %v7770_v37 = vpop.eup %7049 }
 0x71b   : > { %2765 = vadd.xlane.f32.xlu1 %v2764_v28  ;;  %v2770_v38 = vsel %vm1933_vm0, %v7770_v37, 0.0 }
 0x71f   : > { %2771 = vadd.xlane.f32.xlu1 %v2770_v38 }
 0x729   : > { %6824 = vrot.lane.b32.xlu0 %v7592_v47, %s8242_s22 }
 0x730   : > { %6829 = vrot.lane.b32.xlu1 %v7590_v45, %s8242_s22  ;;  %s8305_s22 = sld [smem:[#allocation18_spill]] }
 0x79c   : > { %v2763_v42 = vpop.xlane.xlu0 %2762 }
 0x79d   : > { %7051 = vrcp.f32 %v2763_v42 }
 0x7a0   : > { %v2769_v43 = vpop.xlane.xlu0 %2768 }
 0x7a4   : > { %v6825_v53 = vpop.permute.xlu0 %6824 }
 0x7a5   : > { %v6323_v44 = vpop.f32.mrb[8].mxu0  ;;  %v6827_v59 = vunpack.i.h.bf16 %v6825_v53  ;;  %v6826_v62 = vunpack.i.l.bf16 %v6825_v53 }
 0x7a6   : > { %v2457_v46 = vpop.f32.mrb[9].mxu0 }
 0x7a7   : > { %v2476_v48 = vpack.c.bf16 %v6323_v44, %v2457_v46  ;;  %v6650_v0 = vpack.c.bf16 %v6827_v59, %v6826_v62  ;;  %v7052_v4 = vpop.eup %7051 }
 0x7a8   : > { %v2766_v50 = vpop.xlane.xlu1 %2765  ;;  %v2777_v11 = vmul.f32 %v7052_v4, %v7044_v34 }
 0x7a9   : > { %v6326_v51 = vpop.f32.mrb[10].mxu0  ;;  %6331 = vmatprep.mubr.msk.bf16.mxu0 %vm1933_vm0, %v2476_v48  ;;  %7053 = vrcp.f32 %v2766_v50 }
 0x7aa   : > { %v2467_v54 = vpop.f32.mrb[11].mxu0  ;;  %7055 = vrcp.f32 %v2769_v43 }
 0x7ab   : > { %v2477_v55 = vpack.c.bf16 %v6326_v51, %v2467_v54 }
 0x7ac   : > { %v2772_v58 = vpop.xlane.xlu1 %2771 }
 0x7ad   : > { %6332 = vmatmul.mubr.msk.bf16.vlgmr.msra.gmra.mrb[12].mxu0 %vm1933_vm0, %v2477_v55  ;;  %7057 = vrcp.f32 %v2772_v58 }
 0x7ae   : > { %6336 = vmatpush3.bf16.msra.mxu0 %v6869_v41  ;;  %6339 = vmatprep.mubr.msk.bf16.mxu0 %vm1933_vm0, %v2192_v20 }
 0x7af   : > { %6337 = vmatprep.subr.bf16.mxu0 %v6870_v56 }
 0x7b0   : > { %v6830_v1 = vpop.permute.xlu1 %6829 }
 0x7b1   : > { %v6832_v5 = vunpack.i.h.bf16 %v6830_v1  ;;  %v6831_v6 = vunpack.i.l.bf16 %v6830_v1 }
 0x7b2   : > { %6338 = vmatpush3.bf16.msra.mxu0 %v6870_v56 }
 0x7b3   : > { %6651 = vmatprep.subr.bf16.mxu0 %v6650_v0  ;;  %v6654_v19 = vpack.c.bf16 %v6832_v5, %v6831_v6  ;;  %v7054_v24 = vpop.eup %7053 }
 0x7b4   : > { %v7056_v22 = vpop.eup %7055  ;;  %v2778_v31 = vmul.f32 %v7054_v24, %v7766_v26 }
 0x7b5   : > { %v6389_v7 = vpop.f32.mrb[20].mxu1  ;;  %v2779_v33 = vmul.f32 %v7056_v22, %v7762_v25 }
 0x7b6   : > { %v3081_v9 = vmul.f32 0.17677669, %v6389_v7  ;;  %v3061_v8 = vpop.f32.mrb[21].mxu1 }
 0x7b7   : > { %v3080_v10 = vmul.f32 0.17677669, %v3061_v8  ;;  %v7058_v18 = vpop.eup %7057 }
 0x7b8   : > { %v3085_v17 = vadd.f32 %v3081_v9, %v7597_v49 }
 0x7b9   : > { %6340 = vmatmul.mubr.msk.bf16.vlgmr.msra.gmra.mrb[12].mxu0 %vm1933_vm0, %v2193_v23  ;;  %v6392_v20 = vpop.f32.mrb[22].mxu1  ;;  %v3084_v12 = vadd.f32 %v3080_v10, %v7599_v52 }
 0x7ba   : > { %6653 = vmatpush3.bf16.msra.mxu0 %v6650_v0  ;;  %v3083_v13 = vmul.f32 0.17677669, %v6392_v20  ;;  %6365 = vmatprep.mubr.msk.f32.mxu0 %vm1933_vm0, %v2777_v11  ;;  %v3071_v14 = vpop.f32.mrb[23].mxu1  ;;  %v3091_v15 = vsel %vm1933_vm0, %v3085_v17, -inf }
 0x7bb   : > { %6655 = vmatprep.subr.bf16.mxu0 %v6654_v19  ;;  %v3082_v16 = vmul.f32 0.17677669, %v3071_v14  ;;  %3092 = vmax.xlane.f32.xlu0 %v3091_v15  ;;  %v3088_v49 = vsel %vm1933_vm0, %v3084_v12, -inf }
 0x7bc   : > { %3089 = vmax.xlane.f32.xlu1 %v3088_v49  ;;  %v3087_v21 = vadd.f32 %v3083_v13, %v7603_v57  ;;  %v2780_v57 = vmul.f32 %v7058_v18, %v7770_v37  ;;  %v6874_v49 = vld [vmem:[%s7282_s19 + $0x38] sm:$0xff]  }
 0x7bd   : > { %v3086_v52 = vadd.f32 %v3082_v16, %v7606_v63  ;;  %v6871_v63 = vld [vmem:[%s7282_s19 + $0x20] sm:$0xff]   ;;  %v6873_v16 = vld [vmem:[%s7282_s19 + $0x30] sm:$0xff]  }
 0x7be   : > { %6657 = vmatpush3.bf16.msra.mxu0 %v6654_v19  ;;  %v3097_v23 = vsel %vm1933_vm0, %v3087_v21, -inf }
 0x7bf   : > { %v3094_v27 = vsel %vm1933_vm0, %v3086_v52, -inf  ;;  %6371 = vmatprep.subr.bf16.mxu0 %v6871_v63 }
 0x7c0   : > { %3095 = vmax.xlane.f32.xlu0 %v3094_v27  ;;  %3098 = vmax.xlane.f32.xlu1 %v3097_v23  ;;  %v5817_v27 = vld [vmem:[%s7287_s24] ss:$0 sm:$0xff] }
 0x7c1   : > { %6366 = vmatmul.mubr.msk.f32.vlgmr.msra.gmra.mrb[16].mxu0 %vm1933_vm0, %v2778_v31 }
 0x7c2   : > { %6368 = vmatprep.mubr.msk.f32.mxu0 %vm1933_vm0, %v2779_v33  ;;  %6372 = vmatpush3.bf16.msra.mxu0 %v6871_v63 }
 0x7c3   : > { %6373 = vmatprep.subr.bf16.mxu0 %v6872_v32 }
 0x7c5   : > { %6369 = vmatmul.mubr.msk.f32.gmra.mrb[18].mxu0 %vm1933_vm0, %v2780_v57 }
 0x7c6   : > { %6374 = vmatpush3.bf16.msra.mxu0 %v6872_v32 }
 0x848   : > { %v3093_v34 = vpop.xlane.xlu0 %3092 }
 0x849   : > { %v3101_v30 = vsub.f32 %v3085_v17, %v3093_v34  ;;  %v3090_v35 = vpop.xlane.xlu1 %3089 }
 0x84a   : > { %v3100_v36 = vsub.f32 %v3084_v12, %v3090_v35 }
 0x84b   : > { %v3106_v29 = vmul.f32 1.442695, %v3101_v30 }
 0x84c   : > { %v3104_v25 = vmul.f32 1.442695, %v3100_v36 }
 0x84d   : > { %7059 = vpow2.f32 %v3106_v29  ;;  %v3099_v26 = vpop.xlane.xlu1 %3098  ;;  %v3096_v28 = vpop.xlane.xlu0 %3095 }
 0x84e   : > { %7061 = vpow2.f32 %v3104_v25  ;;  %v3103_v38 = vsub.f32 %v3087_v21, %v3099_v26  ;;  %v3102_v37 = vsub.f32 %v3086_v52, %v3096_v28  ;;  %v6875_v28 = vld [vmem:[%s8286_s12] ss:$8 sps:$4 sm:$0xff]  }
 0x850   : > { %v3110_v39 = vmul.f32 1.442695, %v3103_v38  ;;  %v3108_v40 = vmul.f32 1.442695, %v3102_v37  ;;  %v6877_v38 = vld [vmem:[%s8286_s12 + $0x4] ss:$8 sps:$4 sm:$0xff]  }
 0x851   : > { %v6880_v37 = vld [vmem:[%s8286_s12 + $0x14] ss:$8 sps:$4 sm:$0xff]   ;;  %3485 = vmatprep.subr.bf16.mxu1 %v6877_v38 }
 0x852   : > { %7063 = vpow2.f32 %v3110_v39  ;;  %3486 = vmatpush1.bf16.msra.mxu1 %v6875_v28  ;;  %v6878_v39 = vld [vmem:[%s8286_s12 + $0x10] ss:$8 sps:$4 sm:$0xff]  }
 0x853   : > { %7065 = vpow2.f32 %v3108_v40  ;;  %3487 = vmatprep.subr.bf16.mxu1 %v6880_v37 }
 0x856   : > { %3488 = vmatpush1.bf16.msra.mxu1 %v6878_v39 }
 0x857   : > { %v7060_v41 = vpop.eup %7059 }
 0x858   : > { %v7062_v42 = vpop.eup %7061  ;;  %v3115_v43 = vsel %vm1933_vm0, %v7060_v41, 0.0 }
 0x859   : > { %3116 = vadd.xlane.f32.xlu1 %v3115_v43  ;;  %v3112_v44 = vsel %vm1933_vm0, %v7062_v42, 0.0 }
 0x85a   : > { %3113 = vadd.xlane.f32.xlu0 %v3112_v44 }
 0x85c   : > { %v7064_v46 = vpop.eup %7063 }
 0x85d   : > { %v7066_v48 = vpop.eup %7065  ;;  %v3121_v50 = vsel %vm1933_vm0, %v7064_v46, 0.0 }
 0x85e   : > { %3122 = vadd.xlane.f32.xlu1 %v3121_v50  ;;  %v3118_v51 = vsel %vm1933_vm0, %v7066_v48, 0.0 }
 0x85f   : > { %3119 = vadd.xlane.f32.xlu0 %v3118_v51 }
 0x86f   : > { %6839 = vrot.lane.b32.xlu1 %v7590_v45, %s8238_s23 }
 0x875   : > { %6834 = vrot.lane.b32.xlu0 %v7592_v47, %s8238_s23  ;;  %s8299_s23 = sld [smem:[#allocation12_spill]] }
 0x894   : > { %v6367_v53 = vpop.f32.mrb[16].mxu0 }
 0x895   : > { %v2871_v54 = vpop.f32.mrb[17].mxu0 }
 0x896   : > { %v2890_v55 = vpack.c.bf16 %v6367_v53, %v2871_v54 }
 0x898   : > { %v6370_v56 = vpop.f32.mrb[18].mxu0  ;;  %6375 = vmatprep.mubr.msk.bf16.mxu0 %vm1933_vm0, %v2890_v55 }
 0x899   : > { %v2881_v58 = vpop.f32.mrb[19].mxu0 }
 0x89a   : > { %v2891_v59 = vpack.c.bf16 %v6370_v56, %v2881_v58  ;;  %v6883_v56 = vld [vmem:[%s8286_s12 + $0x24] ss:$8 sps:$4 sm:$0xff]   ;;  %v6881_v58 = vld [vmem:[%s8286_s12 + $0x20] ss:$8 sps:$4 sm:$0xff]  }
 0x89b   : > { %3489 = vmatprep.subr.bf16.mxu1 %v6883_v56 }
 0x89c   : > { %6376 = vmatmul.mubr.msk.bf16.vlgmr.msra.gmra.mrb[12].mxu0 %vm1933_vm0, %v2891_v59  ;;  %3490 = vmatpush1.bf16.msra.mxu1 %v6881_v58  ;;  %v6886_v59 = vld [vmem:[%s8286_s12 + $0x34] ss:$8 sps:$4 sm:$0xff]  }
 0x89d   : > { %3491 = vmatprep.subr.bf16.mxu1 %v6886_v59 }
 0x8e6   : > { %v3117_v62 = vpop.xlane.xlu1 %3116 }
 0x8e7   : > { %v3114_v0 = vpop.xlane.xlu0 %3113 }
 0x8e8   : > { %7067 = vrcp.f32 %v3114_v0  ;;  %v6889_v0 = vld [vmem:[%s8286_s12 + $0x44] ss:$8 sps:$4 sm:$0xff]  }
 0x8e9   : > { %7069 = vrcp.f32 %v3117_v62  ;;  %v6884_v62 = vld [vmem:[%s8286_s12 + $0x30] ss:$8 sps:$4 sm:$0xff]  }
 0x8ea   : > { %3492 = vmatpush1.bf16.msra.mxu1 %v6884_v62 }
 0x8eb   : > { %v3123_v1 = vpop.xlane.xlu1 %3122  ;;  %3493 = vmatprep.subr.bf16.mxu1 %v6889_v0 }
 0x8ec   : > { %v3120_v4 = vpop.xlane.xlu0 %3119 }
 0x8ed   : > { %7071 = vrcp.f32 %v3120_v4  ;;  %v6892_v4 = vld [vmem:[%s8286_s12 + $0x54] ss:$8 sps:$4 sm:$0xff]  }
 0x8ee   : > { %7073 = vrcp.f32 %v3123_v1  ;;  %v6887_v1 = vld [vmem:[%s8286_s12 + $0x40] ss:$8 sps:$4 sm:$0xff]  }
 0x8ef   : > { %v6840_v45 = vpop.permute.xlu1 %6839  ;;  %3494 = vmatpush1.bf16.msra.mxu1 %v6887_v1 }
 0x8f0   : > { %v6835_v5 = vpop.permute.xlu0 %6834  ;;  %v6842_v47 = vunpack.i.h.bf16 %v6840_v45  ;;  %v6841_v6 = vunpack.i.l.bf16 %v6840_v45  ;;  %v6890_v45 = vld [vmem:[%s8286_s12 + $0x50] ss:$8 sps:$4 sm:$0xff]   ;;  %3495 = vmatprep.subr.bf16.mxu1 %v6892_v4 }
 0x8f1   : > { %v6837_v7 = vunpack.i.h.bf16 %v6835_v5  ;;  %v6836_v9 = vunpack.i.l.bf16 %v6835_v5  ;;  %v6895_v5 = vld [vmem:[%s8286_s12 + $0x64] ss:$8 sps:$4 sm:$0xff]  }
 0x8f2   : > { %v7068_v8 = vpop.eup %7067  ;;  %v6674_v17 = vpack.c.bf16 %v6842_v47, %v6841_v6  ;;  %v6893_v47 = vld [vmem:[%s8286_s12 + $0x60] ss:$8 sps:$4 sm:$0xff]   ;;  %v6896_v6 = vld [vmem:[%s8286_s12 + $0x70] ss:$8 sps:$4 sm:$0xff]  }
 0x8f3   : > { %v6670_v10 = vpack.c.bf16 %v6837_v7, %v6836_v9  ;;  %v3128_v11 = vmul.f32 %v7068_v8, %v7062_v42  ;;  %v7070_v19 = vpop.eup %7069  ;;  %3496 = vmatpush1.bf16.msra.mxu1 %v6890_v45  ;;  %v6898_v7 = vld [vmem:[%s8286_s12 + $0x74] ss:$8 sps:$4 sm:$0xff]   ;;  %v7219_v9 = vmov 0   ;;  %v6899_v8 = vld [vmem:[%s7312_s27 + $0x40] sm:$0xff]  }
 0x8f4   : > { %v3129_v12 = vmul.f32 %v7070_v19, %v7060_v41  ;;  %3497 = vmatprep.subr.bf16.mxu1 %v6895_v5  ;;  %3517 = vmatprep.mubr.bf16.mxu1 %v7219_v9  ;;  %v6903_v19 = vld [vmem:[%s7312_s27 + $0x50] sm:$0xff]  }
 0x8f5   : > { %6671 = vmatprep.subr.bf16.mxu0 %v6670_v10  ;;  %6401 = vmatprep.mubr.msk.f32.mxu0 %vm1933_vm0, %v3128_v11  ;;  %v6901_v11 = vld [vmem:[%s7312_s27 + $0x48] sm:$0xff]  }
 0x8f6   : > { %6673 = vmatpush3.bf16.msra.mxu0 %v6670_v10  ;;  %v6900_v10 = vld [vmem:[%s7312_s27] sm:$0xff]  }
 0x8f7   : > { %6675 = vmatprep.subr.bf16.mxu0 %v6674_v17  ;;  %v7072_v20 = vpop.eup %7071  ;;  %3498 = vmatpush1.bf16.msra.mxu1 %v6893_v47 }
 0x8f8   : > { %v7074_v13 = vpop.eup %7073  ;;  %v3130_v14 = vmul.f32 %v7072_v20, %v7066_v48  ;;  %3499 = vmatprep.subr.bf16.mxu1 %v6898_v7  ;;  %v6904_v20 = vld [vmem:[%s7312_s27 + $0x10] sm:$0xff]  }
 0x8f9   : > { %v3131_v15 = vmul.f32 %v7074_v13, %v7064_v46  ;;  %v6906_v13 = vld [vmem:[%s7312_s27 + $0x18] sm:$0xff]  }
 0x8fa   : > { %6677 = vmatpush3.bf16.msra.mxu0 %v6674_v17  ;;  %v6902_v17 = vld [vmem:[%s7312_s27 + $0x8] sm:$0xff]  }
 0x8fb   : > { %6407 = vmatprep.subr.bf16.mxu0 %v6873_v16  ;;  %3500 = vmatpush1.bf16.msra.mxu1 %v6896_v6 }
 0x8fd   : > { %6402 = vmatmul.mubr.msk.f32.vlgmr.msra.gmra.mrb[20].mxu0 %vm1933_vm0, %v3129_v12  ;;  %v6905_v12 = vld [vmem:[%s7312_s27 + $0x58] sm:$0xff]  }
 0x8fe   : > { %6404 = vmatprep.mubr.msk.f32.mxu0 %vm1933_vm0, %v3130_v14  ;;  %6408 = vmatpush3.bf16.msra.mxu0 %v6873_v16  ;;  %v6907_v14 = vld [vmem:[%s7312_s27 + $0x60] sm:$0xff]   ;;  %v6909_v16 = vld [vmem:[%s7312_s27 + $0x68] sm:$0xff]  }
 0x8ff   : > { %6409 = vmatprep.subr.bf16.mxu0 %v6874_v49 }
 0x901   : > { %6405 = vmatmul.mubr.msk.f32.gmra.mrb[22].mxu0 %vm1933_vm0, %v3131_v15  ;;  %v6908_v15 = vld [vmem:[%s7312_s27 + $0x20] sm:$0xff]  }
 0x902   : > { %6410 = vmatpush3.bf16.msra.mxu0 %v6874_v49 }
 0x903   : > { %6083 = vmatprep.subr.bf16.mxu0 %v6899_v8 }
 0x9d0   : > { %v6403_v24 = vpop.f32.mrb[20].mxu0 }
 0x9d1   : > { %v3222_v21 = vpop.f32.mrb[21].mxu0 }
 0x9d2   : > { %v3241_v22 = vpack.c.bf16 %v6403_v24, %v3222_v21 }
 0x9d4   : > { %v6406_v52 = vpop.f32.mrb[22].mxu0  ;;  %6411 = vmatprep.mubr.msk.bf16.mxu0 %vm1933_vm0, %v3241_v22 }
 0x9d5   : > { %v3232_v23 = vpop.f32.mrb[23].mxu0 }
 0x9d6   : > { %v3242_v31 = vpack.c.bf16 %v6406_v52, %v3232_v23 }
 0x9d8   : > { %6412 = vmatmul.mubr.msk.bf16.vlgmr.msra.gmra.mrb[12].mxu0 %vm1933_vm0, %v3242_v31 }
 0x9d9   : > { %6084 = vmatpush3.bf16.msra.mxu0 %v6900_v10 }
 0x9da   : > { %6085 = vmatprep.subr.bf16.mxu0 %v6901_v11 }
 0x9dd   : > { %6086 = vmatpush3.bf16.msra.mxu0 %v6902_v17 }
 0x9de   : > { %6087 = vmatprep.subr.bf16.mxu0 %v6903_v19 }
 0x9e1   : > { %6088 = vmatpush3.bf16.msra.mxu0 %v6904_v20 }
 0x9e2   : > { %6089 = vmatprep.subr.bf16.mxu0 %v6905_v12 }
 0x9e5   : > { %6090 = vmatpush3.bf16.msra.mxu0 %v6906_v13 }
 0x9e6   : > { %6091 = vmatprep.subr.bf16.mxu0 %v6907_v14 }
 0x9e9   : > { %6092 = vmatpush3.bf16.msra.mxu0 %v6908_v15 }
 0x9ea   : > { %6093 = vmatprep.subr.bf16.mxu0 %v6909_v16 }
 0xaab   : > { %v6413_v18 = vpop.f32.mrb[12].mxu0 }
 0xaac   : > { %v3295_v33 = vpop.f32.mrb[13].mxu0  ;;  %v3322_v36 = vadd.f32 %v6413_v18, %v5817_v27 }
 0xaad   : > { %v3320_v57 = vadd.f32 %v5817_v27, %v3295_v33  ;;  %v6414_v63 = vpop.f32.mrb[14].mxu0 }
 0xaae   : > { %v3298_v32 = vpop.f32.mrb[15].mxu0  ;;  %v3323_v34 = vadd.f32 %v6414_v63, %v5817_v27  ;;  %v3326_v26 = vadd.f32 %v3322_v36, %v7540_v2 }
 0xaaf   : > { %v3321_v30 = vadd.f32 %v5817_v27, %v3298_v32  ;;  %v3324_v35 = vadd.f32 %v3320_v57, %v7533_v60 }
 0xab0   : > { %v3327_v25 = vadd.f32 %v3323_v34, %v7542_v3  ;;  %v5818_v34 = vld [vmem:[%s8299_s23] ss:$0 sm:$0xff]  ;;  %s8302_s23 = sld [smem:[#allocation16_spill]] }
 0xab1   : > { %3328 = vadd.xlane.f32.xlu1 %v3324_v35  ;;  %v3325_v29 = vadd.f32 %v3321_v30, %v7535_v61 }
 0xab3   : > { %3330 = vadd.xlane.f32.xlu0 %v3325_v29 }
 0xab5   : > { %3334 = vadd.xlane.f32.xlu1 %v3327_v25 }
 0xab7   : > { %3332 = vadd.xlane.f32.xlu0 %v3326_v26 }
 0xb3e   : > { %v3329_v60 = vpop.xlane.xlu1 %3328 }
 0xb3f   : > { %v3336_v40 = vmul.f32 0.0078125, %v3329_v60 }
 0xb40   : > { %v3331_v41 = vpop.xlane.xlu0 %3330 }
 0xb41   : > { %v7836_v42 = vsub.f32 %v3324_v35, %v3336_v40  ;;  %v3337_v61 = vmul.f32 0.0078125, %v3331_v41 }
 0xb42   : > { %v3335_v3 = vpop.xlane.xlu1 %3334 }
 0xb43   : > { %v7838_v43 = vsub.f32 %v3325_v29, %v3337_v61  ;;  %v3339_v2 = vmul.f32 0.0078125, %v3335_v3  ;;  %v3344_v44 = vmul.f32 %v7836_v42, %v7836_v42 }
 0xb44   : > { %v3333_v46 = vpop.xlane.xlu0 %3332 }
 0xb45   : > { %v7842_v48 = vsub.f32 %v3327_v25, %v3339_v2  ;;  %v3338_v50 = vmul.f32 0.0078125, %v3333_v46  ;;  %3348 = vadd.xlane.f32.xlu0 %v3344_v44  ;;  %v3345_v51 = vmul.f32 %v7838_v43, %v7838_v43  ;;  %v5819_v25 = vld [vmem:[%s8300_s16] ss:$0 sm:$0xff]  ;;  %s8301_s16 = sld [smem:[#allocation15_spill]]  ;;  %v6910_v44 = vld [vmem:[%s7312_s27 + $0x28] sm:$0xff]   ;;  %v6911_v46 = vld [vmem:[%s7312_s27 + $0x70] sm:$0xff]  }
 0xb46   : > { %6094 = vmatpush3.bf16.msra.mxu0 %v6910_v44 }
 0xb47   : > { %v7846_v53 = vsub.f32 %v3326_v26, %v3338_v50  ;;  %3350 = vadd.xlane.f32.xlu1 %v3345_v51  ;;  %v3347_v54 = vmul.f32 %v7842_v48, %v7842_v48  ;;  %6095 = vmatprep.subr.bf16.mxu0 %v6911_v46  ;;  %v6913_v50 = vld [vmem:[%s7312_s27 + $0x78] sm:$0xff]  }
 0xb48   : > { %v6914_v51 = vld [vmem:[%s7312_s27 + $0x38] sm:$0xff]  }
 0xb49   : > { %v3346_v55 = vmul.f32 %v7846_v53, %v7846_v53 }
 0xb4b   : > { %3354 = vadd.xlane.f32.xlu1 %v3347_v54  ;;  %3352 = vadd.xlane.f32.xlu0 %v3346_v55  ;;  %v1357_v56 = vld [vmem:[%s8301_s16] sm:$0x3]  ;;  %s8303_s16 = sld [smem:[#allocation19_spill]] }
 0xbd2   : > { %v3349_v49 = vpop.xlane.xlu0 %3348 }
 0xbd3   : > { %v3356_v24 = vmul.f32 0.0078125, %v3349_v49 }
 0xbd4   : > { %v3351_v21 = vpop.xlane.xlu1 %3350 }
 0xbd5   : > { %v3360_v22 = vadd.f32 1e-05, %v3356_v24  ;;  %v3357_v52 = vmul.f32 0.0078125, %v3351_v21 }
 0xbd7   : > { %7075 = vrsqrt.f32 %v3360_v22  ;;  %v3361_v23 = vadd.f32 1e-05, %v3357_v52 }
 0xbd8   : > { %v3355_v31 = vpop.xlane.xlu1 %3354  ;;  %v3353_v27 = vpop.xlane.xlu0 %3352 }
 0xbd9   : > { %7077 = vrsqrt.f32 %v3361_v23  ;;  %v3359_v18 = vmul.f32 0.0078125, %v3355_v31  ;;  %v3358_v33 = vmul.f32 0.0078125, %v3353_v27 }
 0xbdb   : > { %v3363_v57 = vadd.f32 1e-05, %v3359_v18  ;;  %v3362_v63 = vadd.f32 1e-05, %v3358_v33 }
 0xbdd   : > { %7079 = vrsqrt.f32 %v3363_v57  ;;  %v5836_v57 = vld [vmem:[%s8302_s23] ss:$0 sm:$0xff]  ;;  %s8304_s23 = sld [smem:[#allocation17_spill]] }
 0xbde   : > { %7081 = vrsqrt.f32 %v3362_v63 }
 0xbe1   : > { %v7076_v32 = vpop.eup %7075 }
 0xbe2   : > { %v3368_v30 = vmul.f32 %v7076_v32, %v7836_v42 }
 0xbe3   : > { %v7078_v35 = vpop.eup %7077 }
 0xbe4   : > { %v3378_v36 = vmul.f32 %v5818_v34, %v3368_v30  ;;  %v3369_v29 = vmul.f32 %v7078_v35, %v7838_v43 }
 0xbe6   : > { %v3379_v26 = vmul.f32 %v5818_v34, %v3369_v29  ;;  %v7880_v37 = vadd.f32 %v5819_v25, %v3378_v36 }
 0xbe7   : > { %v7080_v28 = vpop.eup %7079 }
 0xbe8   : > { %v7082_v38 = vpop.eup %7081  ;;  %v7882_v39 = vadd.f32 %v5819_v25, %v3379_v26  ;;  %v3371_v60 = vmul.f32 %v7080_v28, %v7842_v48  ;;  %v6912_v48 = vld [vmem:[%s7312_s27 + $0x30] sm:$0xff]  }
 0xbe9   : > { %v3370_v40 = vmul.f32 %v7082_v38, %v7846_v53  ;;  %6096 = vmatpush3.bf16.msra.mxu0 %v6912_v48  ;;  %v3395_v53 = vlaneseq }
 0xbea   : > { %v3392_v41 = vpack.c.bf16 %v7882_v39, %v7880_v37  ;;  %v3381_v42 = vmul.f32 %v5818_v34, %v3371_v60  ;;  %6097 = vmatprep.subr.bf16.mxu0 %v6913_v50 }
 0xbeb   : > { %v3380_v61 = vmul.f32 %v5818_v34, %v3370_v40  ;;  %v7901_v54 = vshrl.u32 %v3395_v53, 7 }
 0xbec   : > { %3518 = vmatmul.mubr.bf16.vlgmr.msra.gmra.mrb[24].mxu1 %v3392_v41  ;;  %v7891_v43 = vadd.f32 %v5819_v25, %v3381_v42 }
 0xbed   : > { %3527 = vmatprep.mubr.bf16.mxu1 %v7219_v9  ;;  %v7889_v3 = vadd.f32 %v5819_v25, %v3380_v61  ;;  %6098 = vmatpush3.bf16.msra.mxu0 %v6914_v51  ;;  %v3397_v55 = vsub.s32 0, %v7901_v54  ;;  %v3401_v58 = vsub.s32 1, %v7901_v54 }
 0xbef   : > { %v3393_v2 = vpack.c.bf16 %v7891_v43, %v7889_v3  ;;  %v3398_v59 = vrot.slane %v1357_v56, %v3397_v55  ;;  %v3402_v62 = vrot.slane %v1357_v56, %v3401_v58 }
 0xbf4   : > { %3528 = vmatmul.mubr.bf16.gmra.mrb[28].mxu1 %v3393_v2 }
 0xcbf   : > { %v3519_v0 = vpop.f32.mrb[24].mxu1 }
 0xcc0   : > { %v3520_v1 = vadd.f32 %v3519_v0, %v3398_v59  ;;  %v3521_v4 = vpop.f32.mrb[25].mxu1 }
 0xcc1   : > { %v3522_v45 = vadd.f32 %v3521_v4, %v3402_v62  ;;  %v3523_v5 = vpop.f32.mrb[26].mxu1 }
 0xcc2   : > { %v3524_v47 = vadd.f32 %v3523_v5, %v3398_v59  ;;  %v3525_v6 = vpop.f32.mrb[27].mxu1  ;;  %v3538_v8 = vmax.f32 %v3520_v1, 0.0 }
 0xcc3   : > { %v3526_v7 = vadd.f32 %v3525_v6, %v3402_v62  ;;  %v3539_v11 = vmax.f32 %v3522_v45, 0.0  ;;  %v7220_v6 = vmov 0.0|0.0  }
 0xcc4   : > { %v3540_v10 = vmax.f32 %v3524_v47, 0.0  ;;  %6678 = vmatprep.subr.bf16.mxu1 %v7220_v6 }
 0xcc5   : > { %v3541_v17 = vmax.f32 %v3526_v7, 0.0  ;;  %v7222_v7 = vmov 0.0  }
 0xcc6   : > { %v3546_v19 = vpack.c.bf16 %v3540_v10, %v3538_v8  ;;  %6423 = vmatprep.mubr.msk.f32.mxu1 %vm7221_vm2, %v7222_v7  ;;  %6426 = vmatprep.subr.bf16.mxu0 %v7222_v7  ;;  %v6915_v8 = vld [vmem:[%s8303_s16] sm:$0xff]   ;;  %v6917_v10 = vld [vmem:[%s8303_s16 + $0x8] sm:$0xff]  }
 0xcc7   : > { %v3547_v20 = vpack.c.bf16 %v3541_v17, %v3539_v11  ;;  %v3529_v12 = vpop.f32.mrb[28].mxu1  ;;  %v6919_v11 = vld [vmem:[%s8303_s16 + $0x10] sm:$0xff]   ;;  %v6921_v17 = vld [vmem:[%s8303_s16 + $0x18] sm:$0xff]  }
 0xcc8   : > { %v3530_v13 = vadd.f32 %v3529_v12, %v3398_v59  ;;  %v3531_v14 = vpop.f32.mrb[29].mxu1  ;;  %v6927_v12 = vld [vmem:[%s8303_s16 + $0x30] sm:$0xff]  }
 0xcc9   : > { %v3532_v15 = vadd.f32 %v3531_v14, %v3402_v62  ;;  %v3533_v16 = vpop.f32.mrb[30].mxu1  ;;  %3684 = vmatprep.mubr.bf16.mxu0 %v3547_v20  ;;  %v6925_v20 = vld [vmem:[%s8303_s16 + $0x28] sm:$0xff]  }
 0xcca   : > { %v3534_v49 = vadd.f32 %v3533_v16, %v3398_v59  ;;  %v3535_v24 = vpop.f32.mrb[31].mxu1  ;;  %3685 = vmatmul.mubr.bf16.vlgmr.msra.gmra.mrb[24].mxu0 %v3546_v19  ;;  %v3542_v22 = vmax.f32 %v3530_v13, 0.0  ;;  %v6923_v19 = vld [vmem:[%s8303_s16 + $0x20] sm:$0xff]  }
 0xccb   : > { %v3536_v21 = vadd.f32 %v3535_v24, %v3402_v62  ;;  %v3543_v23 = vmax.f32 %v3532_v15, 0.0  ;;  %6427 = vmatpush3.bf16.msra.mxu0 %v6915_v8 }
 0xccc   : > { %v3544_v52 = vmax.f32 %v3534_v49, 0.0  ;;  %6428 = vmatprep.subr.bf16.mxu0 %v7222_v7 }
 0xccd   : > { %v3545_v31 = vmax.f32 %v3536_v21, 0.0 }
 0xcce   : > { %v3548_v27 = vpack.c.bf16 %v3544_v52, %v3542_v22 }
 0xccf   : > { %v3549_v18 = vpack.c.bf16 %v3545_v31, %v3543_v23  ;;  %6429 = vmatpush3.bf16.msra.mxu0 %v6917_v10 }
 0xcd0   : > { %6430 = vmatprep.subr.bf16.mxu0 %v7222_v7 }
 0xcd1   : > { %3692 = vmatprep.mubr.bf16.mxu0 %v3549_v18 }
 0xcd2   : > { %3693 = vmatmul.mubr.bf16.gmra.mrb[28].mxu0 %v3548_v27 }
 0xcd3   : > { %6442 = vmatprep.mubr.msk.bf16.mxu0 %vm7221_vm2, %v7222_v7  ;;  %6431 = vmatpush3.bf16.msra.mxu0 %v6919_v11 }
 0xcd4   : > { %6432 = vmatprep.subr.bf16.mxu0 %v7222_v7 }
 0xcd7   : > { %6433 = vmatpush3.bf16.msra.mxu0 %v6921_v17 }
 0xcd8   : > { %6434 = vmatprep.subr.bf16.mxu0 %v7222_v7 }
 0xcdb   : > { %6435 = vmatpush3.bf16.msra.mxu0 %v6923_v19 }
 0xcdc   : > { %6436 = vmatprep.subr.bf16.mxu0 %v7222_v7 }
 0xcdf   : > { %6437 = vmatpush3.bf16.msra.mxu0 %v6925_v20 }
 0xce0   : > { %6438 = vmatprep.subr.bf16.mxu0 %v7222_v7 }
 0xce3   : > { %6439 = vmatpush3.bf16.msra.mxu0 %v6927_v12 }
 0xce4   : > { %6440 = vmatprep.subr.bf16.mxu0 %v7222_v7 }
 0xd9d   : > { %v6099_v33 = vpop.f32.mrb[24].mxu0 }
 0xd9e   : > { %v6100_v63 = vpop.f32.mrb[25].mxu0 }
 0xd9f   : > { %v6101_v32 = vadd.f32 %v6100_v63, %v6099_v33  ;;  %v6102_v34 = vpop.f32.mrb[26].mxu0  ;;  %v5853_v33 = vld [vmem:[%s8304_s23] ss:$0 sm:$0xff]  ;;  %s8308_s23 = sld [smem:[#allocation23_spill]] }
 0xda0   : > { %v6103_v30 = vpop.f32.mrb[27].mxu0 }
 0xda1   : > { %v3687_v35 = vadd.f32 %v6101_v32, %v5836_v57  ;;  %v6104_v36 = vadd.f32 %v6103_v30, %v6102_v34  ;;  %v5854_v30 = vld [vmem:[%s8305_s22] ss:$0 sm:$0xff]  ;;  %s8307_s22 = sld [smem:[#allocation35_spill]] }
 0xda3   : > { %v3690_v29 = vadd.f32 %v6104_v36, %v5836_v57  ;;  %v3701_v25 = vadd.f32 %v3687_v35, %v7880_v37 }
 0xda5   : > { %3705 = vadd.xlane.f32.xlu0 %v3701_v25  ;;  %v6105_v26 = vpop.f32.mrb[28].mxu0  ;;  %v3702_v28 = vadd.f32 %v3690_v29, %v7882_v39  ;;  %v6934_v8 = vld [vmem:[%s8308_s23 + $0x18] sm:$0xff]   ;;  %v6935_v10 = vld [vmem:[%s8308_s23 + $0x20] sm:$0xff]   ;;  %v6936_v11 = vld [vmem:[%s8308_s23 + $0x28] sm:$0xff]  }
 0xda6   : > { %v6106_v38 = vpop.f32.mrb[29].mxu0  ;;  %v6937_v17 = vld [vmem:[%s8308_s23 + $0x30] sm:$0xff]   ;;  %v6938_v19 = vld [vmem:[%s8308_s23 + $0x38] sm:$0xff]  }
 0xda7   : > { %v6107_v60 = vadd.f32 %v6106_v38, %v6105_v26  ;;  %3707 = vadd.xlane.f32.xlu1 %v3702_v28  ;;  %v6108_v40 = vpop.f32.mrb[30].mxu0 }
 0xda8   : > { %v6109_v41 = vpop.f32.mrb[31].mxu0 }
 0xda9   : > { %v3695_v42 = vadd.f32 %v6107_v60, %v5836_v57  ;;  %v6110_v61 = vadd.f32 %v6109_v41, %v6108_v40  ;;  %v3772_v41 = vand.u32 127, %v3395_v53  ;;  %v6918_v53 = vld [vmem:[%s8306_s3 + $0x8] sm:$0xff]  }
 0xdab   : > { %v3698_v2 = vadd.f32 %v6110_v61, %v5836_v57  ;;  %v3703_v44 = vadd.f32 %v3695_v42, %v7889_v3  ;;  %v3773_v42 = vmul.u32 8, %v7901_v54  ;;  %v6988_v54 = vld [vmem:[%s8322_s9 + $0x8] sm:$0xff]  }
 0xdad   : > { %3709 = vadd.xlane.f32.xlu0 %v3703_v44  ;;  %v3704_v46 = vadd.f32 %v3698_v2, %v7891_v43  ;;  %vm3774_vm3 = vcmp.eq.s32.totalorder %v3772_v41, %v3773_v42 }
 0xdaf   : > { %3711 = vadd.xlane.f32.xlu1 %v3704_v46 }
 0xe32   : > { %v3706_v48 = vpop.xlane.xlu0 %3705 }
 0xe33   : > { %v3713_v37 = vmul.f32 0.0078125, %v3706_v48  ;;  %v5855_v48 = vsel %vm3774_vm3, 1.0, %v7222_v7 }
 0xe34   : > { %v3708_v50 = vpop.xlane.xlu1 %3707 }
 0xe35   : > { %v7915_v51 = vsub.f32 %v3701_v25, %v3713_v37  ;;  %v3714_v39 = vmul.f32 0.0078125, %v3708_v50  ;;  %v6916_v37 = vld [vmem:[%s8306_s3] sm:$0xff]   ;;  %v6920_v50 = vld [vmem:[%s8306_s3 + $0x10] sm:$0xff]  }
 0xe37   : > { %v7917_v56 = vsub.f32 %v3702_v28, %v3714_v39  ;;  %v3721_v59 = vmul.f32 %v7915_v51, %v7915_v51  ;;  %v6924_v39 = vld [vmem:[%s8306_s3 + $0x20] sm:$0xff]  }
 0xe39   : > { %3725 = vadd.xlane.f32.xlu0 %v3721_v59  ;;  %v3722_v62 = vmul.f32 %v7917_v56, %v7917_v56  ;;  %v6928_v59 = vld [vmem:[%s8306_s3 + $0x30] sm:$0xff]  }
 0xe3a   : > { %v3710_v3 = vpop.xlane.xlu0 %3709 }
 0xe3b   : > { %v3715_v0 = vmul.f32 0.0078125, %v3710_v3  ;;  %3727 = vadd.xlane.f32.xlu1 %v3722_v62  ;;  %v6929_v62 = vld [vmem:[%s8303_s16 + $0x38] sm:$0xff]  }
 0xe3c   : > { %v3712_v43 = vpop.xlane.xlu1 %3711  ;;  %v6930_v3 = vld [vmem:[%s8306_s3 + $0x38] sm:$0xff]   ;;  %6441 = vmatpush3.bf16.msra.mxu0 %v6929_v62 }
 0xe3d   : > { %v3719_v1 = vsub.f32 %v3703_v44, %v3715_v0  ;;  %v3716_v4 = vmul.f32 0.0078125, %v3712_v43  ;;  %6466 = vmatprep.subr.bf16.mxu0 %v7222_v7  ;;  %v1515_v0 = vld [vmem:[%s8307_s22] sm:$0xf]  ;;  %s8309_s22 = sld [smem:[#allocation20_spill]] }
 0xe3f   : > { %v7923_v45 = vsub.f32 %v3704_v46, %v3716_v4  ;;  %v3723_v5 = vmul.f32 %v3719_v1, %v3719_v1 }
 0xe41   : > { %3729 = vadd.xlane.f32.xlu0 %v3723_v5  ;;  %v3724_v47 = vmul.f32 %v7923_v45, %v7923_v45 }
 0xe43   : > { %3731 = vadd.xlane.f32.xlu1 %v3724_v47  ;;  %v6932_v47 = vld [vmem:[%s8308_s23 + $0x8] sm:$0xff]   ;;  %v5857_v20 = vld [vmem:[%s8309_s22] ss:$0 sm:$0xff]  ;;  %s8316_s22 = sld [smem:[#allocation26_spill]] }
 0xec6   : > { %v3726_v13 = vpop.xlane.xlu0 %3725 }
 0xec7   : > { %v3733_v14 = vmul.f32 0.0078125, %v3726_v13 }
 0xec8   : > { %v3728_v15 = vpop.xlane.xlu1 %3727 }
 0xec9   : > { %v3737_v16 = vadd.f32 1e-05, %v3733_v14  ;;  %v3734_v49 = vmul.f32 0.0078125, %v3728_v15 }
 0xecb   : > { %7083 = vrsqrt.f32 %v3737_v16  ;;  %v3738_v24 = vadd.f32 1e-05, %v3734_v49 }
 0xecd   : > { %7085 = vrsqrt.f32 %v3738_v24 }
 0xece   : > { %v3730_v21 = vpop.xlane.xlu0 %3729 }
 0xecf   : > { %v3735_v22 = vmul.f32 0.0078125, %v3730_v21 }
 0xed0   : > { %v3732_v52 = vpop.xlane.xlu1 %3731 }
 0xed1   : > { %v3739_v23 = vadd.f32 1e-05, %v3735_v22  ;;  %v3736_v31 = vmul.f32 0.0078125, %v3732_v52 }
 0xed3   : > { %7087 = vrsqrt.f32 %v3739_v23  ;;  %v3740_v27 = vadd.f32 1e-05, %v3736_v31  ;;  %v5875_v31 = vld [vmem:[%s8311_s5] ss:$0 sm:$0xff]  ;;  %s8313_s5 = smov 96  }
 0xed5   : > { %v7084_v18 = vpop.eup %7083  ;;  %7089 = vrsqrt.f32 %v3740_v27 }
 0xed6   : > { %v3745_v57 = vmul.f32 %v7084_v18, %v7915_v51  ;;  %v6922_v51 = vld [vmem:[%s8306_s3 + $0x18] sm:$0xff]  }
 0xed7   : > { %v7086_v63 = vpop.eup %7085 }
 0xed8   : > { %v3746_v32 = vmul.f32 %v7086_v63, %v7917_v56  ;;  %v3755_v34 = vmul.f32 %v5853_v33, %v3745_v57  ;;  %v6926_v56 = vld [vmem:[%s8306_s3 + $0x28] sm:$0xff]   ;;  %s8310_s3 = sld [smem:[#allocation22_spill]] }
 0xeda   : > { %v3756_v35 = vmul.f32 %v5853_v33, %v3746_v32  ;;  %v3765_v36 = vadd.f32 %v5854_v30, %v3755_v34 }
 0xedc   : > { %v3766_v29 = vadd.f32 %v5854_v30, %v3756_v35 }
 0xedd   : > { %v7088_v25 = vpop.eup %7087 }
 0xede   : > { %v3747_v26 = vmul.f32 %v7088_v25, %v3719_v1  ;;  %v6679_v28 = vpack.c.bf16 %v3766_v29, %v3765_v36  ;;  %v5866_v12 = vld [vmem:[%s8310_s3] ss:$0 sm:$0xff]  ;;  %s8314_s3 = smov 32  }
 0xedf   : > { %v7090_v38 = vpop.eup %7089 }
 0xee0   : > { %v3748_v60 = vmul.f32 %v7090_v38, %v7923_v45  ;;  %6680 = vmatpush3.bf16.msra.mxu1 %v6679_v28  ;;  %v3757_v40 = vmul.f32 %v5853_v33, %v3747_v26  ;;  %v6931_v45 = vld [vmem:[%s8308_s23] sm:$0xff]  }
 0xee1   : > { %6681 = vmatprep.subr.bf16.mxu1 %v7220_v6  ;;  %v6933_v6 = vld [vmem:[%s8308_s23 + $0x10] sm:$0xff]  }
 0xee2   : > { %v3758_v61 = vmul.f32 %v5853_v33, %v3748_v60  ;;  %v3767_v2 = vadd.f32 %v5854_v30, %v3757_v40 }
 0xee4   : > { %v3768_v44 = vadd.f32 %v5854_v30, %v3758_v61 }
 0xee6   : > { %v6682_v46 = vpack.c.bf16 %v3768_v44, %v3767_v2 }
 0xee8   : > { %6683 = vmatpush3.bf16.msra.mxu1 %v6682_v46 }
 0xee9   : > { %6446 = vmatprep.subr.bf16.mxu1 %v7222_v7 }
 0xeeb   : > { %6424 = vmatmul.mubr.msk.f32.vlgmr.msra.gmra.mrb[32].mxu1 %vm1933_vm0, %v5855_v48 }
 0xeec   : > { %6447 = vmatpush3.bf16.msra.mxu1 %v6916_v37  ;;  %6462 = vmatprep.mubr.msk.bf16.mxu1 %vm7221_vm2, %v7222_v7 }
 0xeed   : > { %6448 = vmatprep.subr.bf16.mxu1 %v7222_v7 }
 0xef0   : > { %6449 = vmatpush3.bf16.msra.mxu1 %v6918_v53 }
 0xef1   : > { %6450 = vmatprep.subr.bf16.mxu1 %v7222_v7 }
 0xef4   : > { %6451 = vmatpush3.bf16.msra.mxu1 %v6920_v50 }
 0xef5   : > { %6452 = vmatprep.subr.bf16.mxu1 %v7222_v7 }
 0xef8   : > { %6453 = vmatpush3.bf16.msra.mxu1 %v6922_v51 }
 0xef9   : > { %6454 = vmatprep.subr.bf16.mxu1 %v7222_v7 }
 0xefc   : > { %6455 = vmatpush3.bf16.msra.mxu1 %v6924_v39 }
 0xefd   : > { %6456 = vmatprep.subr.bf16.mxu1 %v7222_v7 }
 0xf00   : > { %6457 = vmatpush3.bf16.msra.mxu1 %v6926_v56 }
 0xf01   : > { %6458 = vmatprep.subr.bf16.mxu1 %v7222_v7 }
 0xf04   : > { %6459 = vmatpush3.bf16.msra.mxu1 %v6928_v59 }
 0xf05   : > { %6460 = vmatprep.subr.bf16.mxu1 %v7222_v7 }
 0xf08   : > { %6461 = vmatpush3.bf16.msra.mxu1 %v6930_v3 }
 0xf09   : > { %6486 = vmatprep.subr.mxu1 %v7222_v7 }
 0xfbe   : > { %v7977_v43 = vpop.f32.mrb[32].mxu1 }
 0xfbf   : > { %v7980_v1 = vadd.f32 %v7977_v43, %v1515_v0  ;;  %v6425_v4 = vpop.f32.mrb[33].mxu1 }
 0xfc1   : > { %v3851_v5 = vpack.c.bf16 %v7980_v1, %v7980_v1 }
 0xfc3   : > { %6443 = vmatmul.mubr.bf16.vlgmr.msra.gmra.mrb[32].mxu0 %v3851_v5  ;;  %6463 = vmatmul.mubr.bf16.vlgmr.msra.gmra.mrb[36].mxu1 %v3851_v5 }
 0xfc4   : > { %6467 = vmatpush3.bf16.msra.mxu0 %v6931_v45  ;;  %6482 = vmatprep.mubr.msk.bf16.mxu0 %vm7221_vm2, %v7222_v7 }
 0xfc5   : > { %6468 = vmatprep.subr.bf16.mxu0 %v7222_v7  ;;  %6488 = vmatprep.mubr.msk.f32.mxu1 %vm7221_vm2, %v7222_v7 }
 0xfc8   : > { %6469 = vmatpush3.bf16.msra.mxu0 %v6932_v47 }
 0xfc9   : > { %6470 = vmatprep.subr.bf16.mxu0 %v7222_v7 }
 0xfcc   : > { %6471 = vmatpush3.bf16.msra.mxu0 %v6933_v6 }
 0xfcd   : > { %6472 = vmatprep.subr.bf16.mxu0 %v7222_v7 }
 0xfd0   : > { %6473 = vmatpush3.bf16.msra.mxu0 %v6934_v8 }
 0xfd1   : > { %6474 = vmatprep.subr.bf16.mxu0 %v7222_v7 }
 0xfd4   : > { %6475 = vmatpush3.bf16.msra.mxu0 %v6935_v10 }
 0xfd5   : > { %6476 = vmatprep.subr.bf16.mxu0 %v7222_v7 }
 0xfd8   : > { %6477 = vmatpush3.bf16.msra.mxu0 %v6936_v11 }
 0xfd9   : > { %6478 = vmatprep.subr.bf16.mxu0 %v7222_v7 }
 0xfdc   : > { %6479 = vmatpush3.bf16.msra.mxu0 %v6937_v17 }
 0xfdd   : > { %6480 = vmatprep.subr.bf16.mxu0 %v7222_v7 }
 0xfe0   : > { %6481 = vmatpush3.bf16.msra.mxu0 %v6938_v19 }
 0xfe1   : > { %6522 = vmatprep.subr.mxu0 %v7222_v7 }
 0xfe3   : > { %6483 = vmatmul.mubr.bf16.vlgmr.msra.gmra.mrb[36].mxu0 %v3851_v5 }
 0xfe4   : > { %6524 = vmatprep.mubr.msk.f32.mxu0 %vm7221_vm2, %v7222_v7 }
0x1096   : > { %v3940_v13 = vpop.f32.mrb[32].mxu0  ;;  %v4034_v14 = vpop.f32.mrb[36].mxu1 }
0x1097   : > { %v3941_v15 = vadd.f32 %v5857_v20, %v3940_v13  ;;  %v4035_v16 = vadd.f32 %v5866_v12, %v4034_v14  ;;  %v6444_v49 = vpop.f32.mrb[33].mxu0  ;;  %v6464_v24 = vpop.f32.mrb[37].mxu1 }
0x1098   : > { %v3943_v21 = vpop.f32.mrb[34].mxu0  ;;  %v4037_v22 = vpop.f32.mrb[38].mxu1 }
0x1099   : > { %4580 = vrot.lane.b32.xlu1 %v3941_v15, %s8312_s8  ;;  %v6445_v52 = vpop.f32.mrb[35].mxu0  ;;  %4582 = vrot.lane.b32.xlu0 %v4035_v16, %s8312_s8  ;;  %v6465_v23 = vpop.f32.mrb[39].mxu1 }
0x109a   : > { %6487 = vmatpush3.xpose.msk.msra.mxu1 %vm1933_vm0, %v4035_v16 }
0x109b   : > { %6491 = vmatprep.subr.mxu1 %v7222_v7 }
0x109d   : > { %6489 = vmatmul.mubr.msk.f32.vlgmr.msra.gmra.mrb[34].mxu1 %vm1933_vm0, %v3941_v15 }
0x109e   : > { %6493 = vmatprep.mubr.msk.f32.mxu1 %vm7221_vm2, %v7222_v7 }
0x10b6   : > { %v4128_v27 = vpop.f32.mrb[36].mxu0 }
0x10b7   : > { %v8016_v18 = vadd.f32 %v5875_v31, %v4128_v27  ;;  %v6484_v33 = vpop.f32.mrb[37].mxu0 }
0x10b8   : > { %v4131_v57 = vpop.f32.mrb[38].mxu0 }
0x10b9   : > { %v6485_v63 = vpop.f32.mrb[39].mxu0  ;;  %6492 = vmatpush3.msk.msra.mxu1 %vm4227_vm4, %v8016_v18 }
0x10ba   : > { %6496 = vmatprep.subr.mxu1 %v7222_v7 }
0x110b   : > { %v4583_v32 = vpop.permute.xlu0 %4582  ;;  %v4581_v34 = vpop.permute.xlu1 %4580 }
0x110c   : > { %6523 = vmatpush3.xpose.msk.msra.mxu0 %vm1933_vm0, %v4583_v32 }
0x110d   : > { %6527 = vmatprep.subr.mxu0 %v7222_v7 }
0x110f   : > { %6525 = vmatmul.mubr.msk.f32.vlgmr.msra.gmra.mrb[40].mxu0 %vm1933_vm0, %v4581_v34 }
0x1110   : > { %6529 = vmatprep.mubr.msk.f32.mxu0 %vm7221_vm2, %v7222_v7 }
0x1170   : > { %v4206_v30 = vpop.f32.mrb[34].mxu1 }
0x1171   : > { %v4210_v35 = vmul.f32 0.17677669, %v4206_v30  ;;  %v6490_v36 = vpop.f32.mrb[35].mxu1 }
0x1173   : > { %v4212_v29 = vsel %vm4211_vm5, %v4210_v35, -inf }
0x1174   : > { %4213 = vmax.xlane.f32.xlu1 %v4212_v29 }
0x1185   : > { %4302 = vrot.lane.b32.xlu1 %v3941_v15, %s8313_s5 }
0x1189   : > { %4670 = vrot.lane.b32.xlu1 %v8016_v18, %s8312_s8  ;;  %s8315_s8 = sld [smem:[#allocation25_spill]] }
0x118f   : > { %v6939_v32 = vld [vmem:[%s8315_s8 + $0x10] sm:$0xff]   ;;  %v6940_v30 = vld [vmem:[%s8315_s8 + $0x18] sm:$0xff]  }
0x11e2   : > { %v4654_v25 = vpop.f32.mrb[40].mxu0 }
0x11e3   : > { %v4658_v26 = vmul.f32 0.17677669, %v4654_v25  ;;  %v6526_v28 = vpop.f32.mrb[41].mxu0 }
0x11e5   : > { %v4659_v38 = vsel %vm4211_vm5, %v4658_v26, -inf }
0x11e6   : > { %4660 = vmax.xlane.f32.xlu0 %v4659_v38 }
0x1201   : > { %v4214_v60 = vpop.xlane.xlu1 %4213 }
0x1202   : > { %v4215_v40 = vsub.f32 %v4210_v35, %v4214_v60  ;;  %v6942_v60 = vld [vmem:[%s8315_s8 + $0x8] sm:$0xff]  }
0x1204   : > { %v4216_v41 = vmul.f32 1.442695, %v4215_v40  ;;  %v6943_v40 = vld [vmem:[%s8315_s8 + $0x20] sm:$0xff]  }
0x1205   : > { %v4303_v42 = vpop.permute.xlu1 %4302 }
0x1206   : > { %7091 = vpow2.f32 %v4216_v41  ;;  %v6944_v41 = vld [vmem:[%s8315_s8 + $0x28] sm:$0xff]  }
0x1209   : > { %v4671_v61 = vpop.permute.xlu1 %4670 }
0x120a   : > { %6528 = vmatpush3.msk.msra.mxu0 %vm4227_vm4, %v4671_v61 }
0x120b   : > { %6540 = vmatprep.subr.mxu0 %v7222_v7 }
0x1210   : > { %v7092_v2 = vpop.eup %7091 }
0x1211   : > { %v4218_v44 = vsel %vm4211_vm5, %v7092_v2, 0.0 }
0x1212   : > { %4219 = vadd.xlane.f32.xlu0 %v4218_v44 }
0x1228   : > { %4304 = vrot.lane.b32.xlu0 %v4035_v16, %s8313_s5 }
0x122c   : > { %4804 = vrot.lane.b32.xlu0 %v3941_v15, %s8314_s3 }
0x1273   : > { %v4661_v46 = vpop.xlane.xlu0 %4660 }
0x1274   : > { %v4662_v48 = vsub.f32 %v4658_v26, %v4661_v46  ;;  %v6941_v26 = vld [vmem:[%s8315_s8] sm:$0xff]  }
0x1276   : > { %v4663_v37 = vmul.f32 1.442695, %v4662_v48 }
0x1278   : > { %7093 = vpow2.f32 %v4663_v37 }
0x1282   : > { %v7094_v53 = vpop.eup %7093 }
0x1283   : > { %v4665_v50 = vsel %vm4211_vm5, %v7094_v53, 0.0 }
0x1284   : > { %4666 = vadd.xlane.f32.xlu1 %v4665_v50 }
0x1295   : > { %4806 = vrot.lane.b32.xlu1 %v4035_v16, %s8314_s3 }
0x129f   : > { %v4220_v51 = vpop.xlane.xlu0 %4219 }
0x12a0   : > { %7095 = vrcp.f32 %v4220_v51 }
0x12a3   : > { %v4305_v59 = vpop.permute.xlu0 %4304 }
0x12a7   : > { %v4805_v45 = vpop.permute.xlu0 %4804 }
0x12aa   : > { %v7096_v39 = vpop.eup %7095 }
0x12ab   : > { %v4222_v56 = vmul.f32 %v7096_v39, %v7092_v2  ;;  %v6946_v2 = vld [vmem:[%s8315_s8 + $0x38] sm:$0xff]  }
0x12ad   : > { %6494 = vmatmul.mubr.msk.f32.vlgmr.msra.gmra.mrb[40].mxu1 %vm4223_vm6, %v4222_v56 }
0x12ae   : > { %6497 = vmatpush3.xpose.msk.msra.mxu1 %vm1933_vm0, %v4305_v59  ;;  %6498 = vmatprep.mubr.msk.f32.mxu1 %vm7221_vm2, %v7222_v7 }
0x12af   : > { %6501 = vmatprep.subr.mxu1 %v7222_v7 }
0x12b1   : > { %6499 = vmatmul.mubr.msk.f32.vlgmr.msra.gmra.mrb[42].mxu1 %vm1933_vm0, %v4303_v42  ;;  %v6945_v42 = vld [vmem:[%s8315_s8 + $0x30] sm:$0xff]   ;;  %s8321_s8 = sld [smem:[#allocation30_spill]] }
0x12b2   : > { %6503 = vmatprep.mubr.msk.f32.mxu1 %vm7221_vm2, %v7222_v7 }
0x1311   : > { %v4667_v62 = vpop.xlane.xlu1 %4666 }
0x1312   : > { %7097 = vrcp.f32 %v4667_v62 }
0x1315   : > { %v4807_v4 = vpop.permute.xlu1 %4806 }
0x131c   : > { %v7098_v3 = vpop.eup %7097 }
0x131d   : > { %v4669_v0 = vmul.f32 %v7098_v3, %v7094_v53 }
0x131f   : > { %6530 = vmatmul.mubr.msk.f32.vlgmr.msra.gmra.mrb[42].mxu0 %vm4223_vm6, %v4669_v0 }
0x1320   : > { %6541 = vmatpush3.xpose.msk.msra.mxu0 %vm1933_vm0, %v4807_v4  ;;  %6542 = vmatprep.mubr.msk.f32.mxu0 %vm7221_vm2, %v7222_v7 }
0x1321   : > { %6545 = vmatprep.subr.mxu0 %v7222_v7 }
0x1323   : > { %6543 = vmatmul.mubr.msk.f32.vlgmr.msra.gmra.mrb[44].mxu0 %vm1933_vm0, %v4805_v45 }
0x1324   : > { %6547 = vmatprep.mubr.msk.f32.mxu0 %vm7221_vm2, %v7222_v7 }
0x1380   : > { %v8054_v5 = vpop.f32.mrb[40].mxu1 }
0x1381   : > { %v6495_v47 = vpop.f32.mrb[41].mxu1 }
0x1384   : > { %v4376_v6 = vpop.f32.mrb[42].mxu1 }
0x1385   : > { %v4380_v8 = vmul.f32 0.17677669, %v4376_v6  ;;  %v6500_v10 = vpop.f32.mrb[43].mxu1  ;;  %v5912_v6 = vld [vmem:[%s8316_s22] ss:$0 sm:$0xff]  ;;  %s8319_s22 = sld [smem:[#allocation27_spill]] }
0x1387   : > { %v4381_v11 = vsel %vm4211_vm5, %v4380_v8, -inf }
0x1388   : > { %4382 = vmax.xlane.f32.xlu1 %v4381_v11 }
0x1399   : > { %4392 = vrot.lane.b32.xlu1 %v8016_v18, %s8313_s5  ;;  %s8317_s5 = sld [smem:[#allocation29_spill]] }
0x13f2   : > { %v8059_v17 = vpop.f32.mrb[42].mxu0 }
0x13f3   : > { %v6531_v19 = vpop.f32.mrb[43].mxu0  ;;  %v4747_v61 = vpack.c.bf16 %v8059_v17, %v8059_v17 }
0x13f6   : > { %v4878_v20 = vpop.f32.mrb[44].mxu0 }
0x13f7   : > { %v4882_v12 = vmul.f32 0.17677669, %v4878_v20  ;;  %v6544_v13 = vpop.f32.mrb[45].mxu0 }
0x13f9   : > { %v4883_v14 = vsel %vm4211_vm5, %v4882_v12, -inf }
0x13fa   : > { %4884 = vmax.xlane.f32.xlu0 %v4883_v14  ;;  %v6947_v14 = vld [vmem:[%s8317_s5] ss:$8 sps:$4 sm:$0xff]  }
0x1415   : > { %v4383_v15 = vpop.xlane.xlu1 %4382 }
0x1416   : > { %v4384_v16 = vsub.f32 %v4380_v8, %v4383_v15  ;;  %v6949_v15 = vld [vmem:[%s8317_s5 + $0x4] ss:$8 sps:$4 sm:$0xff]  }
0x1418   : > { %v4385_v49 = vmul.f32 1.442695, %v4384_v16  ;;  %v6952_v16 = vld [vmem:[%s8317_s5 + $0x14] ss:$8 sps:$4 sm:$0xff]  }
0x1419   : > { %v4393_v24 = vpop.permute.xlu1 %4392 }
0x141a   : > { %7099 = vpow2.f32 %v4385_v49  ;;  %6502 = vmatpush3.msk.msra.mxu1 %vm4227_vm4, %v4393_v24  ;;  %v6950_v49 = vld [vmem:[%s8317_s5 + $0x10] ss:$8 sps:$4 sm:$0xff]   ;;  %v6955_v24 = vld [vmem:[%s8317_s5 + $0x24] ss:$8 sps:$4 sm:$0xff]  }
0x141b   : > { %6506 = vmatprep.subr.bf16.mxu1 %v7222_v7 }
0x1424   : > { %v7100_v21 = vpop.eup %7099 }
0x1425   : > { %v4387_v22 = vsel %vm4211_vm5, %v7100_v21, 0.0 }
0x1426   : > { %4388 = vadd.xlane.f32.xlu0 %v4387_v22 }
0x1487   : > { %v4885_v52 = vpop.xlane.xlu0 %4884 }
0x1488   : > { %v4886_v23 = vsub.f32 %v4882_v12, %v4885_v52 }
0x148a   : > { %v4887_v31 = vmul.f32 1.442695, %v4886_v23 }
0x148c   : > { %7101 = vpow2.f32 %v4887_v31 }
0x1496   : > { %v7102_v27 = vpop.eup %7101 }
0x1497   : > { %v4889_v33 = vsel %vm4211_vm5, %v7102_v27, 0.0 }
0x1498   : > { %4890 = vadd.xlane.f32.xlu0 %v4889_v33  ;;  %v6956_v33 = vld [vmem:[%s8317_s5 + $0x30] ss:$8 sps:$4 sm:$0xff]  }
0x14ae   : > { %4894 = vrot.lane.b32.xlu0 %v8016_v18, %s8314_s3  ;;  %s8318_s3 = sld [smem:[#allocation31_spill]] }
0x14b3   : > { %v4389_v57 = vpop.xlane.xlu0 %4388 }
0x14b4   : > { %7103 = vrcp.f32 %v4389_v57  ;;  %v6961_v57 = vld [vmem:[%s8317_s5 + $0x44] ss:$8 sps:$4 sm:$0xff]  }
0x14be   : > { %v7104_v63 = vpop.eup %7103 }
0x14bf   : > { %v4391_v34 = vmul.f32 %v7104_v63, %v7100_v21  ;;  %v6953_v21 = vld [vmem:[%s8317_s5 + $0x20] ss:$8 sps:$4 sm:$0xff]  }
0x14c0   : > { %v6959_v63 = vld [vmem:[%s8317_s5 + $0x40] ss:$8 sps:$4 sm:$0xff]  }
0x14c1   : > { %6504 = vmatmul.mubr.msk.f32.vlgmr.msra.gmra.mrb[44].mxu1 %vm4223_vm6, %v4391_v34  ;;  %v6962_v34 = vld [vmem:[%s8317_s5 + $0x50] ss:$8 sps:$4 sm:$0xff]  }
0x14c2   : > { %6507 = vmatpush3.bf16.msra.mxu1 %v6939_v32  ;;  %6510 = vmatprep.mubr.msk.bf16.mxu1 %vm7221_vm2, %v7222_v7  ;;  %v6964_v32 = vld [vmem:[%s8317_s5 + $0x54] ss:$8 sps:$4 sm:$0xff]  }
0x14c3   : > { %6508 = vmatprep.subr.bf16.mxu1 %v7222_v7 }
0x14c6   : > { %6509 = vmatpush3.bf16.msra.mxu1 %v6940_v30  ;;  %v6965_v30 = vld [vmem:[%s8317_s5 + $0x60] ss:$8 sps:$4 sm:$0xff]  }
0x14c7   : > { %6514 = vmatprep.subr.bf16.mxu1 %v7222_v7 }
0x1525   : > { %v4891_v18 = vpop.xlane.xlu0 %4890 }
0x1526   : > { %7105 = vrcp.f32 %v4891_v18  ;;  %v6967_v18 = vld [vmem:[%s8317_s5 + $0x64] ss:$8 sps:$4 sm:$0xff]  }
0x1529   : > { %v4895_v35 = vpop.permute.xlu0 %4894 }
0x152a   : > { %6546 = vmatpush3.msk.msra.mxu0 %vm4227_vm4, %v4895_v35  ;;  %v6970_v35 = vld [vmem:[%s8317_s5 + $0x74] ss:$8 sps:$4 sm:$0xff]  }
0x152b   : > { %5155 = vmatprep.subr.bf16.mxu0 %v6949_v15 }
0x1530   : > { %v7106_v36 = vpop.eup %7105 }
0x1531   : > { %v4893_v29 = vmul.f32 %v7106_v36, %v7102_v27  ;;  %v6958_v27 = vld [vmem:[%s8317_s5 + $0x34] ss:$8 sps:$4 sm:$0xff]   ;;  %v6968_v36 = vld [vmem:[%s8317_s5 + $0x70] ss:$8 sps:$4 sm:$0xff]   ;;  %s8320_s5 = sld [smem:[#allocation28_spill]] }
0x1533   : > { %6548 = vmatmul.mubr.msk.f32.vlgmr.msra.gmra.mrb[46].mxu0 %vm4223_vm6, %v4893_v29  ;;  %v6971_v29 = vld [vmem:[%s8318_s3 + $0x40] sm:$0xff]  }
0x1534   : > { %5187 = vmatprep.mubr.bf16.mxu0 %v7219_v9  ;;  %v4301_v9 = vpack.c.bf16 %v8054_v5, %v8054_v5  ;;  %5156 = vmatpush1.bf16.msra.mxu0 %v6947_v14  ;;  %v6987_v14 = vld [vmem:[%s8322_s9] sm:$0xff]  }
0x1535   : > { %5157 = vmatprep.subr.bf16.mxu0 %v6952_v16  ;;  %v6991_v16 = vld [vmem:[%s8322_s9 + $0x20] sm:$0xff]  }
0x1538   : > { %5158 = vmatpush1.bf16.msra.mxu0 %v6950_v49  ;;  %v6992_v49 = vld [vmem:[%s8322_s9 + $0x28] sm:$0xff]  }
0x1539   : > { %5159 = vmatprep.subr.bf16.mxu0 %v6955_v24  ;;  %v6993_v24 = vld [vmem:[%s8322_s9 + $0x30] sm:$0xff]  }
0x153c   : > { %5160 = vmatpush1.bf16.msra.mxu0 %v6953_v21  ;;  %v6994_v21 = vld [vmem:[%s8322_s9 + $0x38] sm:$0xff]  }
0x153d   : > { %5161 = vmatprep.subr.bf16.mxu0 %v6958_v27 }
0x1540   : > { %5162 = vmatpush1.bf16.msra.mxu0 %v6956_v33 }
0x1541   : > { %5163 = vmatprep.subr.bf16.mxu0 %v6961_v57 }
0x1544   : > { %5164 = vmatpush1.bf16.msra.mxu0 %v6959_v63 }
0x1545   : > { %5165 = vmatprep.subr.bf16.mxu0 %v6964_v32 }
0x1548   : > { %5166 = vmatpush1.bf16.msra.mxu0 %v6962_v34  ;;  %v6995_v34 = vld [vmem:[%s8287_s6] sm:$0xff]  }
0x1549   : > { %5167 = vmatprep.subr.bf16.mxu0 %v6967_v18  ;;  %v6996_v18 = vld [vmem:[%s8287_s6 + $0x8] sm:$0xff]  }
0x154c   : > { %5168 = vmatpush1.bf16.msra.mxu0 %v6965_v30 }
0x154d   : > { %5169 = vmatprep.subr.bf16.mxu0 %v6970_v35 }
0x1550   : > { %5170 = vmatpush1.bf16.msra.mxu0 %v6968_v36 }
0x1551   : > { %6558 = vmatprep.subr.bf16.mxu0 %v7222_v7 }
0x1594   : > { %v4465_v25 = vpop.f32.mrb[44].mxu1 }
0x1595   : > { %v4469_v28 = vpack.c.bf16 %v4465_v25, %v4465_v25  ;;  %v6505_v38 = vpop.f32.mrb[45].mxu1  ;;  %v6972_v25 = vld [vmem:[%s8318_s3] sm:$0xff]  }
0x1596   : > { %v6975_v38 = vld [vmem:[%s8318_s3 + $0x50] sm:$0xff]  }
0x1597   : > { %6511 = vmatmul.mubr.msk.bf16.vlgmr.msra.gmra.mrb[48].mxu1 %vm1933_vm0, %v4469_v28  ;;  %v6974_v28 = vld [vmem:[%s8318_s3 + $0x8] sm:$0xff]  }
0x1598   : > { %6515 = vmatpush3.bf16.msra.mxu1 %v6941_v26  ;;  %6518 = vmatprep.mubr.msk.bf16.mxu1 %vm7221_vm2, %v7222_v7  ;;  %v6973_v26 = vld [vmem:[%s8318_s3 + $0x48] sm:$0xff]  }
0x1599   : > { %6516 = vmatprep.subr.bf16.mxu1 %v7222_v7 }
0x159c   : > { %6517 = vmatpush3.bf16.msra.mxu1 %v6942_v60  ;;  %v6976_v60 = vld [vmem:[%s8318_s3 + $0x10] sm:$0xff]  }
0x159d   : > { %6532 = vmatprep.subr.bf16.mxu1 %v7222_v7 }
0x159f   : > { %6519 = vmatmul.mubr.msk.bf16.vlgmr.msra.gmra.mrb[52].mxu1 %vm1933_vm0, %v4301_v9  ;;  %v6978_v9 = vld [vmem:[%s8318_s3 + $0x18] sm:$0xff]  }
0x15a0   : > { %6533 = vmatpush3.bf16.msra.mxu1 %v6943_v40  ;;  %6536 = vmatprep.mubr.msk.bf16.mxu1 %vm7221_vm2, %v7222_v7  ;;  %v6977_v40 = vld [vmem:[%s8318_s3 + $0x58] sm:$0xff]  }
0x15a1   : > { %6534 = vmatprep.subr.bf16.mxu1 %v7222_v7 }
0x15a4   : > { %6535 = vmatpush3.bf16.msra.mxu1 %v6944_v41  ;;  %v6979_v41 = vld [vmem:[%s8318_s3 + $0x60] sm:$0xff]  }
0x15a5   : > { %6550 = vmatprep.subr.bf16.mxu1 %v7222_v7 }
0x15a7   : > { %6537 = vmatmul.mubr.msk.bf16.vlgmr.msra.gmra.mrb[56].mxu1 %vm1933_vm0, %v4747_v61  ;;  %v6981_v61 = vld [vmem:[%s8318_s3 + $0x68] sm:$0xff]  }
0x15a8   : > { %6551 = vmatpush3.bf16.msra.mxu1 %v6945_v42  ;;  %6554 = vmatprep.mubr.msk.bf16.mxu1 %vm7221_vm2, %v7222_v7  ;;  %v6980_v42 = vld [vmem:[%s8318_s3 + $0x20] sm:$0xff]  }
0x15a9   : > { %6552 = vmatprep.subr.bf16.mxu1 %v7222_v7 }
0x15ac   : > { %6553 = vmatpush3.bf16.msra.mxu1 %v6946_v2  ;;  %v6982_v2 = vld [vmem:[%s8318_s3 + $0x28] sm:$0xff]  }
0x15ad   : > { %6171 = vmatprep.subr.bf16.mxu1 %v6971_v29 }
0x1606   : > { %v4967_v44 = vpop.f32.mrb[46].mxu0 }
0x1607   : > { %v4971_v46 = vpack.c.bf16 %v4967_v44, %v4967_v44  ;;  %v6549_v48 = vpop.f32.mrb[47].mxu0 }
0x1609   : > { %6555 = vmatmul.mubr.msk.bf16.vlgmr.msra.gmra.mrb[60].mxu1 %vm1933_vm0, %v4971_v46 }
0x160a   : > { %6172 = vmatpush3.bf16.msra.mxu1 %v6972_v25 }
0x160b   : > { %6173 = vmatprep.subr.bf16.mxu1 %v6973_v26 }
0x160e   : > { %6174 = vmatpush3.bf16.msra.mxu1 %v6974_v28 }
0x160f   : > { %6175 = vmatprep.subr.bf16.mxu1 %v6975_v38 }
0x1612   : > { %6176 = vmatpush3.bf16.msra.mxu1 %v6976_v60  ;;  %v6997_v60 = vld [vmem:[%s8287_s6 + $0x10] sm:$0xff]  }
0x1613   : > { %6177 = vmatprep.subr.bf16.mxu1 %v6977_v40  ;;  %v6998_v40 = vld [vmem:[%s8287_s6 + $0x18] sm:$0xff]  }
0x1616   : > { %6178 = vmatpush3.bf16.msra.mxu1 %v6978_v9  ;;  %v6999_v9 = vld [vmem:[%s8287_s6 + $0x20] sm:$0xff]  }
0x1617   : > { %6179 = vmatprep.subr.bf16.mxu1 %v6979_v41  ;;  %v7000_v41 = vld [vmem:[%s8287_s6 + $0x28] sm:$0xff]  }
0x161a   : > { %6180 = vmatpush3.bf16.msra.mxu1 %v6980_v42  ;;  %v7001_v42 = vld [vmem:[%s8287_s6 + $0x30] sm:$0xff]  }
0x161b   : > { %6181 = vmatprep.subr.bf16.mxu1 %v6981_v61  ;;  %v7002_v61 = vld [vmem:[%s8287_s6 + $0x38] sm:$0xff]  }
0x161e   : > { %6182 = vmatpush3.bf16.msra.mxu1 %v6982_v2 }
0x166a   : > { %v4519_v37 = vpop.f32.mrb[48].mxu1 }
0x166b   : > { %v6512_v53 = vpop.f32.mrb[49].mxu1 }
0x166c   : > { %v4522_v50 = vpop.f32.mrb[50].mxu1  ;;  %v5913_v53 = vld [vmem:[%s8319_s22] ss:$0 sm:$0xff]  ;;  %s8325_s22 = sld [smem:[#allocation34_spill]] }
0x166d   : > { %v6513_v51 = vpop.f32.mrb[51].mxu1 }
0x166e   : > { %v5914_v51 = vld [vmem:[%s8320_s5] ss:$0 sm:$0xff]  ;;  %s8324_s5 = sld [smem:[#allocation33_spill]] }
0x1672   : > { %v4574_v39 = vpop.f32.mrb[52].mxu1 }
0x1673   : > { %v4575_v56 = vadd.f32 %v4574_v39, %v4519_v37  ;;  %v6520_v59 = vpop.f32.mrb[53].mxu1 }
0x1674   : > { %v4577_v62 = vpop.f32.mrb[54].mxu1 }
0x1675   : > { %v6521_v3 = vpop.f32.mrb[55].mxu1  ;;  %v6983_v62 = vld [vmem:[%s8318_s3 + $0x70] sm:$0xff]  }
0x1676   : > { %v6984_v3 = vld [vmem:[%s8318_s3 + $0x30] sm:$0xff]   ;;  %6183 = vmatprep.subr.bf16.mxu1 %v6983_v62 }
0x1677   : > { %6184 = vmatpush3.bf16.msra.mxu1 %v6984_v3 }
0x167a   : > { %v4797_v0 = vpop.f32.mrb[56].mxu1 }
0x167b   : > { %v4803_v4 = vadd.f32 %v4797_v0, %v4575_v56  ;;  %v6538_v45 = vpop.f32.mrb[57].mxu1  ;;  %v6985_v0 = vld [vmem:[%s8318_s3 + $0x78] sm:$0xff]  }
0x167c   : > { %v4800_v5 = vpop.f32.mrb[58].mxu1  ;;  %6185 = vmatprep.subr.bf16.mxu1 %v6985_v0  ;;  %v1479_v45 = vld [vmem:[%s8321_s8] sm:$0x3]  ;;  %s8323_s8 = sld [smem:[#allocation32_spill]] }
0x167d   : > { %v6539_v47 = vpop.f32.mrb[59].mxu1  ;;  %v5068_v5 = vrot.slane %v1479_v45, %v3397_v55  ;;  %v6989_v55 = vld [vmem:[%s8322_s9 + $0x10] sm:$0xff]  }
0x167e   : > { %v5072_v47 = vrot.slane %v1479_v45, %v3401_v58  ;;  %v6990_v58 = vld [vmem:[%s8322_s9 + $0x18] sm:$0xff]   ;;  %s5968_s9 = sshll.u32 %s7460_s0, 6 }
0x167f   : > { %s8194_s12 = scalar_lea.hbm %s7437_s4, %s5968_s9 }
0x16dc   : > { %v5021_v8 = vpop.f32.mrb[60].mxu1 }
0x16dd   : > { %v5027_v10 = vadd.f32 %v5021_v8, %v4803_v4  ;;  %v6556_v11 = vpop.f32.mrb[61].mxu1  ;;  %v6986_v4 = vld [vmem:[%s8318_s3 + $0x38] sm:$0xff]  }
0x16de   : > { %v5024_v17 = vpop.f32.mrb[62].mxu1  ;;  %6186 = vmatpush3.bf16.msra.mxu1 %v6986_v4 }
0x16df   : > { %v5034_v19 = vadd.f32 %v5912_v6, %v5027_v10  ;;  %v6557_v20 = vpop.f32.mrb[63].mxu1  ;;  %6578 = vmatprep.subr.bf16.mxu1 %v7222_v7 }
0x16e1   : > { %v5035_v12 = vadd.f32 %v5034_v19, %v7980_v1 }
0x16e3   : > { %v5036_v13 = vsel %vm4227_vm4, %v5035_v12, 0.0 }
0x16e4   : > { %5037 = vadd.xlane.f32.xlu1 %v5036_v13 }
0x1771   : > { %v5038_v1 = vpop.xlane.xlu1 %5037 }
0x1772   : > { %v5039_v22 = vmul.f32 0.0078125, %v5038_v1  ;;  %v5371_v1 = vpack.c.bf16 %v7977_v43, %v7977_v43 }
0x1774   : > { %v5040_v52 = vsub.f32 %v5035_v12, %v5039_v22 }
0x1776   : > { %v5041_v23 = vmul.f32 %v5040_v52, %v5040_v52 }
0x1778   : > { %v5042_v31 = vsel %vm4227_vm4, %v5041_v23, 0.0 }
0x1779   : > { %5043 = vadd.xlane.f32.xlu0 %v5042_v31 }
0x1806   : > { %v5044_v44 = vpop.xlane.xlu0 %5043 }
0x1807   : > { %v5045_v46 = vmul.f32 0.0078125, %v5044_v44 }
0x1809   : > { %v5046_v48 = vadd.f32 1e-05, %v5045_v46 }
0x180b   : > { %7107 = vrsqrt.f32 %v5046_v48 }
0x1815   : > { %v7108_v37 = vpop.eup %7107 }
0x1816   : > { %v5048_v50 = vmul.f32 %v7108_v37, %v5040_v52  ;;  %v5931_v52 = vld [vmem:[%s8323_s8] ss:$0 sm:$0xff]  ;;  %s1251_s8 = sand.u32 1, %s7165_s10  }
0x1817   : > { %v5948_v37 = vld [vmem:[%s8324_s5] ss:$0 sm:$0xff]  ;;  %s5718_s3 = sshll.u32 %s1251_s8, 2  ;;  %s5562_s14 = scalar_lea.sflag [#allocation3], %s1251_s8 }
0x1818   : > { %v5055_v39 = vmul.f32 %v5913_v53, %v5048_v50  ;;  %v5949_v50 = vld [vmem:[%s8325_s22] ss:$0 sm:$0xff]  ;;  %s1253_s6 = scalar_lea.vmem [#allocation2], %s5718_s3  ;;  %s7223_s5 = smov [#allocation2]  }
0x1819   : > { %s5578_s13 = sshll.u32 %s1253_s6, 4  ;;  %s7115_s17 = sshll.u32 %s7223_s5, 4  ;;  %s5579_s13 = int_to_ptr.vmem [resolvable:$true] %s5578_s13  ;;  %s7116_s17 = int_to_ptr.vmem [resolvable:$false] %s7115_s17 }
0x181a   : > { %v5062_v56 = vadd.f32 %v5914_v51, %v5055_v39  ;;  %s7111_s16 = scalar_lea.vmem %s5579_s13, 64  ;;  %s7117_s22 = scalar_lea.vmem %s7116_s17, 128 }
0x181b   : > { %p7112_p11 = scmp.ne.s32.totalorder %s5579_s13, %s7111_s16  ;;  %p7118_p0 = scmp.lt.s32.totalorder %s5579_s13, %s7116_s17 }
0x181c   : > { %v5063_v59 = vpack.c.bf16 %v5062_v56, %v5062_v56  ;;  %p7119_p1 = scmp.lt.s32.totalorder %s7117_s22, %s7111_s16 }
0x181d   : > { %p7113_p12 = pnand %p7112_p11, %p7477_p5 }
0x181e   : > { %5188 = vmatmul.mubr.bf16.vlgmr.msra.gmra.mrb[48].mxu0 %v5063_v59  ;;  %p7120_p2 = por %p7119_p1, %p7118_p0 }
0x181f   : > { %6574 = vmatprep.mubr.msk.bf16.mxu0 %vm7221_vm2, %v7222_v7  ;;  %6559 = vmatpush3.bf16.msra.mxu0 %v6995_v34  ;;  %p7114_p13 = pneg %p7113_p12 }
0x1820   : > { %6560 = vmatprep.subr.bf16.mxu0 %v7222_v7 }
0x1821   : > { %p7121_p3 = pnand %p7120_p2, %p7114_p13 }
0x1823   : > { %6561 = vmatpush3.bf16.msra.mxu0 %v6996_v18 }
0x1824   : > { %6562 = vmatprep.subr.bf16.mxu0 %v7222_v7 }
0x1827   : > { %6563 = vmatpush3.bf16.msra.mxu0 %v6997_v60 }
0x1828   : > { %6564 = vmatprep.subr.bf16.mxu0 %v7222_v7 }
0x182b   : > { %6565 = vmatpush3.bf16.msra.mxu0 %v6998_v40 }
0x182c   : > { %6566 = vmatprep.subr.bf16.mxu0 %v7222_v7 }
0x182f   : > { %6567 = vmatpush3.bf16.msra.mxu0 %v6999_v9 }
0x1830   : > { %6568 = vmatprep.subr.bf16.mxu0 %v7222_v7 }
0x1833   : > { %6569 = vmatpush3.bf16.msra.mxu0 %v7000_v41 }
0x1834   : > { %6570 = vmatprep.subr.bf16.mxu0 %v7222_v7 }
0x1837   : > { %6571 = vmatpush3.bf16.msra.mxu0 %v7001_v42 }
0x1838   : > { %6572 = vmatprep.subr.bf16.mxu0 %v7222_v7 }
0x183b   : > { %6573 = vmatpush3.bf16.msra.mxu0 %v7002_v61 }
0x18f1   : > { %v5189_v6 = vpop.f32.mrb[48].mxu0 }
0x18f2   : > { %v5190_v8 = vadd.f32 %v5189_v6, %v5068_v5  ;;  %v5191_v10 = vpop.f32.mrb[49].mxu0 }
0x18f3   : > { %v5192_v11 = vadd.f32 %v5191_v10, %v5072_v47  ;;  %v5193_v17 = vpop.f32.mrb[50].mxu0 }
0x18f4   : > { %v5196_v19 = vmax.f32 %v5190_v8, 0.0  ;;  %v5194_v20 = vpop.f32.mrb[51].mxu0 }
0x18f5   : > { %v5197_v12 = vmax.f32 %v5192_v11, 0.0 }
0x18f6   : > { %v5198_v15 = vpack.c.bf16 %v5196_v19, %v5196_v19 }
0x18f7   : > { %v5199_v13 = vpack.c.bf16 %v5197_v12, %v5197_v12 }
0x18f9   : > { %5334 = vmatprep.mubr.bf16.mxu1 %v5199_v13 }
0x18fa   : > { %5335 = vmatmul.mubr.bf16.vlgmr.msra.gmra.mrb[64].mxu1 %v5198_v15 }
0x18fb   : > { %6579 = vmatpush3.bf16.msra.mxu1 %v6987_v14  ;;  %6594 = vmatprep.mubr.msk.bf16.mxu1 %vm7221_vm2, %v7222_v7 }
0x18fc   : > { %6580 = vmatprep.subr.bf16.mxu1 %v7222_v7 }
0x18ff   : > { %6581 = vmatpush3.bf16.msra.mxu1 %v6988_v54 }
0x1900   : > { %6582 = vmatprep.subr.bf16.mxu1 %v7222_v7 }
0x1903   : > { %6583 = vmatpush3.bf16.msra.mxu1 %v6989_v55 }
0x1904   : > { %6584 = vmatprep.subr.bf16.mxu1 %v7222_v7 }
0x1907   : > { %6585 = vmatpush3.bf16.msra.mxu1 %v6990_v58 }
0x1908   : > { %6586 = vmatprep.subr.bf16.mxu1 %v7222_v7 }
0x190b   : > { %6587 = vmatpush3.bf16.msra.mxu1 %v6991_v16 }
0x190c   : > { %6588 = vmatprep.subr.bf16.mxu1 %v7222_v7 }
0x190f   : > { %6589 = vmatpush3.bf16.msra.mxu1 %v6992_v49 }
0x1910   : > { %6590 = vmatprep.subr.bf16.mxu1 %v7222_v7 }
0x1913   : > { %6591 = vmatpush3.bf16.msra.mxu1 %v6993_v24 }
0x1914   : > { %6592 = vmatprep.subr.bf16.mxu1 %v7222_v7 }
0x1917   : > { %6593 = vmatpush3.bf16.msra.mxu1 %v6994_v21 }
0x191a   : > { %6595 = vmatmul.mubr.bf16.vlgmr.msra.gmra.mrb[68].mxu1 %v5371_v1 }
0x19cd   : > { %v6187_v22 = vpop.f32.mrb[64].mxu1 }
0x19ce   : > { %v6188_v23 = vpop.f32.mrb[65].mxu1 }
0x19cf   : > { %v6189_v31 = vadd.f32 %v6188_v23, %v6187_v22  ;;  %v6190_v27 = vpop.f32.mrb[66].mxu1 }
0x19d0   : > { %v6191_v33 = vpop.f32.mrb[67].mxu1 }
0x19d1   : > { %v5337_v57 = vadd.f32 %v6189_v31, %v5931_v52 }
0x19d3   : > { %v5342_v63 = vadd.f32 %v5337_v57, %v5062_v56 }
0x19d5   : > { %v5343_v32 = vsel %vm4227_vm4, %v5342_v63, 0.0 }
0x19d6   : > { %5344 = vadd.xlane.f32.xlu1 %v5343_v32 }
0x19ed   : > { %v8172_v30 = vpop.f32.mrb[68].mxu1 }
0x19ee   : > { %v6596_v43 = vpop.f32.mrb[69].mxu1 }
0x19ef   : > { %v5546_v35 = vpop.f32.mrb[70].mxu1 }
0x19f0   : > { %v6597_v36 = vpop.f32.mrb[71].mxu1 }
0x1a63   : > { %v5345_v29 = vpop.xlane.xlu1 %5344 }
0x1a64   : > { %v5346_v25 = vmul.f32 0.0078125, %v5345_v29 }
0x1a66   : > { %v5347_v26 = vsub.f32 %v5342_v63, %v5346_v25 }
0x1a68   : > { %v5348_v28 = vmul.f32 %v5347_v26, %v5347_v26 }
0x1a6a   : > { %v5349_v38 = vsel %vm4227_vm4, %v5348_v28, 0.0 }
0x1a6b   : > { %5350 = vadd.xlane.f32.xlu0 %v5349_v38 }
0x1af8   : > { %v5351_v2 = vpop.xlane.xlu0 %5350 }
0x1af9   : > { %v5352_v44 = vmul.f32 0.0078125, %v5351_v2 }
0x1afb   : > { %v5353_v46 = vadd.f32 1e-05, %v5352_v44 }
0x1afd   : > { %7109 = vrsqrt.f32 %v5353_v46 }
0x1b07   : > { %v7110_v48 = vpop.eup %7109 }
0x1b08   : > { %v5355_v53 = vmul.f32 %v7110_v48, %v5347_v26 }
0x1b0a   : > { %v5362_v51 = vmul.f32 %v5948_v37, %v5355_v53 }
0x1b0c   : > { %v5369_v39 = vadd.f32 %v5949_v50, %v5362_v51 }
0x1b0e   : > { %v5372_v56 = vpack.c.bf16 %v5369_v39, %v5369_v39  ;;  %5370 = vst [vmem:[%s1253_s6] sm:$0xf] %v5369_v39 }
0x1b10   : > { %6575 = vmatmul.mubr.bf16.vlgmr.msra.gmra.mrb[52].mxu0 %v5372_v56 }
0x1b11   : > { %7124 = shalt.err (!%p7121_p3)
}
0x1b12   : > { %s7125_s9 = scalar_lea.hbm %s8194_s12, 64  ;;  %s7129_s6 = scalar_lea.hbm %s7437_s4, 128 }
0x1b13   : > { %p7126_p4 = scmp.ne.s32.totalorder %s8194_s12, %s7125_s9  ;;  %p7130_p9 = scmp.lt.u32.totalorder %s8194_s12, %s7437_s4 }
0x1b14   : > { %p7131_p10 = scmp.lt.u32.totalorder %s7129_s6, %s7125_s9  ;;  %p7133_p12 = scmp.lt.u32.totalorder %s7125_s9, %s8194_s12 }
0x1b15   : > { %p7127_p7 = pnand %p7126_p4, %p7477_p5 }
0x1b16   : > { %p7132_p11 = por %p7131_p10, %p7130_p9 }
0x1b17   : > { %p7128_p8 = pneg %p7127_p7 }
0x1b18   : > { %p7134_p0 = por %p7133_p12, %p7132_p11 }
0x1b1a   : > { %p7135_p13 = pnand %p7134_p0, %p7128_p8 }
0x1b1c   : > { %7138 = shalt.err (!%p7135_p13)
}
0x1b1d   : > { %6696 = dma.vmem_to_hbm [thread:$0]  (%p7477_p5), %s5579_s13, 64, %s8194_s12, %s5562_s14   ;;  %v5966_v7 = vld [vmem:[%s7427_s20] ss:$0 sm:$0xff] }
0x1b1e   : > { %s5723_s17 = sshll.u32 %s7489_s2, 2 }
0x1b1f   : > { %s1267_s0 = scalar_lea.vmem %s7432_s30, %s5723_s17 }
0x1be3   : > { %v5455_v59 = vpop.f32.mrb[52].mxu0 }
0x1be4   : > { %v5544_v62 = vadd.f32 %v8172_v30, %v5455_v59  ;;  %v6576_v3 = vpop.f32.mrb[53].mxu0 }
0x1be5   : > { %v5458_v0 = vpop.f32.mrb[54].mxu0 }
0x1be6   : > { %v5555_v4 = vadd.f32 %v5966_v7, %v5544_v62  ;;  %v6577_v45 = vpop.f32.mrb[55].mxu0 }
0x1be8   : > { %5556 = vst [vmem:[%s1267_s0] sm:$0xf] %v5555_v4 }
0x1be9 PF: > { %p6702_p1 = scmp.ge.s32.totalorder %s7173_s15, 2  ;;  %s5597_s28 = sand.u32 1, %s7161_s7  }
0x1bea   : > { %s5598_s13 = scalar_lea.sflag [#allocation3], %s5597_s28 }
0x1beb   : > { %p6699_p2 = pnand %p6702_p1, %p7481_p6 }
0x1bed   : > { %7156 = dma.done.wait (!%p6699_p2), %s5598_s13, 64  }
0x1bee   : > { %7158 = vsyncadd (!%p6699_p2), %s5598_s13, 4294967232  ;;  %p94_p5 = scmp.ge.s32.totalorder %s7464_s18, 4   ;;  %s8326_s7 = smov %s7165_s10 }
0x1bef   : > { %s8327_s10 = smov %s7169_s11  ;;  %s8328_s11 = smov %s7475_s26 }
0x1bf0   : > { %s8329_s15 = smov %s7464_s18  ;;  %96 = sbr.rel (!%p94_p5) target bundleno = 79 (0x4f), region = 271 }
0x1bf7   :  { %5603 = vsyncpa [#allocation3], 1 }
0x1bf8   :  { %5605 = vsyncpa [#allocation3 + $0x1], 1 }

</bundles_post_ra>
